<compile_context>
chip_gen: v7x
topology: tpu7x:2x2x1
jax: 0.10.0
libtpu: 0.0.40
codegen_flags: <defaults>
</compile_context>

<pallas_src>
import math

import jax
import jax.numpy as jnp
from jax import lax
from jax.experimental import pallas as pl
from jax.experimental.pallas import tpu as pltpu

EPS = 1e-5          # nn.LayerNorm default eps
LEAKY_SLOPE = 0.01  # nn.LeakyReLU default negative_slope


# ------------------------------- small helpers -------------------------------
def _vmem_specs(n):
    return [pl.BlockSpec(memory_space=pltpu.MemorySpace.VMEM) for _ in range(n)]


def _vmem_limit_bytes(entries):
    """entries: iterable of (shape, dtype). 2x margin, clamped to a budget that
    is safe on every TPU generation (v5e scoped default 16 MiB, v7x phys 64 MiB)."""
    total = sum(math.prod(s) * jnp.dtype(d).itemsize for s, d in entries)
    return int(min(max(2 * total + (4 << 20), 16 << 20), 48 << 20))


def _gate_dtype():
    """bf16 gate/state math where the VPU/EUP support bf16 (v6e, v7x); f32 on
    v5e and older (no bf16 VPU/EUP)."""
    try:
        kind = jax.devices()[0].device_kind.lower()
    except Exception:
        return jnp.float32
    if "tpu" not in kind:
        return jnp.float32
    if any(v in kind for v in ("v2", "v3", "v4", "v5")):
        return jnp.float32
    return jnp.bfloat16


def _layernorm(x, g, b):
    mean = jnp.mean(x, axis=-1, keepdims=True)
    xc = x - mean
    var = jnp.mean(xc * xc, axis=-1, keepdims=True)
    return xc * lax.rsqrt(var + EPS) * g + b


# ------------------- shared fused bidirectional recurrence -------------------
def _bilstm_recurrence(gx_ref, whh_cat, T, B, H, gate_dtype, hseq_ref=None):
    """gx_ref: (T*B, 8H) f32 VMEM scratch holding [fwd i,f,g,o | bwd i,f,g,o];
    whh_cat: (2H, 8H) bf16 block-diagonal recurrent weight (already loaded);
    hseq_ref: optional (T, B, 2H) bf16 output ([fwd | bwd] packed along lanes).
    Returns the final lane-concatenated hidden state [h_fwd_T-1 | h_bwd_0]."""
    H4 = 4 * H

    def cell(g, c):
        g = g.astype(gate_dtype)                 # PyTorch gate order: i, f, g, o
        i = jax.nn.sigmoid(g[:, 0:H])
        f = jax.nn.sigmoid(g[:, H:2 * H])
        gg = jnp.tanh(g[:, 2 * H:3 * H])
        o = jax.nn.sigmoid(g[:, 3 * H:4 * H])
        c_new = f * c + i * gg
        h_new = o * jnp.tanh(c_new)
        return h_new, c_new

    def step(t, carry):
        hcat, cf, cb = carry
        tb = T - 1 - t
        # single block-diagonal matmul -> [g_hh_fwd | g_hh_bwd]
        g_hh = jnp.dot(hcat.astype(jnp.bfloat16), whh_cat,
                       preferred_element_type=jnp.float32)
        # lane-aligned half-row slices of the precomputed input gates
        gx_f = gx_ref[pl.ds(t * B, B), 0:H4]
        gx_b = gx_ref[pl.ds(tb * B, B), H4:2 * H4]
        hf_n, cf_n = cell(gx_f + g_hh[:, 0:H4], cf)
        hb_n, cb_n = cell(gx_b + g_hh[:, H4:2 * H4], cb)
        if hseq_ref is not None:
            hseq_ref[t, :, 0:H] = hf_n.astype(hseq_ref.dtype)
            hseq_ref[tb, :, H:2 * H] = hb_n.astype(hseq_ref.dtype)
        hcat_n = jnp.concatenate([hf_n, hb_n], axis=-1)
        return hcat_n, cf_n, cb_n

    z_h = jnp.zeros((B, H), gate_dtype)
    z_2h = jnp.zeros((B, 2 * H), gate_dtype)
    unroll = T if T <= 16 else 4                 # full unroll for short static T
    hcat, _, _ = lax.fori_loop(0, T, step, (z_2h, z_h, z_h), unroll=unroll)
    return hcat


# ----------------- layer 0: LayerNorm + input proj + recurrence --------------
def _make_first_layer_kernel(T, B, H, gate_dtype):
    def kernel(emb_ref, g1_ref, b1_ref, wih_ref, bih_ref, whh_ref,
               hseq_ref, gx_ref):
        x = emb_ref[...].astype(jnp.float32)                    # (T*B, E)
        xn = _layernorm(x, g1_ref[...], b1_ref[...])
        gx = jnp.dot(xn.astype(jnp.bfloat16), wih_ref[...],
                     preferred_element_type=jnp.float32) + bih_ref[...]
        gx_ref[...] = gx                                        # stays in VMEM
        _bilstm_recurrence(gx_ref, whh_ref[...], T, B, H, gate_dtype,
                           hseq_ref=hseq_ref)
    return kernel


def first_layer(emb, g1, b1, wih, bih, whh_cat, *, T, B, H, gate_dtype):
    entries = [(emb.shape, emb.dtype), (wih.shape, wih.dtype),
               (whh_cat.shape, whh_cat.dtype),
               ((T, B, 2 * H), jnp.bfloat16), ((T * B, 8 * H), jnp.float32)]
    return pl.pallas_call(
        _make_first_layer_kernel(T, B, H, gate_dtype),
        out_shape=jax.ShapeDtypeStruct((T, B, 2 * H), jnp.bfloat16),
        in_specs=_vmem_specs(6),
        out_specs=pl.BlockSpec(memory_space=pltpu.MemorySpace.VMEM),
        scratch_shapes=[pltpu.VMEM((T * B, 8 * H), jnp.float32)],
        compiler_params=pltpu.CompilerParams(
            vmem_limit_bytes=_vmem_limit_bytes(entries)),
    )(emb, g1, b1, wih, bih, whh_cat)


# -------------- middle layers (>=1, non-final): proj + recurrence ------------
def _make_mid_layer_kernel(T, B, H, gate_dtype):
    def kernel(hin_ref, wih_ref, bih_ref, whh_ref, hseq_ref, gx_ref):
        gx = jnp.dot(hin_ref[...], wih_ref[...],
                     preferred_element_type=jnp.float32) + bih_ref[...]
        gx_ref[...] = gx
        _bilstm_recurrence(gx_ref, whh_ref[...], T, B, H, gate_dtype,
                           hseq_ref=hseq_ref)
    return kernel


def mid_layer(hin, wih, bih, whh_cat, *, T, B, H, gate_dtype):
    entries = [(hin.shape, hin.dtype), (wih.shape, wih.dtype),
               (whh_cat.shape, whh_cat.dtype),
               ((T, B, 2 * H), jnp.bfloat16), ((T * B, 8 * H), jnp.float32)]
    return pl.pallas_call(
        _make_mid_layer_kernel(T, B, H, gate_dtype),
        out_shape=jax.ShapeDtypeStruct((T, B, 2 * H), jnp.bfloat16),
        in_specs=_vmem_specs(4),
        out_specs=pl.BlockSpec(memory_space=pltpu.MemorySpace.VMEM),
        scratch_shapes=[pltpu.VMEM((T * B, 8 * H), jnp.float32)],
        compiler_params=pltpu.CompilerParams(
            vmem_limit_bytes=_vmem_limit_bytes(entries)),
    )(hin, wih, bih, whh_cat)


# ---------- final layer: proj + recurrence + head (fc1->LN->LReLU->fc2) ------
def _make_final_layer_kernel(T, B, H, gate_dtype):
    def kernel(hin_ref, wih_ref, bih_ref, whh_ref,
               fc1w_ref, fc1b_ref, g2_ref, b2_ref, fc2w_ref, fc2b_ref,
               pred_ref, gx_ref):
        gx = jnp.dot(hin_ref[...], wih_ref[...],
                     preferred_element_type=jnp.float32) + bih_ref[...]
        gx_ref[...] = gx
        # final layer: only the last hidden states are needed -> no hseq stores
        hcat = _bilstm_recurrence(gx_ref, whh_ref[...], T, B, H, gate_dtype,
                                  hseq_ref=None)
        # head == torch: fc1 -> LayerNorm -> LeakyReLU -> Dropout(eval=id) -> fc2
        x = jnp.dot(hcat.astype(jnp.bfloat16), fc1w_ref[...],
                    preferred_element_type=jnp.float32) + fc1b_ref[...]
        x = _layernorm(x, g2_ref[...], b2_ref[...])
        x = jnp.where(x >= 0, x, LEAKY_SLOPE * x)
        pred = jnp.dot(x, fc2w_ref[...],
                       preferred_element_type=jnp.float32) + fc2b_ref[...]
        pred_ref[...] = pred.astype(pred_ref.dtype)
    return kernel


def final_layer(hin, wih, bih, whh_cat, fc1w, fc1b, g2, b2, fc2w, fc2b,
                *, T, B, H, gate_dtype):
    out_dim = fc2w.shape[1]
    entries = [(hin.shape, hin.dtype), (wih.shape, wih.dtype),
               (whh_cat.shape, whh_cat.dtype), (fc1w.shape, fc1w.dtype),
               ((T * B, 8 * H), jnp.float32)]
    return pl.pallas_call(
        _make_final_layer_kernel(T, B, H, gate_dtype),
        out_shape=jax.ShapeDtypeStruct((B, out_dim), jnp.float32),
        in_specs=_vmem_specs(10),
        out_specs=pl.BlockSpec(memory_space=pltpu.MemorySpace.VMEM),
        scratch_shapes=[pltpu.VMEM((T * B, 8 * H), jnp.float32)],
        compiler_params=pltpu.CompilerParams(
            vmem_limit_bytes=_vmem_limit_bytes(entries)),
    )(hin, wih, bih, whh_cat, fc1w, fc1b, g2, b2, fc2w, fc2b)


# ------------------------------ Parameter init -------------------------------
def init_params(key, vocab_size, embedding_dim, output_dim,
                hidden_dim=64, num_layers=2):
    keys = iter(jax.random.split(key, 64))
    H = hidden_dim
    mid = hidden_dim * 2 // 3

    def rnd(shape, dtype=jnp.float32):
        return (0.1 * jax.random.normal(next(keys), shape, jnp.float32)).astype(dtype)

    p = {
        "embedding": rnd((vocab_size, embedding_dim)),
        "norm1_g": jnp.ones((1, embedding_dim), jnp.float32),
        "norm1_b": jnp.zeros((1, embedding_dim), jnp.float32),
        "fc1_w": rnd((2 * H, mid), jnp.bfloat16),
        "fc1_b": rnd((1, mid)),
        "norm2_g": jnp.ones((1, mid), jnp.float32),
        "norm2_b": jnp.zeros((1, mid), jnp.float32),
        "fc2_w": rnd((mid, output_dim)),
        "fc2_b": rnd((1, output_dim)),
        "lstm": [],
    }
    for layer in range(num_layers):
        in_dim = embedding_dim if layer == 0 else 2 * H
        whh_f = rnd((H, 4 * H))
        whh_b = rnd((H, 4 * H))
        # block-diagonal recurrent weight: [h_fwd | h_bwd] @ whh_cat = [g_f | g_b]
        whh_cat = jnp.zeros((2 * H, 8 * H), jnp.float32)
        whh_cat = whh_cat.at[0:H, 0:4 * H].set(whh_f)
        whh_cat = whh_cat.at[H:2 * H, 4 * H:8 * H].set(whh_b)
        p["lstm"].append({
            # input->gate weight, both directions: cols = [fwd i,f,g,o | bwd i,f,g,o]
            "w_ih": rnd((in_dim, 8 * H), jnp.bfloat16),
            # combined (b_ih + b_hh) bias for both directions
            "b": rnd((1, 8 * H)),
            "whh_cat": whh_cat.astype(jnp.bfloat16),
        })
    return p


# --------------------------------- Forward -----------------------------------
def birnn_relu_forward(params, words):
    # words: (B, T) int32
    B, T = words.shape
    layers = params["lstm"]
    L = len(layers)
    assert L >= 2, "this implementation expects num_layers >= 2 (module default)"
    H = layers[0]["whh_cat"].shape[0] // 2
    gate_dtype = _gate_dtype()

    # TODO(synk): the embedding gather stays in XLA (jnp.take); a Pallas version
    # would need PrefetchScalarGridSpec + a pl.Element row gather.
    ids_tm = jnp.transpose(words, (1, 0)).reshape(-1)            # time-major ids
    emb = jnp.take(params["embedding"], ids_tm, axis=0)          # (T*B, E)

    l0 = layers[0]
    hseq = first_layer(emb, params["norm1_g"], params["norm1_b"],
                       l0["w_ih"], l0["b"], l0["whh_cat"],
                       T=T, B=B, H=H, gate_dtype=gate_dtype)     # (T, B, 2H) bf16

    for li in range(1, L - 1):
        lp = layers[li]
        hseq = mid_layer(hseq.reshape(T * B, 2 * H),             # metadata reshape
                         lp["w_ih"], lp["b"], lp["whh_cat"],
                         T=T, B=B, H=H, gate_dtype=gate_dtype)
        # inter-layer LSTM dropout is identity in eval mode

    lp = layers[L - 1]
    pred = final_layer(hseq.reshape(T * B, 2 * H),
                       lp["w_ih"], lp["b"], lp["whh_cat"],
                       params["fc1_w"], params["fc1_b"],
                       params["norm2_g"], params["norm2_b"],
                       params["fc2_w"], params["fc2_b"],
                       T=T, B=B, H=H, gate_dtype=gate_dtype)     # (B, output_dim)
    return {"pred": pred}


if __name__ == "__main__":
    VOCAB = 50
    EMBED = 32
    HIDDEN = 32
    OUTPUT = 4
    NUM_LAYERS = 2
    B, T = 8, 8

    key = jax.random.PRNGKey(0)
    k_params, k_words = jax.random.split(key)
    params = init_params(k_params, VOCAB, EMBED, OUTPUT,
                         hidden_dim=HIDDEN, num_layers=NUM_LAYERS)
    words = jax.random.randint(k_words, (B, T), 0, VOCAB, dtype=jnp.int32)

    fwd = jax.jit(birnn_relu_forward)
    out = fwd(params, words)
    pred = jax.block_until_ready(out["pred"])
    assert pred.shape == (B, OUTPUT)
    assert bool(jnp.all(jnp.isfinite(pred)))
    print("KERNEL_OK")
</pallas_src>

<mosaic_0001>
module attributes {stable_mosaic.version = 11 : i64} {
  func.func @kernel(%arg0: memref<64x32xf32, #tpu.memory_space<vmem>>, %arg1: memref<1x32xf32, #tpu.memory_space<vmem>>, %arg2: memref<1x32xf32, #tpu.memory_space<vmem>>, %arg3: memref<32x256xbf16, #tpu.memory_space<vmem>>, %arg4: memref<1x256xf32, #tpu.memory_space<vmem>>, %arg5: memref<64x256xbf16, #tpu.memory_space<vmem>>, %arg6: memref<8x8x64xbf16, #tpu.memory_space<vmem>>, %arg7: memref<64x256xf32, #tpu.memory_space<vmem>>) attributes {dimension_semantics = [], scalar_prefetch = 0 : i64, scratch_operands = 1 : i64, tpu.core_type = #tpu.core_type<tc>} {
    %c0 = arith.constant 0 : index
    %c0_0 = arith.constant 0 : index
    %0 = vector.load %arg0[%c0, %c0_0] : memref<64x32xf32, #tpu.memory_space<vmem>>, vector<64x32xf32>
    %c0_1 = arith.constant 0 : index
    %c0_2 = arith.constant 0 : index
    %1 = vector.load %arg1[%c0_1, %c0_2] : memref<1x32xf32, #tpu.memory_space<vmem>>, vector<1x32xf32>
    %c0_3 = arith.constant 0 : index
    %c0_4 = arith.constant 0 : index
    %2 = vector.load %arg2[%c0_3, %c0_4] : memref<1x32xf32, #tpu.memory_space<vmem>>, vector<1x32xf32>
    %cst = arith.constant dense<0.000000e+00> : vector<64xf32>
    %3 = vector.multi_reduction <add>, %0, %cst [1] : vector<64x32xf32> to vector<64xf32>
    %4 = vector.shape_cast %3 : vector<64xf32> to vector<64x1xf32>
    %cst_5 = arith.constant 3.200000e+01 : f32
    %5 = vector.broadcast %cst_5 : f32 to vector<64x1xf32>
    %6 = arith.divf %4, %5 : vector<64x1xf32>
    %7 = vector.broadcast %6 : vector<64x1xf32> to vector<64x32xf32>
    %8 = arith.subf %0, %7 : vector<64x32xf32>
    %9 = arith.mulf %8, %8 : vector<64x32xf32>
    %cst_6 = arith.constant dense<0.000000e+00> : vector<64xf32>
    %10 = vector.multi_reduction <add>, %9, %cst_6 [1] : vector<64x32xf32> to vector<64xf32>
    %11 = vector.shape_cast %10 : vector<64xf32> to vector<64x1xf32>
    %cst_7 = arith.constant 3.200000e+01 : f32
    %12 = vector.broadcast %cst_7 : f32 to vector<64x1xf32>
    %13 = arith.divf %11, %12 : vector<64x1xf32>
    %cst_8 = arith.constant 9.99999974E-6 : f32
    %14 = vector.broadcast %cst_8 : f32 to vector<64x1xf32>
    %15 = arith.addf %13, %14 : vector<64x1xf32>
    %16 = math.rsqrt %15 : vector<64x1xf32>
    %17 = vector.broadcast %16 : vector<64x1xf32> to vector<64x32xf32>
    %18 = arith.mulf %8, %17 : vector<64x32xf32>
    %19 = vector.broadcast %1 : vector<1x32xf32> to vector<64x32xf32>
    %20 = arith.mulf %18, %19 : vector<64x32xf32>
    %21 = vector.broadcast %2 : vector<1x32xf32> to vector<64x32xf32>
    %22 = arith.addf %20, %21 : vector<64x32xf32>
    %23 = arith.truncf %22 : vector<64x32xf32> to vector<64x32xbf16>
    %c0_9 = arith.constant 0 : index
    %c0_10 = arith.constant 0 : index
    %24 = vector.load %arg3[%c0_9, %c0_10] : memref<32x256xbf16, #tpu.memory_space<vmem>>, vector<32x256xbf16>
    %cst_11 = arith.constant dense<0.000000e+00> : vector<64x256xf32>
    %25 = tpu.matmul %23, %24, %cst_11 {dimension_numbers = #tpu.dot_dimension_numbers<[1], [0], [0], [1], [0, 0, 1, 1], [], []>} : vector<64x32xbf16>, vector<32x256xbf16>, vector<64x256xf32> -> vector<64x256xf32>
    %c0_12 = arith.constant 0 : index
    %c0_13 = arith.constant 0 : index
    %26 = vector.load %arg4[%c0_12, %c0_13] : memref<1x256xf32, #tpu.memory_space<vmem>>, vector<1x256xf32>
    %27 = vector.broadcast %26 : vector<1x256xf32> to vector<64x256xf32>
    %28 = arith.addf %25, %27 : vector<64x256xf32>
    %c0_14 = arith.constant 0 : index
    %c0_15 = arith.constant 0 : index
    %29 = vector.load %arg7[%c0_14, %c0_15] : memref<64x256xf32, #tpu.memory_space<vmem>>, vector<64x256xf32>
    tpu.vector_store %arg7[%c0_14, %c0_15], %28 {strides = array<i32>} : memref<64x256xf32, #tpu.memory_space<vmem>>, vector<64x256xf32>,
    %c0_16 = arith.constant 0 : index
    %c0_17 = arith.constant 0 : index
    %30 = vector.load %arg5[%c0_16, %c0_17] : memref<64x256xbf16, #tpu.memory_space<vmem>>, vector<64x256xbf16>
    %cst_18 = arith.constant 0.000000e+00 : f32
    %31 = vector.broadcast %cst_18 : f32 to vector<8x32xf32>
    %cst_19 = arith.constant 0.000000e+00 : f32
    %32 = vector.broadcast %cst_19 : f32 to vector<8x64xf32>
    %c0_i32 = arith.constant 0 : i32
    %c7_i32 = arith.constant 7 : i32
    %33 = arith.subi %c7_i32, %c0_i32 : i32
    %34 = arith.truncf %32 : vector<8x64xf32> to vector<8x64xbf16>
    %cst_20 = arith.constant dense<0.000000e+00> : vector<8x256xf32>
    %35 = tpu.matmul %34, %30, %cst_20 {dimension_numbers = #tpu.dot_dimension_numbers<[1], [0], [0], [1], [0, 0, 1, 1], [], []>} : vector<8x64xbf16>, vector<64x256xbf16>, vector<8x256xf32> -> vector<8x256xf32>
    %c8_i32 = arith.constant 8 : i32
    %36 = arith.muli %c0_i32, %c8_i32 : i32
    %37 = arith.index_cast %36 : i32 to index
    %c0_21 = arith.constant 0 : index
    %38 = vector.load %arg7[%37, %c0_21] : memref<64x256xf32, #tpu.memory_space<vmem>>, vector<8x128xf32>
    %c8_i32_22 = arith.constant 8 : i32
    %39 = arith.muli %33, %c8_i32_22 : i32
    %40 = arith.index_cast %39 : i32 to index
    %c128 = arith.constant 128 : index
    %41 = vector.load %arg7[%40, %c128] : memref<64x256xf32, #tpu.memory_space<vmem>>, vector<8x128xf32>
    %42 = vector.extract_strided_slice %35 {offsets = [0, 0], sizes = [8, 128], strides = [1, 1]} : vector<8x256xf32> to vector<8x128xf32>
    %43 = arith.addf %38, %42 : vector<8x128xf32>
    %44 = vector.extract_strided_slice %43 {offsets = [0, 0], sizes = [8, 32], strides = [1, 1]} : vector<8x128xf32> to vector<8x32xf32>
    %45 = arith.negf %44 : vector<8x32xf32>
    %46 = math.exp %45 : vector<8x32xf32>
    %cst_23 = arith.constant 1.000000e+00 : f32
    %47 = vector.broadcast %cst_23 : f32 to vector<8x32xf32>
    %48 = arith.addf %47, %46 : vector<8x32xf32>
    %49 = arith.divf %47, %48 : vector<8x32xf32>
    %50 = vector.extract_strided_slice %43 {offsets = [0, 32], sizes = [8, 32], strides = [1, 1]} : vector<8x128xf32> to vector<8x32xf32>
    %51 = arith.negf %50 : vector<8x32xf32>
    %52 = math.exp %51 : vector<8x32xf32>
    %cst_24 = arith.constant 1.000000e+00 : f32
    %53 = vector.broadcast %cst_24 : f32 to vector<8x32xf32>
    %54 = arith.addf %53, %52 : vector<8x32xf32>
    %55 = arith.divf %53, %54 : vector<8x32xf32>
    %56 = vector.extract_strided_slice %43 {offsets = [0, 64], sizes = [8, 32], strides = [1, 1]} : vector<8x128xf32> to vector<8x32xf32>
    %57 = math.tanh %56 : vector<8x32xf32>
    %58 = vector.extract_strided_slice %43 {offsets = [0, 96], sizes = [8, 32], strides = [1, 1]} : vector<8x128xf32> to vector<8x32xf32>
    %59 = arith.negf %58 : vector<8x32xf32>
    %60 = math.exp %59 : vector<8x32xf32>
    %cst_25 = arith.constant 1.000000e+00 : f32
    %61 = vector.broadcast %cst_25 : f32 to vector<8x32xf32>
    %62 = arith.addf %61, %60 : vector<8x32xf32>
    %63 = arith.divf %61, %62 : vector<8x32xf32>
    %64 = arith.mulf %55, %31 : vector<8x32xf32>
    %65 = arith.mulf %49, %57 : vector<8x32xf32>
    %66 = arith.addf %64, %65 : vector<8x32xf32>
    %67 = math.tanh %66 : vector<8x32xf32>
    %68 = arith.mulf %63, %67 : vector<8x32xf32>
    %69 = vector.extract_strided_slice %35 {offsets = [0, 128], sizes = [8, 128], strides = [1, 1]} : vector<8x256xf32> to vector<8x128xf32>
    %70 = arith.addf %41, %69 : vector<8x128xf32>
    %71 = vector.extract_strided_slice %70 {offsets = [0, 0], sizes = [8, 32], strides = [1, 1]} : vector<8x128xf32> to vector<8x32xf32>
    %72 = arith.negf %71 : vector<8x32xf32>
    %73 = math.exp %72 : vector<8x32xf32>
    %cst_26 = arith.constant 1.000000e+00 : f32
    %74 = vector.broadcast %cst_26 : f32 to vector<8x32xf32>
    %75 = arith.addf %74, %73 : vector<8x32xf32>
    %76 = arith.divf %74, %75 : vector<8x32xf32>
    %77 = vector.extract_strided_slice %70 {offsets = [0, 32], sizes = [8, 32], strides = [1, 1]} : vector<8x128xf32> to vector<8x32xf32>
    %78 = arith.negf %77 : vector<8x32xf32>
    %79 = math.exp %78 : vector<8x32xf32>
    %cst_27 = arith.constant 1.000000e+00 : f32
    %80 = vector.broadcast %cst_27 : f32 to vector<8x32xf32>
    %81 = arith.addf %80, %79 : vector<8x32xf32>
    %82 = arith.divf %80, %81 : vector<8x32xf32>
    %83 = vector.extract_strided_slice %70 {offsets = [0, 64], sizes = [8, 32], strides = [1, 1]} : vector<8x128xf32> to vector<8x32xf32>
    %84 = math.tanh %83 : vector<8x32xf32>
    %85 = vector.extract_strided_slice %70 {offsets = [0, 96], sizes = [8, 32], strides = [1, 1]} : vector<8x128xf32> to vector<8x32xf32>
    %86 = arith.negf %85 : vector<8x32xf32>
    %87 = math.exp %86 : vector<8x32xf32>
    %cst_28 = arith.constant 1.000000e+00 : f32
    %88 = vector.broadcast %cst_28 : f32 to vector<8x32xf32>
    %89 = arith.addf %88, %87 : vector<8x32xf32>
    %90 = arith.divf %88, %89 : vector<8x32xf32>
    %91 = arith.mulf %82, %31 : vector<8x32xf32>
    %92 = arith.mulf %76, %84 : vector<8x32xf32>
    %93 = arith.addf %91, %92 : vector<8x32xf32>
    %94 = math.tanh %93 : vector<8x32xf32>
    %95 = arith.mulf %90, %94 : vector<8x32xf32>
    %96 = arith.truncf %68 : vector<8x32xf32> to vector<8x32xbf16>
    %97 = arith.index_cast %c0_i32 : i32 to index
    %c0_29 = arith.constant 0 : index
    %c0_30 = arith.constant 0 : index
    %98 = vector.load %arg6[%97, %c0_29, %c0_30] : memref<8x8x64xbf16, #tpu.memory_space<vmem>>, vector<1x8x32xbf16>
    %99 = vector.shape_cast %98 : vector<1x8x32xbf16> to vector<8x32xbf16>
    %100 = vector.shape_cast %96 : vector<8x32xbf16> to vector<1x8x32xbf16>
    tpu.vector_store %arg6[%97, %c0_29, %c0_30], %100 {strides = array<i32>} : memref<8x8x64xbf16, #tpu.memory_space<vmem>>, vector<1x8x32xbf16>,
    %101 = arith.truncf %95 : vector<8x32xf32> to vector<8x32xbf16>
    %102 = arith.index_cast %33 : i32 to index
    %c0_31 = arith.constant 0 : index
    %c32 = arith.constant 32 : index
    %103 = vector.load %arg6[%102, %c0_31, %c32] : memref<8x8x64xbf16, #tpu.memory_space<vmem>>, vector<1x8x32xbf16>
    %104 = vector.shape_cast %103 : vector<1x8x32xbf16> to vector<8x32xbf16>
    %105 = vector.shape_cast %101 : vector<8x32xbf16> to vector<1x8x32xbf16>
    tpu.vector_store %arg6[%102, %c0_31, %c32], %105 {strides = array<i32>} : memref<8x8x64xbf16, #tpu.memory_space<vmem>>, vector<1x8x32xbf16>,
    %106 = tpu.concatenate %68, %95 in 1 : vector<8x32xf32>, vector<8x32xf32> -> vector<8x64xf32>
    %c1_i32 = arith.constant 1 : i32
    %c7_i32_32 = arith.constant 7 : i32
    %107 = arith.subi %c7_i32_32, %c1_i32 : i32
    %108 = arith.truncf %106 : vector<8x64xf32> to vector<8x64xbf16>
    %cst_33 = arith.constant dense<0.000000e+00> : vector<8x256xf32>
    %109 = tpu.matmul %108, %30, %cst_33 {dimension_numbers = #tpu.dot_dimension_numbers<[1], [0], [0], [1], [0, 0, 1, 1], [], []>} : vector<8x64xbf16>, vector<64x256xbf16>, vector<8x256xf32> -> vector<8x256xf32>
    %c8_i32_34 = arith.constant 8 : i32
    %110 = arith.muli %c1_i32, %c8_i32_34 : i32
    %111 = arith.index_cast %110 : i32 to index
    %c0_35 = arith.constant 0 : index
    %112 = vector.load %arg7[%111, %c0_35] : memref<64x256xf32, #tpu.memory_space<vmem>>, vector<8x128xf32>
    %c8_i32_36 = arith.constant 8 : i32
    %113 = arith.muli %107, %c8_i32_36 : i32
    %114 = arith.index_cast %113 : i32 to index
    %c128_37 = arith.constant 128 : index
    %115 = vector.load %arg7[%114, %c128_37] : memref<64x256xf32, #tpu.memory_space<vmem>>, vector<8x128xf32>
    %116 = vector.extract_strided_slice %109 {offsets = [0, 0], sizes = [8, 128], strides = [1, 1]} : vector<8x256xf32> to vector<8x128xf32>
    %117 = arith.addf %112, %116 : vector<8x128xf32>
    %118 = vector.extract_strided_slice %117 {offsets = [0, 0], sizes = [8, 32], strides = [1, 1]} : vector<8x128xf32> to vector<8x32xf32>
    %119 = arith.negf %118 : vector<8x32xf32>
    %120 = math.exp %119 : vector<8x32xf32>
    %cst_38 = arith.constant 1.000000e+00 : f32
    %121 = vector.broadcast %cst_38 : f32 to vector<8x32xf32>
    %122 = arith.addf %121, %120 : vector<8x32xf32>
    %123 = arith.divf %121, %122 : vector<8x32xf32>
    %124 = vector.extract_strided_slice %117 {offsets = [0, 32], sizes = [8, 32], strides = [1, 1]} : vector<8x128xf32> to vector<8x32xf32>
    %125 = arith.negf %124 : vector<8x32xf32>
    %126 = math.exp %125 : vector<8x32xf32>
    %cst_39 = arith.constant 1.000000e+00 : f32
    %127 = vector.broadcast %cst_39 : f32 to vector<8x32xf32>
    %128 = arith.addf %127, %126 : vector<8x32xf32>
    %129 = arith.divf %127, %128 : vector<8x32xf32>
    %130 = vector.extract_strided_slice %117 {offsets = [0, 64], sizes = [8, 32], strides = [1, 1]} : vector<8x128xf32> to vector<8x32xf32>
    %131 = math.tanh %130 : vector<8x32xf32>
    %132 = vector.extract_strided_slice %117 {offsets = [0, 96], sizes = [8, 32], strides = [1, 1]} : vector<8x128xf32> to vector<8x32xf32>
    %133 = arith.negf %132 : vector<8x32xf32>
    %134 = math.exp %133 : vector<8x32xf32>
    %cst_40 = arith.constant 1.000000e+00 : f32
    %135 = vector.broadcast %cst_40 : f32 to vector<8x32xf32>
    %136 = arith.addf %135, %134 : vector<8x32xf32>
    %137 = arith.divf %135, %136 : vector<8x32xf32>
    %138 = arith.mulf %129, %66 : vector<8x32xf32>
    %139 = arith.mulf %123, %131 : vector<8x32xf32>
    %140 = arith.addf %138, %139 : vector<8x32xf32>
    %141 = math.tanh %140 : vector<8x32xf32>
    %142 = arith.mulf %137, %141 : vector<8x32xf32>
    %143 = vector.extract_strided_slice %109 {offsets = [0, 128], sizes = [8, 128], strides = [1, 1]} : vector<8x256xf32> to vector<8x128xf32>
    %144 = arith.addf %115, %143 : vector<8x128xf32>
    %145 = vector.extract_strided_slice %144 {offsets = [0, 0], sizes = [8, 32], strides = [1, 1]} : vector<8x128xf32> to vector<8x32xf32>
    %146 = arith.negf %145 : vector<8x32xf32>
    %147 = math.exp %146 : vector<8x32xf32>
    %cst_41 = arith.constant 1.000000e+00 : f32
    %148 = vector.broadcast %cst_41 : f32 to vector<8x32xf32>
    %149 = arith.addf %148, %147 : vector<8x32xf32>
    %150 = arith.divf %148, %149 : vector<8x32xf32>
    %151 = vector.extract_strided_slice %144 {offsets = [0, 32], sizes = [8, 32], strides = [1, 1]} : vector<8x128xf32> to vector<8x32xf32>
    %152 = arith.negf %151 : vector<8x32xf32>
    %153 = math.exp %152 : vector<8x32xf32>
    %cst_42 = arith.constant 1.000000e+00 : f32
    %154 = vector.broadcast %cst_42 : f32 to vector<8x32xf32>
    %155 = arith.addf %154, %153 : vector<8x32xf32>
    %156 = arith.divf %154, %155 : vector<8x32xf32>
    %157 = vector.extract_strided_slice %144 {offsets = [0, 64], sizes = [8, 32], strides = [1, 1]} : vector<8x128xf32> to vector<8x32xf32>
    %158 = math.tanh %157 : vector<8x32xf32>
    %159 = vector.extract_strided_slice %144 {offsets = [0, 96], sizes = [8, 32], strides = [1, 1]} : vector<8x128xf32> to vector<8x32xf32>
    %160 = arith.negf %159 : vector<8x32xf32>
    %161 = math.exp %160 : vector<8x32xf32>
    %cst_43 = arith.constant 1.000000e+00 : f32
    %162 = vector.broadcast %cst_43 : f32 to vector<8x32xf32>
    %163 = arith.addf %162, %161 : vector<8x32xf32>
    %164 = arith.divf %162, %163 : vector<8x32xf32>
    %165 = arith.mulf %156, %93 : vector<8x32xf32>
    %166 = arith.mulf %150, %158 : vector<8x32xf32>
    %167 = arith.addf %165, %166 : vector<8x32xf32>
    %168 = math.tanh %167 : vector<8x32xf32>
    %169 = arith.mulf %164, %168 : vector<8x32xf32>
    %170 = arith.truncf %142 : vector<8x32xf32> to vector<8x32xbf16>
    %171 = arith.index_cast %c1_i32 : i32 to index
    %c0_44 = arith.constant 0 : index
    %c0_45 = arith.constant 0 : index
    %172 = vector.load %arg6[%171, %c0_44, %c0_45] : memref<8x8x64xbf16, #tpu.memory_space<vmem>>, vector<1x8x32xbf16>
    %173 = vector.shape_cast %172 : vector<1x8x32xbf16> to vector<8x32xbf16>
    %174 = vector.shape_cast %170 : vector<8x32xbf16> to vector<1x8x32xbf16>
    tpu.vector_store %arg6[%171, %c0_44, %c0_45], %174 {strides = array<i32>} : memref<8x8x64xbf16, #tpu.memory_space<vmem>>, vector<1x8x32xbf16>,
    %175 = arith.truncf %169 : vector<8x32xf32> to vector<8x32xbf16>
    %176 = arith.index_cast %107 : i32 to index
    %c0_46 = arith.constant 0 : index
    %c32_47 = arith.constant 32 : index
    %177 = vector.load %arg6[%176, %c0_46, %c32_47] : memref<8x8x64xbf16, #tpu.memory_space<vmem>>, vector<1x8x32xbf16>
    %178 = vector.shape_cast %177 : vector<1x8x32xbf16> to vector<8x32xbf16>
    %179 = vector.shape_cast %175 : vector<8x32xbf16> to vector<1x8x32xbf16>
    tpu.vector_store %arg6[%176, %c0_46, %c32_47], %179 {strides = array<i32>} : memref<8x8x64xbf16, #tpu.memory_space<vmem>>, vector<1x8x32xbf16>,
    %180 = tpu.concatenate %142, %169 in 1 : vector<8x32xf32>, vector<8x32xf32> -> vector<8x64xf32>
    %c2_i32 = arith.constant 2 : i32
    %c7_i32_48 = arith.constant 7 : i32
    %181 = arith.subi %c7_i32_48, %c2_i32 : i32
    %182 = arith.truncf %180 : vector<8x64xf32> to vector<8x64xbf16>
    %cst_49 = arith.constant dense<0.000000e+00> : vector<8x256xf32>
    %183 = tpu.matmul %182, %30, %cst_49 {dimension_numbers = #tpu.dot_dimension_numbers<[1], [0], [0], [1], [0, 0, 1, 1], [], []>} : vector<8x64xbf16>, vector<64x256xbf16>, vector<8x256xf32> -> vector<8x256xf32>
    %c8_i32_50 = arith.constant 8 : i32
    %184 = arith.muli %c2_i32, %c8_i32_50 : i32
    %185 = arith.index_cast %184 : i32 to index
    %c0_51 = arith.constant 0 : index
    %186 = vector.load %arg7[%185, %c0_51] : memref<64x256xf32, #tpu.memory_space<vmem>>, vector<8x128xf32>
    %c8_i32_52 = arith.constant 8 : i32
    %187 = arith.muli %181, %c8_i32_52 : i32
    %188 = arith.index_cast %187 : i32 to index
    %c128_53 = arith.constant 128 : index
    %189 = vector.load %arg7[%188, %c128_53] : memref<64x256xf32, #tpu.memory_space<vmem>>, vector<8x128xf32>
    %190 = vector.extract_strided_slice %183 {offsets = [0, 0], sizes = [8, 128], strides = [1, 1]} : vector<8x256xf32> to vector<8x128xf32>
    %191 = arith.addf %186, %190 : vector<8x128xf32>
    %192 = vector.extract_strided_slice %191 {offsets = [0, 0], sizes = [8, 32], strides = [1, 1]} : vector<8x128xf32> to vector<8x32xf32>
    %193 = arith.negf %192 : vector<8x32xf32>
    %194 = math.exp %193 : vector<8x32xf32>
    %cst_54 = arith.constant 1.000000e+00 : f32
    %195 = vector.broadcast %cst_54 : f32 to vector<8x32xf32>
    %196 = arith.addf %195, %194 : vector<8x32xf32>
    %197 = arith.divf %195, %196 : vector<8x32xf32>
    %198 = vector.extract_strided_slice %191 {offsets = [0, 32], sizes = [8, 32], strides = [1, 1]} : vector<8x128xf32> to vector<8x32xf32>
    %199 = arith.negf %198 : vector<8x32xf32>
    %200 = math.exp %199 : vector<8x32xf32>
    %cst_55 = arith.constant 1.000000e+00 : f32
    %201 = vector.broadcast %cst_55 : f32 to vector<8x32xf32>
    %202 = arith.addf %201, %200 : vector<8x32xf32>
    %203 = arith.divf %201, %202 : vector<8x32xf32>
    %204 = vector.extract_strided_slice %191 {offsets = [0, 64], sizes = [8, 32], strides = [1, 1]} : vector<8x128xf32> to vector<8x32xf32>
    %205 = math.tanh %204 : vector<8x32xf32>
    %206 = vector.extract_strided_slice %191 {offsets = [0, 96], sizes = [8, 32], strides = [1, 1]} : vector<8x128xf32> to vector<8x32xf32>
    %207 = arith.negf %206 : vector<8x32xf32>
    %208 = math.exp %207 : vector<8x32xf32>
    %cst_56 = arith.constant 1.000000e+00 : f32
    %209 = vector.broadcast %cst_56 : f32 to vector<8x32xf32>
    %210 = arith.addf %209, %208 : vector<8x32xf32>
    %211 = arith.divf %209, %210 : vector<8x32xf32>
    %212 = arith.mulf %203, %140 : vector<8x32xf32>
    %213 = arith.mulf %197, %205 : vector<8x32xf32>
    %214 = arith.addf %212, %213 : vector<8x32xf32>
    %215 = math.tanh %214 : vector<8x32xf32>
    %216 = arith.mulf %211, %215 : vector<8x32xf32>
    %217 = vector.extract_strided_slice %183 {offsets = [0, 128], sizes = [8, 128], strides = [1, 1]} : vector<8x256xf32> to vector<8x128xf32>
    %218 = arith.addf %189, %217 : vector<8x128xf32>
    %219 = vector.extract_strided_slice %218 {offsets = [0, 0], sizes = [8, 32], strides = [1, 1]} : vector<8x128xf32> to vector<8x32xf32>
    %220 = arith.negf %219 : vector<8x32xf32>
    %221 = math.exp %220 : vector<8x32xf32>
    %cst_57 = arith.constant 1.000000e+00 : f32
    %222 = vector.broadcast %cst_57 : f32 to vector<8x32xf32>
    %223 = arith.addf %222, %221 : vector<8x32xf32>
    %224 = arith.divf %222, %223 : vector<8x32xf32>
    %225 = vector.extract_strided_slice %218 {offsets = [0, 32], sizes = [8, 32], strides = [1, 1]} : vector<8x128xf32> to vector<8x32xf32>
    %226 = arith.negf %225 : vector<8x32xf32>
    %227 = math.exp %226 : vector<8x32xf32>
    %cst_58 = arith.constant 1.000000e+00 : f32
    %228 = vector.broadcast %cst_58 : f32 to vector<8x32xf32>
    %229 = arith.addf %228, %227 : vector<8x32xf32>
    %230 = arith.divf %228, %229 : vector<8x32xf32>
    %231 = vector.extract_strided_slice %218 {offsets = [0, 64], sizes = [8, 32], strides = [1, 1]} : vector<8x128xf32> to vector<8x32xf32>
    %232 = math.tanh %231 : vector<8x32xf32>
    %233 = vector.extract_strided_slice %218 {offsets = [0, 96], sizes = [8, 32], strides = [1, 1]} : vector<8x128xf32> to vector<8x32xf32>
    %234 = arith.negf %233 : vector<8x32xf32>
    %235 = math.exp %234 : vector<8x32xf32>
    %cst_59 = arith.constant 1.000000e+00 : f32
    %236 = vector.broadcast %cst_59 : f32 to vector<8x32xf32>
    %237 = arith.addf %236, %235 : vector<8x32xf32>
    %238 = arith.divf %236, %237 : vector<8x32xf32>
    %239 = arith.mulf %230, %167 : vector<8x32xf32>
    %240 = arith.mulf %224, %232 : vector<8x32xf32>
    %241 = arith.addf %239, %240 : vector<8x32xf32>
    %242 = math.tanh %241 : vector<8x32xf32>
    %243 = arith.mulf %238, %242 : vector<8x32xf32>
    %244 = arith.truncf %216 : vector<8x32xf32> to vector<8x32xbf16>
    %245 = arith.index_cast %c2_i32 : i32 to index
    %c0_60 = arith.constant 0 : index
    %c0_61 = arith.constant 0 : index
    %246 = vector.load %arg6[%245, %c0_60, %c0_61] : memref<8x8x64xbf16, #tpu.memory_space<vmem>>, vector<1x8x32xbf16>
    %247 = vector.shape_cast %246 : vector<1x8x32xbf16> to vector<8x32xbf16>
    %248 = vector.shape_cast %244 : vector<8x32xbf16> to vector<1x8x32xbf16>
    tpu.vector_store %arg6[%245, %c0_60, %c0_61], %248 {strides = array<i32>} : memref<8x8x64xbf16, #tpu.memory_space<vmem>>, vector<1x8x32xbf16>,
    %249 = arith.truncf %243 : vector<8x32xf32> to vector<8x32xbf16>
    %250 = arith.index_cast %181 : i32 to index
    %c0_62 = arith.constant 0 : index
    %c32_63 = arith.constant 32 : index
    %251 = vector.load %arg6[%250, %c0_62, %c32_63] : memref<8x8x64xbf16, #tpu.memory_space<vmem>>, vector<1x8x32xbf16>
    %252 = vector.shape_cast %251 : vector<1x8x32xbf16> to vector<8x32xbf16>
    %253 = vector.shape_cast %249 : vector<8x32xbf16> to vector<1x8x32xbf16>
    tpu.vector_store %arg6[%250, %c0_62, %c32_63], %253 {strides = array<i32>} : memref<8x8x64xbf16, #tpu.memory_space<vmem>>, vector<1x8x32xbf16>,
    %254 = tpu.concatenate %216, %243 in 1 : vector<8x32xf32>, vector<8x32xf32> -> vector<8x64xf32>
    %c3_i32 = arith.constant 3 : i32
    %c7_i32_64 = arith.constant 7 : i32
    %255 = arith.subi %c7_i32_64, %c3_i32 : i32
    %256 = arith.truncf %254 : vector<8x64xf32> to vector<8x64xbf16>
    %cst_65 = arith.constant dense<0.000000e+00> : vector<8x256xf32>
    %257 = tpu.matmul %256, %30, %cst_65 {dimension_numbers = #tpu.dot_dimension_numbers<[1], [0], [0], [1], [0, 0, 1, 1], [], []>} : vector<8x64xbf16>, vector<64x256xbf16>, vector<8x256xf32> -> vector<8x256xf32>
    %c8_i32_66 = arith.constant 8 : i32
    %258 = arith.muli %c3_i32, %c8_i32_66 : i32
    %259 = arith.index_cast %258 : i32 to index
    %c0_67 = arith.constant 0 : index
    %260 = vector.load %arg7[%259, %c0_67] : memref<64x256xf32, #tpu.memory_space<vmem>>, vector<8x128xf32>
    %c8_i32_68 = arith.constant 8 : i32
    %261 = arith.muli %255, %c8_i32_68 : i32
    %262 = arith.index_cast %261 : i32 to index
    %c128_69 = arith.constant 128 : index
    %263 = vector.load %arg7[%262, %c128_69] : memref<64x256xf32, #tpu.memory_space<vmem>>, vector<8x128xf32>
    %264 = vector.extract_strided_slice %257 {offsets = [0, 0], sizes = [8, 128], strides = [1, 1]} : vector<8x256xf32> to vector<8x128xf32>
    %265 = arith.addf %260, %264 : vector<8x128xf32>
    %266 = vector.extract_strided_slice %265 {offsets = [0, 0], sizes = [8, 32], strides = [1, 1]} : vector<8x128xf32> to vector<8x32xf32>
    %267 = arith.negf %266 : vector<8x32xf32>
    %268 = math.exp %267 : vector<8x32xf32>
    %cst_70 = arith.constant 1.000000e+00 : f32
    %269 = vector.broadcast %cst_70 : f32 to vector<8x32xf32>
    %270 = arith.addf %269, %268 : vector<8x32xf32>
    %271 = arith.divf %269, %270 : vector<8x32xf32>
    %272 = vector.extract_strided_slice %265 {offsets = [0, 32], sizes = [8, 32], strides = [1, 1]} : vector<8x128xf32> to vector<8x32xf32>
    %273 = arith.negf %272 : vector<8x32xf32>
    %274 = math.exp %273 : vector<8x32xf32>
    %cst_71 = arith.constant 1.000000e+00 : f32
    %275 = vector.broadcast %cst_71 : f32 to vector<8x32xf32>
    %276 = arith.addf %275, %274 : vector<8x32xf32>
    %277 = arith.divf %275, %276 : vector<8x32xf32>
    %278 = vector.extract_strided_slice %265 {offsets = [0, 64], sizes = [8, 32], strides = [1, 1]} : vector<8x128xf32> to vector<8x32xf32>
    %279 = math.tanh %278 : vector<8x32xf32>
    %280 = vector.extract_strided_slice %265 {offsets = [0, 96], sizes = [8, 32], strides = [1, 1]} : vector<8x128xf32> to vector<8x32xf32>
    %281 = arith.negf %280 : vector<8x32xf32>
    %282 = math.exp %281 : vector<8x32xf32>
    %cst_72 = arith.constant 1.000000e+00 : f32
    %283 = vector.broadcast %cst_72 : f32 to vector<8x32xf32>
    %284 = arith.addf %283, %282 : vector<8x32xf32>
    %285 = arith.divf %283, %284 : vector<8x32xf32>
    %286 = arith.mulf %277, %214 : vector<8x32xf32>
    %287 = arith.mulf %271, %279 : vector<8x32xf32>
    %288 = arith.addf %286, %287 : vector<8x32xf32>
    %289 = math.tanh %288 : vector<8x32xf32>
    %290 = arith.mulf %285, %289 : vector<8x32xf32>
    %291 = vector.extract_strided_slice %257 {offsets = [0, 128], sizes = [8, 128], strides = [1, 1]} : vector<8x256xf32> to vector<8x128xf32>
    %292 = arith.addf %263, %291 : vector<8x128xf32>
    %293 = vector.extract_strided_slice %292 {offsets = [0, 0], sizes = [8, 32], strides = [1, 1]} : vector<8x128xf32> to vector<8x32xf32>
    %294 = arith.negf %293 : vector<8x32xf32>
    %295 = math.exp %294 : vector<8x32xf32>
    %cst_73 = arith.constant 1.000000e+00 : f32
    %296 = vector.broadcast %cst_73 : f32 to vector<8x32xf32>
    %297 = arith.addf %296, %295 : vector<8x32xf32>
    %298 = arith.divf %296, %297 : vector<8x32xf32>
    %299 = vector.extract_strided_slice %292 {offsets = [0, 32], sizes = [8, 32], strides = [1, 1]} : vector<8x128xf32> to vector<8x32xf32>
    %300 = arith.negf %299 : vector<8x32xf32>
    %301 = math.exp %300 : vector<8x32xf32>
    %cst_74 = arith.constant 1.000000e+00 : f32
    %302 = vector.broadcast %cst_74 : f32 to vector<8x32xf32>
    %303 = arith.addf %302, %301 : vector<8x32xf32>
    %304 = arith.divf %302, %303 : vector<8x32xf32>
    %305 = vector.extract_strided_slice %292 {offsets = [0, 64], sizes = [8, 32], strides = [1, 1]} : vector<8x128xf32> to vector<8x32xf32>
    %306 = math.tanh %305 : vector<8x32xf32>
    %307 = vector.extract_strided_slice %292 {offsets = [0, 96], sizes = [8, 32], strides = [1, 1]} : vector<8x128xf32> to vector<8x32xf32>
    %308 = arith.negf %307 : vector<8x32xf32>
    %309 = math.exp %308 : vector<8x32xf32>
    %cst_75 = arith.constant 1.000000e+00 : f32
    %310 = vector.broadcast %cst_75 : f32 to vector<8x32xf32>
    %311 = arith.addf %310, %309 : vector<8x32xf32>
    %312 = arith.divf %310, %311 : vector<8x32xf32>
    %313 = arith.mulf %304, %241 : vector<8x32xf32>
    %314 = arith.mulf %298, %306 : vector<8x32xf32>
    %315 = arith.addf %313, %314 : vector<8x32xf32>
    %316 = math.tanh %315 : vector<8x32xf32>
    %317 = arith.mulf %312, %316 : vector<8x32xf32>
    %318 = arith.truncf %290 : vector<8x32xf32> to vector<8x32xbf16>
    %319 = arith.index_cast %c3_i32 : i32 to index
    %c0_76 = arith.constant 0 : index
    %c0_77 = arith.constant 0 : index
    %320 = vector.load %arg6[%319, %c0_76, %c0_77] : memref<8x8x64xbf16, #tpu.memory_space<vmem>>, vector<1x8x32xbf16>
    %321 = vector.shape_cast %320 : vector<1x8x32xbf16> to vector<8x32xbf16>
    %322 = vector.shape_cast %318 : vector<8x32xbf16> to vector<1x8x32xbf16>
    tpu.vector_store %arg6[%319, %c0_76, %c0_77], %322 {strides = array<i32>} : memref<8x8x64xbf16, #tpu.memory_space<vmem>>, vector<1x8x32xbf16>,
    %323 = arith.truncf %317 : vector<8x32xf32> to vector<8x32xbf16>
    %324 = arith.index_cast %255 : i32 to index
    %c0_78 = arith.constant 0 : index
    %c32_79 = arith.constant 32 : index
    %325 = vector.load %arg6[%324, %c0_78, %c32_79] : memref<8x8x64xbf16, #tpu.memory_space<vmem>>, vector<1x8x32xbf16>
    %326 = vector.shape_cast %325 : vector<1x8x32xbf16> to vector<8x32xbf16>
    %327 = vector.shape_cast %323 : vector<8x32xbf16> to vector<1x8x32xbf16>
    tpu.vector_store %arg6[%324, %c0_78, %c32_79], %327 {strides = array<i32>} : memref<8x8x64xbf16, #tpu.memory_space<vmem>>, vector<1x8x32xbf16>,
    %328 = tpu.concatenate %290, %317 in 1 : vector<8x32xf32>, vector<8x32xf32> -> vector<8x64xf32>
    %c4_i32 = arith.constant 4 : i32
    %c7_i32_80 = arith.constant 7 : i32
    %329 = arith.subi %c7_i32_80, %c4_i32 : i32
    %330 = arith.truncf %328 : vector<8x64xf32> to vector<8x64xbf16>
    %cst_81 = arith.constant dense<0.000000e+00> : vector<8x256xf32>
    %331 = tpu.matmul %330, %30, %cst_81 {dimension_numbers = #tpu.dot_dimension_numbers<[1], [0], [0], [1], [0, 0, 1, 1], [], []>} : vector<8x64xbf16>, vector<64x256xbf16>, vector<8x256xf32> -> vector<8x256xf32>
    %c8_i32_82 = arith.constant 8 : i32
    %332 = arith.muli %c4_i32, %c8_i32_82 : i32
    %333 = arith.index_cast %332 : i32 to index
    %c0_83 = arith.constant 0 : index
    %334 = vector.load %arg7[%333, %c0_83] : memref<64x256xf32, #tpu.memory_space<vmem>>, vector<8x128xf32>
    %c8_i32_84 = arith.constant 8 : i32
    %335 = arith.muli %329, %c8_i32_84 : i32
    %336 = arith.index_cast %335 : i32 to index
    %c128_85 = arith.constant 128 : index
    %337 = vector.load %arg7[%336, %c128_85] : memref<64x256xf32, #tpu.memory_space<vmem>>, vector<8x128xf32>
    %338 = vector.extract_strided_slice %331 {offsets = [0, 0], sizes = [8, 128], strides = [1, 1]} : vector<8x256xf32> to vector<8x128xf32>
    %339 = arith.addf %334, %338 : vector<8x128xf32>
    %340 = vector.extract_strided_slice %339 {offsets = [0, 0], sizes = [8, 32], strides = [1, 1]} : vector<8x128xf32> to vector<8x32xf32>
    %341 = arith.negf %340 : vector<8x32xf32>
    %342 = math.exp %341 : vector<8x32xf32>
    %cst_86 = arith.constant 1.000000e+00 : f32
    %343 = vector.broadcast %cst_86 : f32 to vector<8x32xf32>
    %344 = arith.addf %343, %342 : vector<8x32xf32>
    %345 = arith.divf %343, %344 : vector<8x32xf32>
    %346 = vector.extract_strided_slice %339 {offsets = [0, 32], sizes = [8, 32], strides = [1, 1]} : vector<8x128xf32> to vector<8x32xf32>
    %347 = arith.negf %346 : vector<8x32xf32>
    %348 = math.exp %347 : vector<8x32xf32>
    %cst_87 = arith.constant 1.000000e+00 : f32
    %349 = vector.broadcast %cst_87 : f32 to vector<8x32xf32>
    %350 = arith.addf %349, %348 : vector<8x32xf32>
    %351 = arith.divf %349, %350 : vector<8x32xf32>
    %352 = vector.extract_strided_slice %339 {offsets = [0, 64], sizes = [8, 32], strides = [1, 1]} : vector<8x128xf32> to vector<8x32xf32>
    %353 = math.tanh %352 : vector<8x32xf32>
    %354 = vector.extract_strided_slice %339 {offsets = [0, 96], sizes = [8, 32], strides = [1, 1]} : vector<8x128xf32> to vector<8x32xf32>
    %355 = arith.negf %354 : vector<8x32xf32>
    %356 = math.exp %355 : vector<8x32xf32>
    %cst_88 = arith.constant 1.000000e+00 : f32
    %357 = vector.broadcast %cst_88 : f32 to vector<8x32xf32>
    %358 = arith.addf %357, %356 : vector<8x32xf32>
    %359 = arith.divf %357, %358 : vector<8x32xf32>
    %360 = arith.mulf %351, %288 : vector<8x32xf32>
    %361 = arith.mulf %345, %353 : vector<8x32xf32>
    %362 = arith.addf %360, %361 : vector<8x32xf32>
    %363 = math.tanh %362 : vector<8x32xf32>
    %364 = arith.mulf %359, %363 : vector<8x32xf32>
    %365 = vector.extract_strided_slice %331 {offsets = [0, 128], sizes = [8, 128], strides = [1, 1]} : vector<8x256xf32> to vector<8x128xf32>
    %366 = arith.addf %337, %365 : vector<8x128xf32>
    %367 = vector.extract_strided_slice %366 {offsets = [0, 0], sizes = [8, 32], strides = [1, 1]} : vector<8x128xf32> to vector<8x32xf32>
    %368 = arith.negf %367 : vector<8x32xf32>
    %369 = math.exp %368 : vector<8x32xf32>
    %cst_89 = arith.constant 1.000000e+00 : f32
    %370 = vector.broadcast %cst_89 : f32 to vector<8x32xf32>
    %371 = arith.addf %370, %369 : vector<8x32xf32>
    %372 = arith.divf %370, %371 : vector<8x32xf32>
    %373 = vector.extract_strided_slice %366 {offsets = [0, 32], sizes = [8, 32], strides = [1, 1]} : vector<8x128xf32> to vector<8x32xf32>
    %374 = arith.negf %373 : vector<8x32xf32>
    %375 = math.exp %374 : vector<8x32xf32>
    %cst_90 = arith.constant 1.000000e+00 : f32
    %376 = vector.broadcast %cst_90 : f32 to vector<8x32xf32>
    %377 = arith.addf %376, %375 : vector<8x32xf32>
    %378 = arith.divf %376, %377 : vector<8x32xf32>
    %379 = vector.extract_strided_slice %366 {offsets = [0, 64], sizes = [8, 32], strides = [1, 1]} : vector<8x128xf32> to vector<8x32xf32>
    %380 = math.tanh %379 : vector<8x32xf32>
    %381 = vector.extract_strided_slice %366 {offsets = [0, 96], sizes = [8, 32], strides = [1, 1]} : vector<8x128xf32> to vector<8x32xf32>
    %382 = arith.negf %381 : vector<8x32xf32>
    %383 = math.exp %382 : vector<8x32xf32>
    %cst_91 = arith.constant 1.000000e+00 : f32
    %384 = vector.broadcast %cst_91 : f32 to vector<8x32xf32>
    %385 = arith.addf %384, %383 : vector<8x32xf32>
    %386 = arith.divf %384, %385 : vector<8x32xf32>
    %387 = arith.mulf %378, %315 : vector<8x32xf32>
    %388 = arith.mulf %372, %380 : vector<8x32xf32>
    %389 = arith.addf %387, %388 : vector<8x32xf32>
    %390 = math.tanh %389 : vector<8x32xf32>
    %391 = arith.mulf %386, %390 : vector<8x32xf32>
    %392 = arith.truncf %364 : vector<8x32xf32> to vector<8x32xbf16>
    %393 = arith.index_cast %c4_i32 : i32 to index
    %c0_92 = arith.constant 0 : index
    %c0_93 = arith.constant 0 : index
    %394 = vector.load %arg6[%393, %c0_92, %c0_93] : memref<8x8x64xbf16, #tpu.memory_space<vmem>>, vector<1x8x32xbf16>
    %395 = vector.shape_cast %394 : vector<1x8x32xbf16> to vector<8x32xbf16>
    %396 = vector.shape_cast %392 : vector<8x32xbf16> to vector<1x8x32xbf16>
    tpu.vector_store %arg6[%393, %c0_92, %c0_93], %396 {strides = array<i32>} : memref<8x8x64xbf16, #tpu.memory_space<vmem>>, vector<1x8x32xbf16>,
    %397 = arith.truncf %391 : vector<8x32xf32> to vector<8x32xbf16>
    %398 = arith.index_cast %329 : i32 to index
    %c0_94 = arith.constant 0 : index
    %c32_95 = arith.constant 32 : index
    %399 = vector.load %arg6[%398, %c0_94, %c32_95] : memref<8x8x64xbf16, #tpu.memory_space<vmem>>, vector<1x8x32xbf16>
    %400 = vector.shape_cast %399 : vector<1x8x32xbf16> to vector<8x32xbf16>
    %401 = vector.shape_cast %397 : vector<8x32xbf16> to vector<1x8x32xbf16>
    tpu.vector_store %arg6[%398, %c0_94, %c32_95], %401 {strides = array<i32>} : memref<8x8x64xbf16, #tpu.memory_space<vmem>>, vector<1x8x32xbf16>,
    %402 = tpu.concatenate %364, %391 in 1 : vector<8x32xf32>, vector<8x32xf32> -> vector<8x64xf32>
    %c5_i32 = arith.constant 5 : i32
    %c7_i32_96 = arith.constant 7 : i32
    %403 = arith.subi %c7_i32_96, %c5_i32 : i32
    %404 = arith.truncf %402 : vector<8x64xf32> to vector<8x64xbf16>
    %cst_97 = arith.constant dense<0.000000e+00> : vector<8x256xf32>
    %405 = tpu.matmul %404, %30, %cst_97 {dimension_numbers = #tpu.dot_dimension_numbers<[1], [0], [0], [1], [0, 0, 1, 1], [], []>} : vector<8x64xbf16>, vector<64x256xbf16>, vector<8x256xf32> -> vector<8x256xf32>
    %c8_i32_98 = arith.constant 8 : i32
    %406 = arith.muli %c5_i32, %c8_i32_98 : i32
    %407 = arith.index_cast %406 : i32 to index
    %c0_99 = arith.constant 0 : index
    %408 = vector.load %arg7[%407, %c0_99] : memref<64x256xf32, #tpu.memory_space<vmem>>, vector<8x128xf32>
    %c8_i32_100 = arith.constant 8 : i32
    %409 = arith.muli %403, %c8_i32_100 : i32
    %410 = arith.index_cast %409 : i32 to index
    %c128_101 = arith.constant 128 : index
    %411 = vector.load %arg7[%410, %c128_101] : memref<64x256xf32, #tpu.memory_space<vmem>>, vector<8x128xf32>
    %412 = vector.extract_strided_slice %405 {offsets = [0, 0], sizes = [8, 128], strides = [1, 1]} : vector<8x256xf32> to vector<8x128xf32>
    %413 = arith.addf %408, %412 : vector<8x128xf32>
    %414 = vector.extract_strided_slice %413 {offsets = [0, 0], sizes = [8, 32], strides = [1, 1]} : vector<8x128xf32> to vector<8x32xf32>
    %415 = arith.negf %414 : vector<8x32xf32>
    %416 = math.exp %415 : vector<8x32xf32>
    %cst_102 = arith.constant 1.000000e+00 : f32
    %417 = vector.broadcast %cst_102 : f32 to vector<8x32xf32>
    %418 = arith.addf %417, %416 : vector<8x32xf32>
    %419 = arith.divf %417, %418 : vector<8x32xf32>
    %420 = vector.extract_strided_slice %413 {offsets = [0, 32], sizes = [8, 32], strides = [1, 1]} : vector<8x128xf32> to vector<8x32xf32>
    %421 = arith.negf %420 : vector<8x32xf32>
    %422 = math.exp %421 : vector<8x32xf32>
    %cst_103 = arith.constant 1.000000e+00 : f32
    %423 = vector.broadcast %cst_103 : f32 to vector<8x32xf32>
    %424 = arith.addf %423, %422 : vector<8x32xf32>
    %425 = arith.divf %423, %424 : vector<8x32xf32>
    %426 = vector.extract_strided_slice %413 {offsets = [0, 64], sizes = [8, 32], strides = [1, 1]} : vector<8x128xf32> to vector<8x32xf32>
    %427 = math.tanh %426 : vector<8x32xf32>
    %428 = vector.extract_strided_slice %413 {offsets = [0, 96], sizes = [8, 32], strides = [1, 1]} : vector<8x128xf32> to vector<8x32xf32>
    %429 = arith.negf %428 : vector<8x32xf32>
    %430 = math.exp %429 : vector<8x32xf32>
    %cst_104 = arith.constant 1.000000e+00 : f32
    %431 = vector.broadcast %cst_104 : f32 to vector<8x32xf32>
    %432 = arith.addf %431, %430 : vector<8x32xf32>
    %433 = arith.divf %431, %432 : vector<8x32xf32>
    %434 = arith.mulf %425, %362 : vector<8x32xf32>
    %435 = arith.mulf %419, %427 : vector<8x32xf32>
    %436 = arith.addf %434, %435 : vector<8x32xf32>
    %437 = math.tanh %436 : vector<8x32xf32>
    %438 = arith.mulf %433, %437 : vector<8x32xf32>
    %439 = vector.extract_strided_slice %405 {offsets = [0, 128], sizes = [8, 128], strides = [1, 1]} : vector<8x256xf32> to vector<8x128xf32>
    %440 = arith.addf %411, %439 : vector<8x128xf32>
    %441 = vector.extract_strided_slice %440 {offsets = [0, 0], sizes = [8, 32], strides = [1, 1]} : vector<8x128xf32> to vector<8x32xf32>
    %442 = arith.negf %441 : vector<8x32xf32>
    %443 = math.exp %442 : vector<8x32xf32>
    %cst_105 = arith.constant 1.000000e+00 : f32
    %444 = vector.broadcast %cst_105 : f32 to vector<8x32xf32>
    %445 = arith.addf %444, %443 : vector<8x32xf32>
    %446 = arith.divf %444, %445 : vector<8x32xf32>
    %447 = vector.extract_strided_slice %440 {offsets = [0, 32], sizes = [8, 32], strides = [1, 1]} : vector<8x128xf32> to vector<8x32xf32>
    %448 = arith.negf %447 : vector<8x32xf32>
    %449 = math.exp %448 : vector<8x32xf32>
    %cst_106 = arith.constant 1.000000e+00 : f32
    %450 = vector.broadcast %cst_106 : f32 to vector<8x32xf32>
    %451 = arith.addf %450, %449 : vector<8x32xf32>
    %452 = arith.divf %450, %451 : vector<8x32xf32>
    %453 = vector.extract_strided_slice %440 {offsets = [0, 64], sizes = [8, 32], strides = [1, 1]} : vector<8x128xf32> to vector<8x32xf32>
    %454 = math.tanh %453 : vector<8x32xf32>
    %455 = vector.extract_strided_slice %440 {offsets = [0, 96], sizes = [8, 32], strides = [1, 1]} : vector<8x128xf32> to vector<8x32xf32>
    %456 = arith.negf %455 : vector<8x32xf32>
    %457 = math.exp %456 : vector<8x32xf32>
    %cst_107 = arith.constant 1.000000e+00 : f32
    %458 = vector.broadcast %cst_107 : f32 to vector<8x32xf32>
    %459 = arith.addf %458, %457 : vector<8x32xf32>
    %460 = arith.divf %458, %459 : vector<8x32xf32>
    %461 = arith.mulf %452, %389 : vector<8x32xf32>
    %462 = arith.mulf %446, %454 : vector<8x32xf32>
    %463 = arith.addf %461, %462 : vector<8x32xf32>
    %464 = math.tanh %463 : vector<8x32xf32>
    %465 = arith.mulf %460, %464 : vector<8x32xf32>
    %466 = arith.truncf %438 : vector<8x32xf32> to vector<8x32xbf16>
    %467 = arith.index_cast %c5_i32 : i32 to index
    %c0_108 = arith.constant 0 : index
    %c0_109 = arith.constant 0 : index
    %468 = vector.load %arg6[%467, %c0_108, %c0_109] : memref<8x8x64xbf16, #tpu.memory_space<vmem>>, vector<1x8x32xbf16>
    %469 = vector.shape_cast %468 : vector<1x8x32xbf16> to vector<8x32xbf16>
    %470 = vector.shape_cast %466 : vector<8x32xbf16> to vector<1x8x32xbf16>
    tpu.vector_store %arg6[%467, %c0_108, %c0_109], %470 {strides = array<i32>} : memref<8x8x64xbf16, #tpu.memory_space<vmem>>, vector<1x8x32xbf16>,
    %471 = arith.truncf %465 : vector<8x32xf32> to vector<8x32xbf16>
    %472 = arith.index_cast %403 : i32 to index
    %c0_110 = arith.constant 0 : index
    %c32_111 = arith.constant 32 : index
    %473 = vector.load %arg6[%472, %c0_110, %c32_111] : memref<8x8x64xbf16, #tpu.memory_space<vmem>>, vector<1x8x32xbf16>
    %474 = vector.shape_cast %473 : vector<1x8x32xbf16> to vector<8x32xbf16>
    %475 = vector.shape_cast %471 : vector<8x32xbf16> to vector<1x8x32xbf16>
    tpu.vector_store %arg6[%472, %c0_110, %c32_111], %475 {strides = array<i32>} : memref<8x8x64xbf16, #tpu.memory_space<vmem>>, vector<1x8x32xbf16>,
    %476 = tpu.concatenate %438, %465 in 1 : vector<8x32xf32>, vector<8x32xf32> -> vector<8x64xf32>
    %c6_i32 = arith.constant 6 : i32
    %c7_i32_112 = arith.constant 7 : i32
    %477 = arith.subi %c7_i32_112, %c6_i32 : i32
    %478 = arith.truncf %476 : vector<8x64xf32> to vector<8x64xbf16>
    %cst_113 = arith.constant dense<0.000000e+00> : vector<8x256xf32>
    %479 = tpu.matmul %478, %30, %cst_113 {dimension_numbers = #tpu.dot_dimension_numbers<[1], [0], [0], [1], [0, 0, 1, 1], [], []>} : vector<8x64xbf16>, vector<64x256xbf16>, vector<8x256xf32> -> vector<8x256xf32>
    %c8_i32_114 = arith.constant 8 : i32
    %480 = arith.muli %c6_i32, %c8_i32_114 : i32
    %481 = arith.index_cast %480 : i32 to index
    %c0_115 = arith.constant 0 : index
    %482 = vector.load %arg7[%481, %c0_115] : memref<64x256xf32, #tpu.memory_space<vmem>>, vector<8x128xf32>
    %c8_i32_116 = arith.constant 8 : i32
    %483 = arith.muli %477, %c8_i32_116 : i32
    %484 = arith.index_cast %483 : i32 to index
    %c128_117 = arith.constant 128 : index
    %485 = vector.load %arg7[%484, %c128_117] : memref<64x256xf32, #tpu.memory_space<vmem>>, vector<8x128xf32>
    %486 = vector.extract_strided_slice %479 {offsets = [0, 0], sizes = [8, 128], strides = [1, 1]} : vector<8x256xf32> to vector<8x128xf32>
    %487 = arith.addf %482, %486 : vector<8x128xf32>
    %488 = vector.extract_strided_slice %487 {offsets = [0, 0], sizes = [8, 32], strides = [1, 1]} : vector<8x128xf32> to vector<8x32xf32>
    %489 = arith.negf %488 : vector<8x32xf32>
    %490 = math.exp %489 : vector<8x32xf32>
    %cst_118 = arith.constant 1.000000e+00 : f32
    %491 = vector.broadcast %cst_118 : f32 to vector<8x32xf32>
    %492 = arith.addf %491, %490 : vector<8x32xf32>
    %493 = arith.divf %491, %492 : vector<8x32xf32>
    %494 = vector.extract_strided_slice %487 {offsets = [0, 32], sizes = [8, 32], strides = [1, 1]} : vector<8x128xf32> to vector<8x32xf32>
    %495 = arith.negf %494 : vector<8x32xf32>
    %496 = math.exp %495 : vector<8x32xf32>
    %cst_119 = arith.constant 1.000000e+00 : f32
    %497 = vector.broadcast %cst_119 : f32 to vector<8x32xf32>
    %498 = arith.addf %497, %496 : vector<8x32xf32>
    %499 = arith.divf %497, %498 : vector<8x32xf32>
    %500 = vector.extract_strided_slice %487 {offsets = [0, 64], sizes = [8, 32], strides = [1, 1]} : vector<8x128xf32> to vector<8x32xf32>
    %501 = math.tanh %500 : vector<8x32xf32>
    %502 = vector.extract_strided_slice %487 {offsets = [0, 96], sizes = [8, 32], strides = [1, 1]} : vector<8x128xf32> to vector<8x32xf32>
    %503 = arith.negf %502 : vector<8x32xf32>
    %504 = math.exp %503 : vector<8x32xf32>
    %cst_120 = arith.constant 1.000000e+00 : f32
    %505 = vector.broadcast %cst_120 : f32 to vector<8x32xf32>
    %506 = arith.addf %505, %504 : vector<8x32xf32>
    %507 = arith.divf %505, %506 : vector<8x32xf32>
    %508 = arith.mulf %499, %436 : vector<8x32xf32>
    %509 = arith.mulf %493, %501 : vector<8x32xf32>
    %510 = arith.addf %508, %509 : vector<8x32xf32>
    %511 = math.tanh %510 : vector<8x32xf32>
    %512 = arith.mulf %507, %511 : vector<8x32xf32>
    %513 = vector.extract_strided_slice %479 {offsets = [0, 128], sizes = [8, 128], strides = [1, 1]} : vector<8x256xf32> to vector<8x128xf32>
    %514 = arith.addf %485, %513 : vector<8x128xf32>
    %515 = vector.extract_strided_slice %514 {offsets = [0, 0], sizes = [8, 32], strides = [1, 1]} : vector<8x128xf32> to vector<8x32xf32>
    %516 = arith.negf %515 : vector<8x32xf32>
    %517 = math.exp %516 : vector<8x32xf32>
    %cst_121 = arith.constant 1.000000e+00 : f32
    %518 = vector.broadcast %cst_121 : f32 to vector<8x32xf32>
    %519 = arith.addf %518, %517 : vector<8x32xf32>
    %520 = arith.divf %518, %519 : vector<8x32xf32>
    %521 = vector.extract_strided_slice %514 {offsets = [0, 32], sizes = [8, 32], strides = [1, 1]} : vector<8x128xf32> to vector<8x32xf32>
    %522 = arith.negf %521 : vector<8x32xf32>
    %523 = math.exp %522 : vector<8x32xf32>
    %cst_122 = arith.constant 1.000000e+00 : f32
    %524 = vector.broadcast %cst_122 : f32 to vector<8x32xf32>
    %525 = arith.addf %524, %523 : vector<8x32xf32>
    %526 = arith.divf %524, %525 : vector<8x32xf32>
    %527 = vector.extract_strided_slice %514 {offsets = [0, 64], sizes = [8, 32], strides = [1, 1]} : vector<8x128xf32> to vector<8x32xf32>
    %528 = math.tanh %527 : vector<8x32xf32>
    %529 = vector.extract_strided_slice %514 {offsets = [0, 96], sizes = [8, 32], strides = [1, 1]} : vector<8x128xf32> to vector<8x32xf32>
    %530 = arith.negf %529 : vector<8x32xf32>
    %531 = math.exp %530 : vector<8x32xf32>
    %cst_123 = arith.constant 1.000000e+00 : f32
    %532 = vector.broadcast %cst_123 : f32 to vector<8x32xf32>
    %533 = arith.addf %532, %531 : vector<8x32xf32>
    %534 = arith.divf %532, %533 : vector<8x32xf32>
    %535 = arith.mulf %526, %463 : vector<8x32xf32>
    %536 = arith.mulf %520, %528 : vector<8x32xf32>
    %537 = arith.addf %535, %536 : vector<8x32xf32>
    %538 = math.tanh %537 : vector<8x32xf32>
    %539 = arith.mulf %534, %538 : vector<8x32xf32>
    %540 = arith.truncf %512 : vector<8x32xf32> to vector<8x32xbf16>
    %541 = arith.index_cast %c6_i32 : i32 to index
    %c0_124 = arith.constant 0 : index
    %c0_125 = arith.constant 0 : index
    %542 = vector.load %arg6[%541, %c0_124, %c0_125] : memref<8x8x64xbf16, #tpu.memory_space<vmem>>, vector<1x8x32xbf16>
    %543 = vector.shape_cast %542 : vector<1x8x32xbf16> to vector<8x32xbf16>
    %544 = vector.shape_cast %540 : vector<8x32xbf16> to vector<1x8x32xbf16>
    tpu.vector_store %arg6[%541, %c0_124, %c0_125], %544 {strides = array<i32>} : memref<8x8x64xbf16, #tpu.memory_space<vmem>>, vector<1x8x32xbf16>,
    %545 = arith.truncf %539 : vector<8x32xf32> to vector<8x32xbf16>
    %546 = arith.index_cast %477 : i32 to index
    %c0_126 = arith.constant 0 : index
    %c32_127 = arith.constant 32 : index
    %547 = vector.load %arg6[%546, %c0_126, %c32_127] : memref<8x8x64xbf16, #tpu.memory_space<vmem>>, vector<1x8x32xbf16>
    %548 = vector.shape_cast %547 : vector<1x8x32xbf16> to vector<8x32xbf16>
    %549 = vector.shape_cast %545 : vector<8x32xbf16> to vector<1x8x32xbf16>
    tpu.vector_store %arg6[%546, %c0_126, %c32_127], %549 {strides = array<i32>} : memref<8x8x64xbf16, #tpu.memory_space<vmem>>, vector<1x8x32xbf16>,
    %550 = tpu.concatenate %512, %539 in 1 : vector<8x32xf32>, vector<8x32xf32> -> vector<8x64xf32>
    %c7_i32_128 = arith.constant 7 : i32
    %c7_i32_129 = arith.constant 7 : i32
    %551 = arith.subi %c7_i32_129, %c7_i32_128 : i32
    %552 = arith.truncf %550 : vector<8x64xf32> to vector<8x64xbf16>
    %cst_130 = arith.constant dense<0.000000e+00> : vector<8x256xf32>
    %553 = tpu.matmul %552, %30, %cst_130 {dimension_numbers = #tpu.dot_dimension_numbers<[1], [0], [0], [1], [0, 0, 1, 1], [], []>} : vector<8x64xbf16>, vector<64x256xbf16>, vector<8x256xf32> -> vector<8x256xf32>
    %c8_i32_131 = arith.constant 8 : i32
    %554 = arith.muli %c7_i32_128, %c8_i32_131 : i32
    %555 = arith.index_cast %554 : i32 to index
    %c0_132 = arith.constant 0 : index
    %556 = vector.load %arg7[%555, %c0_132] : memref<64x256xf32, #tpu.memory_space<vmem>>, vector<8x128xf32>
    %c8_i32_133 = arith.constant 8 : i32
    %557 = arith.muli %551, %c8_i32_133 : i32
    %558 = arith.index_cast %557 : i32 to index
    %c128_134 = arith.constant 128 : index
    %559 = vector.load %arg7[%558, %c128_134] : memref<64x256xf32, #tpu.memory_space<vmem>>, vector<8x128xf32>
    %560 = vector.extract_strided_slice %553 {offsets = [0, 0], sizes = [8, 128], strides = [1, 1]} : vector<8x256xf32> to vector<8x128xf32>
    %561 = arith.addf %556, %560 : vector<8x128xf32>
    %562 = vector.extract_strided_slice %561 {offsets = [0, 0], sizes = [8, 32], strides = [1, 1]} : vector<8x128xf32> to vector<8x32xf32>
    %563 = arith.negf %562 : vector<8x32xf32>
    %564 = math.exp %563 : vector<8x32xf32>
    %cst_135 = arith.constant 1.000000e+00 : f32
    %565 = vector.broadcast %cst_135 : f32 to vector<8x32xf32>
    %566 = arith.addf %565, %564 : vector<8x32xf32>
    %567 = arith.divf %565, %566 : vector<8x32xf32>
    %568 = vector.extract_strided_slice %561 {offsets = [0, 32], sizes = [8, 32], strides = [1, 1]} : vector<8x128xf32> to vector<8x32xf32>
    %569 = arith.negf %568 : vector<8x32xf32>
    %570 = math.exp %569 : vector<8x32xf32>
    %cst_136 = arith.constant 1.000000e+00 : f32
    %571 = vector.broadcast %cst_136 : f32 to vector<8x32xf32>
    %572 = arith.addf %571, %570 : vector<8x32xf32>
    %573 = arith.divf %571, %572 : vector<8x32xf32>
    %574 = vector.extract_strided_slice %561 {offsets = [0, 64], sizes = [8, 32], strides = [1, 1]} : vector<8x128xf32> to vector<8x32xf32>
    %575 = math.tanh %574 : vector<8x32xf32>
    %576 = vector.extract_strided_slice %561 {offsets = [0, 96], sizes = [8, 32], strides = [1, 1]} : vector<8x128xf32> to vector<8x32xf32>
    %577 = arith.negf %576 : vector<8x32xf32>
    %578 = math.exp %577 : vector<8x32xf32>
    %cst_137 = arith.constant 1.000000e+00 : f32
    %579 = vector.broadcast %cst_137 : f32 to vector<8x32xf32>
    %580 = arith.addf %579, %578 : vector<8x32xf32>
    %581 = arith.divf %579, %580 : vector<8x32xf32>
    %582 = arith.mulf %573, %510 : vector<8x32xf32>
    %583 = arith.mulf %567, %575 : vector<8x32xf32>
    %584 = arith.addf %582, %583 : vector<8x32xf32>
    %585 = math.tanh %584 : vector<8x32xf32>
    %586 = arith.mulf %581, %585 : vector<8x32xf32>
    %587 = vector.extract_strided_slice %553 {offsets = [0, 128], sizes = [8, 128], strides = [1, 1]} : vector<8x256xf32> to vector<8x128xf32>
    %588 = arith.addf %559, %587 : vector<8x128xf32>
    %589 = vector.extract_strided_slice %588 {offsets = [0, 0], sizes = [8, 32], strides = [1, 1]} : vector<8x128xf32> to vector<8x32xf32>
    %590 = arith.negf %589 : vector<8x32xf32>
    %591 = math.exp %590 : vector<8x32xf32>
    %cst_138 = arith.constant 1.000000e+00 : f32
    %592 = vector.broadcast %cst_138 : f32 to vector<8x32xf32>
    %593 = arith.addf %592, %591 : vector<8x32xf32>
    %594 = arith.divf %592, %593 : vector<8x32xf32>
    %595 = vector.extract_strided_slice %588 {offsets = [0, 32], sizes = [8, 32], strides = [1, 1]} : vector<8x128xf32> to vector<8x32xf32>
    %596 = arith.negf %595 : vector<8x32xf32>
    %597 = math.exp %596 : vector<8x32xf32>
    %cst_139 = arith.constant 1.000000e+00 : f32
    %598 = vector.broadcast %cst_139 : f32 to vector<8x32xf32>
    %599 = arith.addf %598, %597 : vector<8x32xf32>
    %600 = arith.divf %598, %599 : vector<8x32xf32>
    %601 = vector.extract_strided_slice %588 {offsets = [0, 64], sizes = [8, 32], strides = [1, 1]} : vector<8x128xf32> to vector<8x32xf32>
    %602 = math.tanh %601 : vector<8x32xf32>
    %603 = vector.extract_strided_slice %588 {offsets = [0, 96], sizes = [8, 32], strides = [1, 1]} : vector<8x128xf32> to vector<8x32xf32>
    %604 = arith.negf %603 : vector<8x32xf32>
    %605 = math.exp %604 : vector<8x32xf32>
    %cst_140 = arith.constant 1.000000e+00 : f32
    %606 = vector.broadcast %cst_140 : f32 to vector<8x32xf32>
    %607 = arith.addf %606, %605 : vector<8x32xf32>
    %608 = arith.divf %606, %607 : vector<8x32xf32>
    %609 = arith.mulf %600, %537 : vector<8x32xf32>
    %610 = arith.mulf %594, %602 : vector<8x32xf32>
    %611 = arith.addf %609, %610 : vector<8x32xf32>
    %612 = math.tanh %611 : vector<8x32xf32>
    %613 = arith.mulf %608, %612 : vector<8x32xf32>
    %614 = arith.truncf %586 : vector<8x32xf32> to vector<8x32xbf16>
    %615 = arith.index_cast %c7_i32_128 : i32 to index
    %c0_141 = arith.constant 0 : index
    %c0_142 = arith.constant 0 : index
    %616 = vector.load %arg6[%615, %c0_141, %c0_142] : memref<8x8x64xbf16, #tpu.memory_space<vmem>>, vector<1x8x32xbf16>
    %617 = vector.shape_cast %616 : vector<1x8x32xbf16> to vector<8x32xbf16>
    %618 = vector.shape_cast %614 : vector<8x32xbf16> to vector<1x8x32xbf16>
    tpu.vector_store %arg6[%615, %c0_141, %c0_142], %618 {strides = array<i32>} : memref<8x8x64xbf16, #tpu.memory_space<vmem>>, vector<1x8x32xbf16>,
    %619 = arith.truncf %613 : vector<8x32xf32> to vector<8x32xbf16>
    %620 = arith.index_cast %551 : i32 to index
    %c0_143 = arith.constant 0 : index
    %c32_144 = arith.constant 32 : index
    %621 = vector.load %arg6[%620, %c0_143, %c32_144] : memref<8x8x64xbf16, #tpu.memory_space<vmem>>, vector<1x8x32xbf16>
    %622 = vector.shape_cast %621 : vector<1x8x32xbf16> to vector<8x32xbf16>
    %623 = vector.shape_cast %619 : vector<8x32xbf16> to vector<1x8x32xbf16>
    tpu.vector_store %arg6[%620, %c0_143, %c32_144], %623 {strides = array<i32>} : memref<8x8x64xbf16, #tpu.memory_space<vmem>>, vector<1x8x32xbf16>,
    %624 = tpu.concatenate %586, %613 in 1 : vector<8x32xf32>, vector<8x32xf32> -> vector<8x64xf32>
    %c8_i32_145 = arith.constant 8 : i32
    return
  }
}

module attributes {stable_mosaic.version = 11 : i64} {
  func.func @kernel(%arg0: memref<64x64xbf16, #tpu.memory_space<vmem>>, %arg1: memref<64x256xbf16, #tpu.memory_space<vmem>>, %arg2: memref<1x256xf32, #tpu.memory_space<vmem>>, %arg3: memref<64x256xbf16, #tpu.memory_space<vmem>>, %arg4: memref<64x21xbf16, #tpu.memory_space<vmem>>, %arg5: memref<1x21xf32, #tpu.memory_space<vmem>>, %arg6: memref<1x21xf32, #tpu.memory_space<vmem>>, %arg7: memref<1x21xf32, #tpu.memory_space<vmem>>, %arg8: memref<21x4xf32, #tpu.memory_space<vmem>>, %arg9: memref<1x4xf32, #tpu.memory_space<vmem>>, %arg10: memref<8x4xf32, #tpu.memory_space<vmem>>, %arg11: memref<64x256xf32, #tpu.memory_space<vmem>>) attributes {dimension_semantics = [], scalar_prefetch = 0 : i64, scratch_operands = 1 : i64, tpu.core_type = #tpu.core_type<tc>} {
    %c0 = arith.constant 0 : index
    %c0_0 = arith.constant 0 : index
    %0 = vector.load %arg0[%c0, %c0_0] : memref<64x64xbf16, #tpu.memory_space<vmem>>, vector<64x64xbf16>
    %c0_1 = arith.constant 0 : index
    %c0_2 = arith.constant 0 : index
    %1 = vector.load %arg1[%c0_1, %c0_2] : memref<64x256xbf16, #tpu.memory_space<vmem>>, vector<64x256xbf16>
    %cst = arith.constant dense<0.000000e+00> : vector<64x256xf32>
    %2 = tpu.matmul %0, %1, %cst {dimension_numbers = #tpu.dot_dimension_numbers<[1], [0], [0], [1], [0, 0, 1, 1], [], []>} : vector<64x64xbf16>, vector<64x256xbf16>, vector<64x256xf32> -> vector<64x256xf32>
    %c0_3 = arith.constant 0 : index
    %c0_4 = arith.constant 0 : index
    %3 = vector.load %arg2[%c0_3, %c0_4] : memref<1x256xf32, #tpu.memory_space<vmem>>, vector<1x256xf32>
    %4 = vector.broadcast %3 : vector<1x256xf32> to vector<64x256xf32>
    %5 = arith.addf %2, %4 : vector<64x256xf32>
    %c0_5 = arith.constant 0 : index
    %c0_6 = arith.constant 0 : index
    %6 = vector.load %arg11[%c0_5, %c0_6] : memref<64x256xf32, #tpu.memory_space<vmem>>, vector<64x256xf32>
    tpu.vector_store %arg11[%c0_5, %c0_6], %5 {strides = array<i32>} : memref<64x256xf32, #tpu.memory_space<vmem>>, vector<64x256xf32>,
    %c0_7 = arith.constant 0 : index
    %c0_8 = arith.constant 0 : index
    %7 = vector.load %arg3[%c0_7, %c0_8] : memref<64x256xbf16, #tpu.memory_space<vmem>>, vector<64x256xbf16>
    %cst_9 = arith.constant 0.000000e+00 : f32
    %8 = vector.broadcast %cst_9 : f32 to vector<8x32xf32>
    %cst_10 = arith.constant 0.000000e+00 : f32
    %9 = vector.broadcast %cst_10 : f32 to vector<8x64xf32>
    %c0_i32 = arith.constant 0 : i32
    %c7_i32 = arith.constant 7 : i32
    %10 = arith.subi %c7_i32, %c0_i32 : i32
    %11 = arith.truncf %9 : vector<8x64xf32> to vector<8x64xbf16>
    %cst_11 = arith.constant dense<0.000000e+00> : vector<8x256xf32>
    %12 = tpu.matmul %11, %7, %cst_11 {dimension_numbers = #tpu.dot_dimension_numbers<[1], [0], [0], [1], [0, 0, 1, 1], [], []>} : vector<8x64xbf16>, vector<64x256xbf16>, vector<8x256xf32> -> vector<8x256xf32>
    %c8_i32 = arith.constant 8 : i32
    %13 = arith.muli %c0_i32, %c8_i32 : i32
    %14 = arith.index_cast %13 : i32 to index
    %c0_12 = arith.constant 0 : index
    %15 = vector.load %arg11[%14, %c0_12] : memref<64x256xf32, #tpu.memory_space<vmem>>, vector<8x128xf32>
    %c8_i32_13 = arith.constant 8 : i32
    %16 = arith.muli %10, %c8_i32_13 : i32
    %17 = arith.index_cast %16 : i32 to index
    %c128 = arith.constant 128 : index
    %18 = vector.load %arg11[%17, %c128] : memref<64x256xf32, #tpu.memory_space<vmem>>, vector<8x128xf32>
    %19 = vector.extract_strided_slice %12 {offsets = [0, 0], sizes = [8, 128], strides = [1, 1]} : vector<8x256xf32> to vector<8x128xf32>
    %20 = arith.addf %15, %19 : vector<8x128xf32>
    %21 = vector.extract_strided_slice %20 {offsets = [0, 0], sizes = [8, 32], strides = [1, 1]} : vector<8x128xf32> to vector<8x32xf32>
    %22 = arith.negf %21 : vector<8x32xf32>
    %23 = math.exp %22 : vector<8x32xf32>
    %cst_14 = arith.constant 1.000000e+00 : f32
    %24 = vector.broadcast %cst_14 : f32 to vector<8x32xf32>
    %25 = arith.addf %24, %23 : vector<8x32xf32>
    %26 = arith.divf %24, %25 : vector<8x32xf32>
    %27 = vector.extract_strided_slice %20 {offsets = [0, 32], sizes = [8, 32], strides = [1, 1]} : vector<8x128xf32> to vector<8x32xf32>
    %28 = arith.negf %27 : vector<8x32xf32>
    %29 = math.exp %28 : vector<8x32xf32>
    %cst_15 = arith.constant 1.000000e+00 : f32
    %30 = vector.broadcast %cst_15 : f32 to vector<8x32xf32>
    %31 = arith.addf %30, %29 : vector<8x32xf32>
    %32 = arith.divf %30, %31 : vector<8x32xf32>
    %33 = vector.extract_strided_slice %20 {offsets = [0, 64], sizes = [8, 32], strides = [1, 1]} : vector<8x128xf32> to vector<8x32xf32>
    %34 = math.tanh %33 : vector<8x32xf32>
    %35 = vector.extract_strided_slice %20 {offsets = [0, 96], sizes = [8, 32], strides = [1, 1]} : vector<8x128xf32> to vector<8x32xf32>
    %36 = arith.negf %35 : vector<8x32xf32>
    %37 = math.exp %36 : vector<8x32xf32>
    %cst_16 = arith.constant 1.000000e+00 : f32
    %38 = vector.broadcast %cst_16 : f32 to vector<8x32xf32>
    %39 = arith.addf %38, %37 : vector<8x32xf32>
    %40 = arith.divf %38, %39 : vector<8x32xf32>
    %41 = arith.mulf %32, %8 : vector<8x32xf32>
    %42 = arith.mulf %26, %34 : vector<8x32xf32>
    %43 = arith.addf %41, %42 : vector<8x32xf32>
    %44 = math.tanh %43 : vector<8x32xf32>
    %45 = arith.mulf %40, %44 : vector<8x32xf32>
    %46 = vector.extract_strided_slice %12 {offsets = [0, 128], sizes = [8, 128], strides = [1, 1]} : vector<8x256xf32> to vector<8x128xf32>
    %47 = arith.addf %18, %46 : vector<8x128xf32>
    %48 = vector.extract_strided_slice %47 {offsets = [0, 0], sizes = [8, 32], strides = [1, 1]} : vector<8x128xf32> to vector<8x32xf32>
    %49 = arith.negf %48 : vector<8x32xf32>
    %50 = math.exp %49 : vector<8x32xf32>
    %cst_17 = arith.constant 1.000000e+00 : f32
    %51 = vector.broadcast %cst_17 : f32 to vector<8x32xf32>
    %52 = arith.addf %51, %50 : vector<8x32xf32>
    %53 = arith.divf %51, %52 : vector<8x32xf32>
    %54 = vector.extract_strided_slice %47 {offsets = [0, 32], sizes = [8, 32], strides = [1, 1]} : vector<8x128xf32> to vector<8x32xf32>
    %55 = arith.negf %54 : vector<8x32xf32>
    %56 = math.exp %55 : vector<8x32xf32>
    %cst_18 = arith.constant 1.000000e+00 : f32
    %57 = vector.broadcast %cst_18 : f32 to vector<8x32xf32>
    %58 = arith.addf %57, %56 : vector<8x32xf32>
    %59 = arith.divf %57, %58 : vector<8x32xf32>
    %60 = vector.extract_strided_slice %47 {offsets = [0, 64], sizes = [8, 32], strides = [1, 1]} : vector<8x128xf32> to vector<8x32xf32>
    %61 = math.tanh %60 : vector<8x32xf32>
    %62 = vector.extract_strided_slice %47 {offsets = [0, 96], sizes = [8, 32], strides = [1, 1]} : vector<8x128xf32> to vector<8x32xf32>
    %63 = arith.negf %62 : vector<8x32xf32>
    %64 = math.exp %63 : vector<8x32xf32>
    %cst_19 = arith.constant 1.000000e+00 : f32
    %65 = vector.broadcast %cst_19 : f32 to vector<8x32xf32>
    %66 = arith.addf %65, %64 : vector<8x32xf32>
    %67 = arith.divf %65, %66 : vector<8x32xf32>
    %68 = arith.mulf %59, %8 : vector<8x32xf32>
    %69 = arith.mulf %53, %61 : vector<8x32xf32>
    %70 = arith.addf %68, %69 : vector<8x32xf32>
    %71 = math.tanh %70 : vector<8x32xf32>
    %72 = arith.mulf %67, %71 : vector<8x32xf32>
    %73 = tpu.concatenate %45, %72 in 1 : vector<8x32xf32>, vector<8x32xf32> -> vector<8x64xf32>
    %c1_i32 = arith.constant 1 : i32
    %c7_i32_20 = arith.constant 7 : i32
    %74 = arith.subi %c7_i32_20, %c1_i32 : i32
    %75 = arith.truncf %73 : vector<8x64xf32> to vector<8x64xbf16>
    %cst_21 = arith.constant dense<0.000000e+00> : vector<8x256xf32>
    %76 = tpu.matmul %75, %7, %cst_21 {dimension_numbers = #tpu.dot_dimension_numbers<[1], [0], [0], [1], [0, 0, 1, 1], [], []>} : vector<8x64xbf16>, vector<64x256xbf16>, vector<8x256xf32> -> vector<8x256xf32>
    %c8_i32_22 = arith.constant 8 : i32
    %77 = arith.muli %c1_i32, %c8_i32_22 : i32
    %78 = arith.index_cast %77 : i32 to index
    %c0_23 = arith.constant 0 : index
    %79 = vector.load %arg11[%78, %c0_23] : memref<64x256xf32, #tpu.memory_space<vmem>>, vector<8x128xf32>
    %c8_i32_24 = arith.constant 8 : i32
    %80 = arith.muli %74, %c8_i32_24 : i32
    %81 = arith.index_cast %80 : i32 to index
    %c128_25 = arith.constant 128 : index
    %82 = vector.load %arg11[%81, %c128_25] : memref<64x256xf32, #tpu.memory_space<vmem>>, vector<8x128xf32>
    %83 = vector.extract_strided_slice %76 {offsets = [0, 0], sizes = [8, 128], strides = [1, 1]} : vector<8x256xf32> to vector<8x128xf32>
    %84 = arith.addf %79, %83 : vector<8x128xf32>
    %85 = vector.extract_strided_slice %84 {offsets = [0, 0], sizes = [8, 32], strides = [1, 1]} : vector<8x128xf32> to vector<8x32xf32>
    %86 = arith.negf %85 : vector<8x32xf32>
    %87 = math.exp %86 : vector<8x32xf32>
    %cst_26 = arith.constant 1.000000e+00 : f32
    %88 = vector.broadcast %cst_26 : f32 to vector<8x32xf32>
    %89 = arith.addf %88, %87 : vector<8x32xf32>
    %90 = arith.divf %88, %89 : vector<8x32xf32>
    %91 = vector.extract_strided_slice %84 {offsets = [0, 32], sizes = [8, 32], strides = [1, 1]} : vector<8x128xf32> to vector<8x32xf32>
    %92 = arith.negf %91 : vector<8x32xf32>
    %93 = math.exp %92 : vector<8x32xf32>
    %cst_27 = arith.constant 1.000000e+00 : f32
    %94 = vector.broadcast %cst_27 : f32 to vector<8x32xf32>
    %95 = arith.addf %94, %93 : vector<8x32xf32>
    %96 = arith.divf %94, %95 : vector<8x32xf32>
    %97 = vector.extract_strided_slice %84 {offsets = [0, 64], sizes = [8, 32], strides = [1, 1]} : vector<8x128xf32> to vector<8x32xf32>
    %98 = math.tanh %97 : vector<8x32xf32>
    %99 = vector.extract_strided_slice %84 {offsets = [0, 96], sizes = [8, 32], strides = [1, 1]} : vector<8x128xf32> to vector<8x32xf32>
    %100 = arith.negf %99 : vector<8x32xf32>
    %101 = math.exp %100 : vector<8x32xf32>
    %cst_28 = arith.constant 1.000000e+00 : f32
    %102 = vector.broadcast %cst_28 : f32 to vector<8x32xf32>
    %103 = arith.addf %102, %101 : vector<8x32xf32>
    %104 = arith.divf %102, %103 : vector<8x32xf32>
    %105 = arith.mulf %96, %43 : vector<8x32xf32>
    %106 = arith.mulf %90, %98 : vector<8x32xf32>
    %107 = arith.addf %105, %106 : vector<8x32xf32>
    %108 = math.tanh %107 : vector<8x32xf32>
    %109 = arith.mulf %104, %108 : vector<8x32xf32>
    %110 = vector.extract_strided_slice %76 {offsets = [0, 128], sizes = [8, 128], strides = [1, 1]} : vector<8x256xf32> to vector<8x128xf32>
    %111 = arith.addf %82, %110 : vector<8x128xf32>
    %112 = vector.extract_strided_slice %111 {offsets = [0, 0], sizes = [8, 32], strides = [1, 1]} : vector<8x128xf32> to vector<8x32xf32>
    %113 = arith.negf %112 : vector<8x32xf32>
    %114 = math.exp %113 : vector<8x32xf32>
    %cst_29 = arith.constant 1.000000e+00 : f32
    %115 = vector.broadcast %cst_29 : f32 to vector<8x32xf32>
    %116 = arith.addf %115, %114 : vector<8x32xf32>
    %117 = arith.divf %115, %116 : vector<8x32xf32>
    %118 = vector.extract_strided_slice %111 {offsets = [0, 32], sizes = [8, 32], strides = [1, 1]} : vector<8x128xf32> to vector<8x32xf32>
    %119 = arith.negf %118 : vector<8x32xf32>
    %120 = math.exp %119 : vector<8x32xf32>
    %cst_30 = arith.constant 1.000000e+00 : f32
    %121 = vector.broadcast %cst_30 : f32 to vector<8x32xf32>
    %122 = arith.addf %121, %120 : vector<8x32xf32>
    %123 = arith.divf %121, %122 : vector<8x32xf32>
    %124 = vector.extract_strided_slice %111 {offsets = [0, 64], sizes = [8, 32], strides = [1, 1]} : vector<8x128xf32> to vector<8x32xf32>
    %125 = math.tanh %124 : vector<8x32xf32>
    %126 = vector.extract_strided_slice %111 {offsets = [0, 96], sizes = [8, 32], strides = [1, 1]} : vector<8x128xf32> to vector<8x32xf32>
    %127 = arith.negf %126 : vector<8x32xf32>
    %128 = math.exp %127 : vector<8x32xf32>
    %cst_31 = arith.constant 1.000000e+00 : f32
    %129 = vector.broadcast %cst_31 : f32 to vector<8x32xf32>
    %130 = arith.addf %129, %128 : vector<8x32xf32>
    %131 = arith.divf %129, %130 : vector<8x32xf32>
    %132 = arith.mulf %123, %70 : vector<8x32xf32>
    %133 = arith.mulf %117, %125 : vector<8x32xf32>
    %134 = arith.addf %132, %133 : vector<8x32xf32>
    %135 = math.tanh %134 : vector<8x32xf32>
    %136 = arith.mulf %131, %135 : vector<8x32xf32>
    %137 = tpu.concatenate %109, %136 in 1 : vector<8x32xf32>, vector<8x32xf32> -> vector<8x64xf32>
    %c2_i32 = arith.constant 2 : i32
    %c7_i32_32 = arith.constant 7 : i32
    %138 = arith.subi %c7_i32_32, %c2_i32 : i32
    %139 = arith.truncf %137 : vector<8x64xf32> to vector<8x64xbf16>
    %cst_33 = arith.constant dense<0.000000e+00> : vector<8x256xf32>
    %140 = tpu.matmul %139, %7, %cst_33 {dimension_numbers = #tpu.dot_dimension_numbers<[1], [0], [0], [1], [0, 0, 1, 1], [], []>} : vector<8x64xbf16>, vector<64x256xbf16>, vector<8x256xf32> -> vector<8x256xf32>
    %c8_i32_34 = arith.constant 8 : i32
    %141 = arith.muli %c2_i32, %c8_i32_34 : i32
    %142 = arith.index_cast %141 : i32 to index
    %c0_35 = arith.constant 0 : index
    %143 = vector.load %arg11[%142, %c0_35] : memref<64x256xf32, #tpu.memory_space<vmem>>, vector<8x128xf32>
    %c8_i32_36 = arith.constant 8 : i32
    %144 = arith.muli %138, %c8_i32_36 : i32
    %145 = arith.index_cast %144 : i32 to index
    %c128_37 = arith.constant 128 : index
    %146 = vector.load %arg11[%145, %c128_37] : memref<64x256xf32, #tpu.memory_space<vmem>>, vector<8x128xf32>
    %147 = vector.extract_strided_slice %140 {offsets = [0, 0], sizes = [8, 128], strides = [1, 1]} : vector<8x256xf32> to vector<8x128xf32>
    %148 = arith.addf %143, %147 : vector<8x128xf32>
    %149 = vector.extract_strided_slice %148 {offsets = [0, 0], sizes = [8, 32], strides = [1, 1]} : vector<8x128xf32> to vector<8x32xf32>
    %150 = arith.negf %149 : vector<8x32xf32>
    %151 = math.exp %150 : vector<8x32xf32>
    %cst_38 = arith.constant 1.000000e+00 : f32
    %152 = vector.broadcast %cst_38 : f32 to vector<8x32xf32>
    %153 = arith.addf %152, %151 : vector<8x32xf32>
    %154 = arith.divf %152, %153 : vector<8x32xf32>
    %155 = vector.extract_strided_slice %148 {offsets = [0, 32], sizes = [8, 32], strides = [1, 1]} : vector<8x128xf32> to vector<8x32xf32>
    %156 = arith.negf %155 : vector<8x32xf32>
    %157 = math.exp %156 : vector<8x32xf32>
    %cst_39 = arith.constant 1.000000e+00 : f32
    %158 = vector.broadcast %cst_39 : f32 to vector<8x32xf32>
    %159 = arith.addf %158, %157 : vector<8x32xf32>
    %160 = arith.divf %158, %159 : vector<8x32xf32>
    %161 = vector.extract_strided_slice %148 {offsets = [0, 64], sizes = [8, 32], strides = [1, 1]} : vector<8x128xf32> to vector<8x32xf32>
    %162 = math.tanh %161 : vector<8x32xf32>
    %163 = vector.extract_strided_slice %148 {offsets = [0, 96], sizes = [8, 32], strides = [1, 1]} : vector<8x128xf32> to vector<8x32xf32>
    %164 = arith.negf %163 : vector<8x32xf32>
    %165 = math.exp %164 : vector<8x32xf32>
    %cst_40 = arith.constant 1.000000e+00 : f32
    %166 = vector.broadcast %cst_40 : f32 to vector<8x32xf32>
    %167 = arith.addf %166, %165 : vector<8x32xf32>
    %168 = arith.divf %166, %167 : vector<8x32xf32>
    %169 = arith.mulf %160, %107 : vector<8x32xf32>
    %170 = arith.mulf %154, %162 : vector<8x32xf32>
    %171 = arith.addf %169, %170 : vector<8x32xf32>
    %172 = math.tanh %171 : vector<8x32xf32>
    %173 = arith.mulf %168, %172 : vector<8x32xf32>
    %174 = vector.extract_strided_slice %140 {offsets = [0, 128], sizes = [8, 128], strides = [1, 1]} : vector<8x256xf32> to vector<8x128xf32>
    %175 = arith.addf %146, %174 : vector<8x128xf32>
    %176 = vector.extract_strided_slice %175 {offsets = [0, 0], sizes = [8, 32], strides = [1, 1]} : vector<8x128xf32> to vector<8x32xf32>
    %177 = arith.negf %176 : vector<8x32xf32>
    %178 = math.exp %177 : vector<8x32xf32>
    %cst_41 = arith.constant 1.000000e+00 : f32
    %179 = vector.broadcast %cst_41 : f32 to vector<8x32xf32>
    %180 = arith.addf %179, %178 : vector<8x32xf32>
    %181 = arith.divf %179, %180 : vector<8x32xf32>
    %182 = vector.extract_strided_slice %175 {offsets = [0, 32], sizes = [8, 32], strides = [1, 1]} : vector<8x128xf32> to vector<8x32xf32>
    %183 = arith.negf %182 : vector<8x32xf32>
    %184 = math.exp %183 : vector<8x32xf32>
    %cst_42 = arith.constant 1.000000e+00 : f32
    %185 = vector.broadcast %cst_42 : f32 to vector<8x32xf32>
    %186 = arith.addf %185, %184 : vector<8x32xf32>
    %187 = arith.divf %185, %186 : vector<8x32xf32>
    %188 = vector.extract_strided_slice %175 {offsets = [0, 64], sizes = [8, 32], strides = [1, 1]} : vector<8x128xf32> to vector<8x32xf32>
    %189 = math.tanh %188 : vector<8x32xf32>
    %190 = vector.extract_strided_slice %175 {offsets = [0, 96], sizes = [8, 32], strides = [1, 1]} : vector<8x128xf32> to vector<8x32xf32>
    %191 = arith.negf %190 : vector<8x32xf32>
    %192 = math.exp %191 : vector<8x32xf32>
    %cst_43 = arith.constant 1.000000e+00 : f32
    %193 = vector.broadcast %cst_43 : f32 to vector<8x32xf32>
    %194 = arith.addf %193, %192 : vector<8x32xf32>
    %195 = arith.divf %193, %194 : vector<8x32xf32>
    %196 = arith.mulf %187, %134 : vector<8x32xf32>
    %197 = arith.mulf %181, %189 : vector<8x32xf32>
    %198 = arith.addf %196, %197 : vector<8x32xf32>
    %199 = math.tanh %198 : vector<8x32xf32>
    %200 = arith.mulf %195, %199 : vector<8x32xf32>
    %201 = tpu.concatenate %173, %200 in 1 : vector<8x32xf32>, vector<8x32xf32> -> vector<8x64xf32>
    %c3_i32 = arith.constant 3 : i32
    %c7_i32_44 = arith.constant 7 : i32
    %202 = arith.subi %c7_i32_44, %c3_i32 : i32
    %203 = arith.truncf %201 : vector<8x64xf32> to vector<8x64xbf16>
    %cst_45 = arith.constant dense<0.000000e+00> : vector<8x256xf32>
    %204 = tpu.matmul %203, %7, %cst_45 {dimension_numbers = #tpu.dot_dimension_numbers<[1], [0], [0], [1], [0, 0, 1, 1], [], []>} : vector<8x64xbf16>, vector<64x256xbf16>, vector<8x256xf32> -> vector<8x256xf32>
    %c8_i32_46 = arith.constant 8 : i32
    %205 = arith.muli %c3_i32, %c8_i32_46 : i32
    %206 = arith.index_cast %205 : i32 to index
    %c0_47 = arith.constant 0 : index
    %207 = vector.load %arg11[%206, %c0_47] : memref<64x256xf32, #tpu.memory_space<vmem>>, vector<8x128xf32>
    %c8_i32_48 = arith.constant 8 : i32
    %208 = arith.muli %202, %c8_i32_48 : i32
    %209 = arith.index_cast %208 : i32 to index
    %c128_49 = arith.constant 128 : index
    %210 = vector.load %arg11[%209, %c128_49] : memref<64x256xf32, #tpu.memory_space<vmem>>, vector<8x128xf32>
    %211 = vector.extract_strided_slice %204 {offsets = [0, 0], sizes = [8, 128], strides = [1, 1]} : vector<8x256xf32> to vector<8x128xf32>
    %212 = arith.addf %207, %211 : vector<8x128xf32>
    %213 = vector.extract_strided_slice %212 {offsets = [0, 0], sizes = [8, 32], strides = [1, 1]} : vector<8x128xf32> to vector<8x32xf32>
    %214 = arith.negf %213 : vector<8x32xf32>
    %215 = math.exp %214 : vector<8x32xf32>
    %cst_50 = arith.constant 1.000000e+00 : f32
    %216 = vector.broadcast %cst_50 : f32 to vector<8x32xf32>
    %217 = arith.addf %216, %215 : vector<8x32xf32>
    %218 = arith.divf %216, %217 : vector<8x32xf32>
    %219 = vector.extract_strided_slice %212 {offsets = [0, 32], sizes = [8, 32], strides = [1, 1]} : vector<8x128xf32> to vector<8x32xf32>
    %220 = arith.negf %219 : vector<8x32xf32>
    %221 = math.exp %220 : vector<8x32xf32>
    %cst_51 = arith.constant 1.000000e+00 : f32
    %222 = vector.broadcast %cst_51 : f32 to vector<8x32xf32>
    %223 = arith.addf %222, %221 : vector<8x32xf32>
    %224 = arith.divf %222, %223 : vector<8x32xf32>
    %225 = vector.extract_strided_slice %212 {offsets = [0, 64], sizes = [8, 32], strides = [1, 1]} : vector<8x128xf32> to vector<8x32xf32>
    %226 = math.tanh %225 : vector<8x32xf32>
    %227 = vector.extract_strided_slice %212 {offsets = [0, 96], sizes = [8, 32], strides = [1, 1]} : vector<8x128xf32> to vector<8x32xf32>
    %228 = arith.negf %227 : vector<8x32xf32>
    %229 = math.exp %228 : vector<8x32xf32>
    %cst_52 = arith.constant 1.000000e+00 : f32
    %230 = vector.broadcast %cst_52 : f32 to vector<8x32xf32>
    %231 = arith.addf %230, %229 : vector<8x32xf32>
    %232 = arith.divf %230, %231 : vector<8x32xf32>
    %233 = arith.mulf %224, %171 : vector<8x32xf32>
    %234 = arith.mulf %218, %226 : vector<8x32xf32>
    %235 = arith.addf %233, %234 : vector<8x32xf32>
    %236 = math.tanh %235 : vector<8x32xf32>
    %237 = arith.mulf %232, %236 : vector<8x32xf32>
    %238 = vector.extract_strided_slice %204 {offsets = [0, 128], sizes = [8, 128], strides = [1, 1]} : vector<8x256xf32> to vector<8x128xf32>
    %239 = arith.addf %210, %238 : vector<8x128xf32>
    %240 = vector.extract_strided_slice %239 {offsets = [0, 0], sizes = [8, 32], strides = [1, 1]} : vector<8x128xf32> to vector<8x32xf32>
    %241 = arith.negf %240 : vector<8x32xf32>
    %242 = math.exp %241 : vector<8x32xf32>
    %cst_53 = arith.constant 1.000000e+00 : f32
    %243 = vector.broadcast %cst_53 : f32 to vector<8x32xf32>
    %244 = arith.addf %243, %242 : vector<8x32xf32>
    %245 = arith.divf %243, %244 : vector<8x32xf32>
    %246 = vector.extract_strided_slice %239 {offsets = [0, 32], sizes = [8, 32], strides = [1, 1]} : vector<8x128xf32> to vector<8x32xf32>
    %247 = arith.negf %246 : vector<8x32xf32>
    %248 = math.exp %247 : vector<8x32xf32>
    %cst_54 = arith.constant 1.000000e+00 : f32
    %249 = vector.broadcast %cst_54 : f32 to vector<8x32xf32>
    %250 = arith.addf %249, %248 : vector<8x32xf32>
    %251 = arith.divf %249, %250 : vector<8x32xf32>
    %252 = vector.extract_strided_slice %239 {offsets = [0, 64], sizes = [8, 32], strides = [1, 1]} : vector<8x128xf32> to vector<8x32xf32>
    %253 = math.tanh %252 : vector<8x32xf32>
    %254 = vector.extract_strided_slice %239 {offsets = [0, 96], sizes = [8, 32], strides = [1, 1]} : vector<8x128xf32> to vector<8x32xf32>
    %255 = arith.negf %254 : vector<8x32xf32>
    %256 = math.exp %255 : vector<8x32xf32>
    %cst_55 = arith.constant 1.000000e+00 : f32
    %257 = vector.broadcast %cst_55 : f32 to vector<8x32xf32>
    %258 = arith.addf %257, %256 : vector<8x32xf32>
    %259 = arith.divf %257, %258 : vector<8x32xf32>
    %260 = arith.mulf %251, %198 : vector<8x32xf32>
    %261 = arith.mulf %245, %253 : vector<8x32xf32>
    %262 = arith.addf %260, %261 : vector<8x32xf32>
    %263 = math.tanh %262 : vector<8x32xf32>
    %264 = arith.mulf %259, %263 : vector<8x32xf32>
    %265 = tpu.concatenate %237, %264 in 1 : vector<8x32xf32>, vector<8x32xf32> -> vector<8x64xf32>
    %c4_i32 = arith.constant 4 : i32
    %c7_i32_56 = arith.constant 7 : i32
    %266 = arith.subi %c7_i32_56, %c4_i32 : i32
    %267 = arith.truncf %265 : vector<8x64xf32> to vector<8x64xbf16>
    %cst_57 = arith.constant dense<0.000000e+00> : vector<8x256xf32>
    %268 = tpu.matmul %267, %7, %cst_57 {dimension_numbers = #tpu.dot_dimension_numbers<[1], [0], [0], [1], [0, 0, 1, 1], [], []>} : vector<8x64xbf16>, vector<64x256xbf16>, vector<8x256xf32> -> vector<8x256xf32>
    %c8_i32_58 = arith.constant 8 : i32
    %269 = arith.muli %c4_i32, %c8_i32_58 : i32
    %270 = arith.index_cast %269 : i32 to index
    %c0_59 = arith.constant 0 : index
    %271 = vector.load %arg11[%270, %c0_59] : memref<64x256xf32, #tpu.memory_space<vmem>>, vector<8x128xf32>
    %c8_i32_60 = arith.constant 8 : i32
    %272 = arith.muli %266, %c8_i32_60 : i32
    %273 = arith.index_cast %272 : i32 to index
    %c128_61 = arith.constant 128 : index
    %274 = vector.load %arg11[%273, %c128_61] : memref<64x256xf32, #tpu.memory_space<vmem>>, vector<8x128xf32>
    %275 = vector.extract_strided_slice %268 {offsets = [0, 0], sizes = [8, 128], strides = [1, 1]} : vector<8x256xf32> to vector<8x128xf32>
    %276 = arith.addf %271, %275 : vector<8x128xf32>
    %277 = vector.extract_strided_slice %276 {offsets = [0, 0], sizes = [8, 32], strides = [1, 1]} : vector<8x128xf32> to vector<8x32xf32>
    %278 = arith.negf %277 : vector<8x32xf32>
    %279 = math.exp %278 : vector<8x32xf32>
    %cst_62 = arith.constant 1.000000e+00 : f32
    %280 = vector.broadcast %cst_62 : f32 to vector<8x32xf32>
    %281 = arith.addf %280, %279 : vector<8x32xf32>
    %282 = arith.divf %280, %281 : vector<8x32xf32>
    %283 = vector.extract_strided_slice %276 {offsets = [0, 32], sizes = [8, 32], strides = [1, 1]} : vector<8x128xf32> to vector<8x32xf32>
    %284 = arith.negf %283 : vector<8x32xf32>
    %285 = math.exp %284 : vector<8x32xf32>
    %cst_63 = arith.constant 1.000000e+00 : f32
    %286 = vector.broadcast %cst_63 : f32 to vector<8x32xf32>
    %287 = arith.addf %286, %285 : vector<8x32xf32>
    %288 = arith.divf %286, %287 : vector<8x32xf32>
    %289 = vector.extract_strided_slice %276 {offsets = [0, 64], sizes = [8, 32], strides = [1, 1]} : vector<8x128xf32> to vector<8x32xf32>
    %290 = math.tanh %289 : vector<8x32xf32>
    %291 = vector.extract_strided_slice %276 {offsets = [0, 96], sizes = [8, 32], strides = [1, 1]} : vector<8x128xf32> to vector<8x32xf32>
    %292 = arith.negf %291 : vector<8x32xf32>
    %293 = math.exp %292 : vector<8x32xf32>
    %cst_64 = arith.constant 1.000000e+00 : f32
    %294 = vector.broadcast %cst_64 : f32 to vector<8x32xf32>
    %295 = arith.addf %294, %293 : vector<8x32xf32>
    %296 = arith.divf %294, %295 : vector<8x32xf32>
    %297 = arith.mulf %288, %235 : vector<8x32xf32>
    %298 = arith.mulf %282, %290 : vector<8x32xf32>
    %299 = arith.addf %297, %298 : vector<8x32xf32>
    %300 = math.tanh %299 : vector<8x32xf32>
    %301 = arith.mulf %296, %300 : vector<8x32xf32>
    %302 = vector.extract_strided_slice %268 {offsets = [0, 128], sizes = [8, 128], strides = [1, 1]} : vector<8x256xf32> to vector<8x128xf32>
    %303 = arith.addf %274, %302 : vector<8x128xf32>
    %304 = vector.extract_strided_slice %303 {offsets = [0, 0], sizes = [8, 32], strides = [1, 1]} : vector<8x128xf32> to vector<8x32xf32>
    %305 = arith.negf %304 : vector<8x32xf32>
    %306 = math.exp %305 : vector<8x32xf32>
    %cst_65 = arith.constant 1.000000e+00 : f32
    %307 = vector.broadcast %cst_65 : f32 to vector<8x32xf32>
    %308 = arith.addf %307, %306 : vector<8x32xf32>
    %309 = arith.divf %307, %308 : vector<8x32xf32>
    %310 = vector.extract_strided_slice %303 {offsets = [0, 32], sizes = [8, 32], strides = [1, 1]} : vector<8x128xf32> to vector<8x32xf32>
    %311 = arith.negf %310 : vector<8x32xf32>
    %312 = math.exp %311 : vector<8x32xf32>
    %cst_66 = arith.constant 1.000000e+00 : f32
    %313 = vector.broadcast %cst_66 : f32 to vector<8x32xf32>
    %314 = arith.addf %313, %312 : vector<8x32xf32>
    %315 = arith.divf %313, %314 : vector<8x32xf32>
    %316 = vector.extract_strided_slice %303 {offsets = [0, 64], sizes = [8, 32], strides = [1, 1]} : vector<8x128xf32> to vector<8x32xf32>
    %317 = math.tanh %316 : vector<8x32xf32>
    %318 = vector.extract_strided_slice %303 {offsets = [0, 96], sizes = [8, 32], strides = [1, 1]} : vector<8x128xf32> to vector<8x32xf32>
    %319 = arith.negf %318 : vector<8x32xf32>
    %320 = math.exp %319 : vector<8x32xf32>
    %cst_67 = arith.constant 1.000000e+00 : f32
    %321 = vector.broadcast %cst_67 : f32 to vector<8x32xf32>
    %322 = arith.addf %321, %320 : vector<8x32xf32>
    %323 = arith.divf %321, %322 : vector<8x32xf32>
    %324 = arith.mulf %315, %262 : vector<8x32xf32>
    %325 = arith.mulf %309, %317 : vector<8x32xf32>
    %326 = arith.addf %324, %325 : vector<8x32xf32>
    %327 = math.tanh %326 : vector<8x32xf32>
    %328 = arith.mulf %323, %327 : vector<8x32xf32>
    %329 = tpu.concatenate %301, %328 in 1 : vector<8x32xf32>, vector<8x32xf32> -> vector<8x64xf32>
    %c5_i32 = arith.constant 5 : i32
    %c7_i32_68 = arith.constant 7 : i32
    %330 = arith.subi %c7_i32_68, %c5_i32 : i32
    %331 = arith.truncf %329 : vector<8x64xf32> to vector<8x64xbf16>
    %cst_69 = arith.constant dense<0.000000e+00> : vector<8x256xf32>
    %332 = tpu.matmul %331, %7, %cst_69 {dimension_numbers = #tpu.dot_dimension_numbers<[1], [0], [0], [1], [0, 0, 1, 1], [], []>} : vector<8x64xbf16>, vector<64x256xbf16>, vector<8x256xf32> -> vector<8x256xf32>
    %c8_i32_70 = arith.constant 8 : i32
    %333 = arith.muli %c5_i32, %c8_i32_70 : i32
    %334 = arith.index_cast %333 : i32 to index
    %c0_71 = arith.constant 0 : index
    %335 = vector.load %arg11[%334, %c0_71] : memref<64x256xf32, #tpu.memory_space<vmem>>, vector<8x128xf32>
    %c8_i32_72 = arith.constant 8 : i32
    %336 = arith.muli %330, %c8_i32_72 : i32
    %337 = arith.index_cast %336 : i32 to index
    %c128_73 = arith.constant 128 : index
    %338 = vector.load %arg11[%337, %c128_73] : memref<64x256xf32, #tpu.memory_space<vmem>>, vector<8x128xf32>
    %339 = vector.extract_strided_slice %332 {offsets = [0, 0], sizes = [8, 128], strides = [1, 1]} : vector<8x256xf32> to vector<8x128xf32>
    %340 = arith.addf %335, %339 : vector<8x128xf32>
    %341 = vector.extract_strided_slice %340 {offsets = [0, 0], sizes = [8, 32], strides = [1, 1]} : vector<8x128xf32> to vector<8x32xf32>
    %342 = arith.negf %341 : vector<8x32xf32>
    %343 = math.exp %342 : vector<8x32xf32>
    %cst_74 = arith.constant 1.000000e+00 : f32
    %344 = vector.broadcast %cst_74 : f32 to vector<8x32xf32>
    %345 = arith.addf %344, %343 : vector<8x32xf32>
    %346 = arith.divf %344, %345 : vector<8x32xf32>
    %347 = vector.extract_strided_slice %340 {offsets = [0, 32], sizes = [8, 32], strides = [1, 1]} : vector<8x128xf32> to vector<8x32xf32>
    %348 = arith.negf %347 : vector<8x32xf32>
    %349 = math.exp %348 : vector<8x32xf32>
    %cst_75 = arith.constant 1.000000e+00 : f32
    %350 = vector.broadcast %cst_75 : f32 to vector<8x32xf32>
    %351 = arith.addf %350, %349 : vector<8x32xf32>
    %352 = arith.divf %350, %351 : vector<8x32xf32>
    %353 = vector.extract_strided_slice %340 {offsets = [0, 64], sizes = [8, 32], strides = [1, 1]} : vector<8x128xf32> to vector<8x32xf32>
    %354 = math.tanh %353 : vector<8x32xf32>
    %355 = vector.extract_strided_slice %340 {offsets = [0, 96], sizes = [8, 32], strides = [1, 1]} : vector<8x128xf32> to vector<8x32xf32>
    %356 = arith.negf %355 : vector<8x32xf32>
    %357 = math.exp %356 : vector<8x32xf32>
    %cst_76 = arith.constant 1.000000e+00 : f32
    %358 = vector.broadcast %cst_76 : f32 to vector<8x32xf32>
    %359 = arith.addf %358, %357 : vector<8x32xf32>
    %360 = arith.divf %358, %359 : vector<8x32xf32>
    %361 = arith.mulf %352, %299 : vector<8x32xf32>
    %362 = arith.mulf %346, %354 : vector<8x32xf32>
    %363 = arith.addf %361, %362 : vector<8x32xf32>
    %364 = math.tanh %363 : vector<8x32xf32>
    %365 = arith.mulf %360, %364 : vector<8x32xf32>
    %366 = vector.extract_strided_slice %332 {offsets = [0, 128], sizes = [8, 128], strides = [1, 1]} : vector<8x256xf32> to vector<8x128xf32>
    %367 = arith.addf %338, %366 : vector<8x128xf32>
    %368 = vector.extract_strided_slice %367 {offsets = [0, 0], sizes = [8, 32], strides = [1, 1]} : vector<8x128xf32> to vector<8x32xf32>
    %369 = arith.negf %368 : vector<8x32xf32>
    %370 = math.exp %369 : vector<8x32xf32>
    %cst_77 = arith.constant 1.000000e+00 : f32
    %371 = vector.broadcast %cst_77 : f32 to vector<8x32xf32>
    %372 = arith.addf %371, %370 : vector<8x32xf32>
    %373 = arith.divf %371, %372 : vector<8x32xf32>
    %374 = vector.extract_strided_slice %367 {offsets = [0, 32], sizes = [8, 32], strides = [1, 1]} : vector<8x128xf32> to vector<8x32xf32>
    %375 = arith.negf %374 : vector<8x32xf32>
    %376 = math.exp %375 : vector<8x32xf32>
    %cst_78 = arith.constant 1.000000e+00 : f32
    %377 = vector.broadcast %cst_78 : f32 to vector<8x32xf32>
    %378 = arith.addf %377, %376 : vector<8x32xf32>
    %379 = arith.divf %377, %378 : vector<8x32xf32>
    %380 = vector.extract_strided_slice %367 {offsets = [0, 64], sizes = [8, 32], strides = [1, 1]} : vector<8x128xf32> to vector<8x32xf32>
    %381 = math.tanh %380 : vector<8x32xf32>
    %382 = vector.extract_strided_slice %367 {offsets = [0, 96], sizes = [8, 32], strides = [1, 1]} : vector<8x128xf32> to vector<8x32xf32>
    %383 = arith.negf %382 : vector<8x32xf32>
    %384 = math.exp %383 : vector<8x32xf32>
    %cst_79 = arith.constant 1.000000e+00 : f32
    %385 = vector.broadcast %cst_79 : f32 to vector<8x32xf32>
    %386 = arith.addf %385, %384 : vector<8x32xf32>
    %387 = arith.divf %385, %386 : vector<8x32xf32>
    %388 = arith.mulf %379, %326 : vector<8x32xf32>
    %389 = arith.mulf %373, %381 : vector<8x32xf32>
    %390 = arith.addf %388, %389 : vector<8x32xf32>
    %391 = math.tanh %390 : vector<8x32xf32>
    %392 = arith.mulf %387, %391 : vector<8x32xf32>
    %393 = tpu.concatenate %365, %392 in 1 : vector<8x32xf32>, vector<8x32xf32> -> vector<8x64xf32>
    %c6_i32 = arith.constant 6 : i32
    %c7_i32_80 = arith.constant 7 : i32
    %394 = arith.subi %c7_i32_80, %c6_i32 : i32
    %395 = arith.truncf %393 : vector<8x64xf32> to vector<8x64xbf16>
    %cst_81 = arith.constant dense<0.000000e+00> : vector<8x256xf32>
    %396 = tpu.matmul %395, %7, %cst_81 {dimension_numbers = #tpu.dot_dimension_numbers<[1], [0], [0], [1], [0, 0, 1, 1], [], []>} : vector<8x64xbf16>, vector<64x256xbf16>, vector<8x256xf32> -> vector<8x256xf32>
    %c8_i32_82 = arith.constant 8 : i32
    %397 = arith.muli %c6_i32, %c8_i32_82 : i32
    %398 = arith.index_cast %397 : i32 to index
    %c0_83 = arith.constant 0 : index
    %399 = vector.load %arg11[%398, %c0_83] : memref<64x256xf32, #tpu.memory_space<vmem>>, vector<8x128xf32>
    %c8_i32_84 = arith.constant 8 : i32
    %400 = arith.muli %394, %c8_i32_84 : i32
    %401 = arith.index_cast %400 : i32 to index
    %c128_85 = arith.constant 128 : index
    %402 = vector.load %arg11[%401, %c128_85] : memref<64x256xf32, #tpu.memory_space<vmem>>, vector<8x128xf32>
    %403 = vector.extract_strided_slice %396 {offsets = [0, 0], sizes = [8, 128], strides = [1, 1]} : vector<8x256xf32> to vector<8x128xf32>
    %404 = arith.addf %399, %403 : vector<8x128xf32>
    %405 = vector.extract_strided_slice %404 {offsets = [0, 0], sizes = [8, 32], strides = [1, 1]} : vector<8x128xf32> to vector<8x32xf32>
    %406 = arith.negf %405 : vector<8x32xf32>
    %407 = math.exp %406 : vector<8x32xf32>
    %cst_86 = arith.constant 1.000000e+00 : f32
    %408 = vector.broadcast %cst_86 : f32 to vector<8x32xf32>
    %409 = arith.addf %408, %407 : vector<8x32xf32>
    %410 = arith.divf %408, %409 : vector<8x32xf32>
    %411 = vector.extract_strided_slice %404 {offsets = [0, 32], sizes = [8, 32], strides = [1, 1]} : vector<8x128xf32> to vector<8x32xf32>
    %412 = arith.negf %411 : vector<8x32xf32>
    %413 = math.exp %412 : vector<8x32xf32>
    %cst_87 = arith.constant 1.000000e+00 : f32
    %414 = vector.broadcast %cst_87 : f32 to vector<8x32xf32>
    %415 = arith.addf %414, %413 : vector<8x32xf32>
    %416 = arith.divf %414, %415 : vector<8x32xf32>
    %417 = vector.extract_strided_slice %404 {offsets = [0, 64], sizes = [8, 32], strides = [1, 1]} : vector<8x128xf32> to vector<8x32xf32>
    %418 = math.tanh %417 : vector<8x32xf32>
    %419 = vector.extract_strided_slice %404 {offsets = [0, 96], sizes = [8, 32], strides = [1, 1]} : vector<8x128xf32> to vector<8x32xf32>
    %420 = arith.negf %419 : vector<8x32xf32>
    %421 = math.exp %420 : vector<8x32xf32>
    %cst_88 = arith.constant 1.000000e+00 : f32
    %422 = vector.broadcast %cst_88 : f32 to vector<8x32xf32>
    %423 = arith.addf %422, %421 : vector<8x32xf32>
    %424 = arith.divf %422, %423 : vector<8x32xf32>
    %425 = arith.mulf %416, %363 : vector<8x32xf32>
    %426 = arith.mulf %410, %418 : vector<8x32xf32>
    %427 = arith.addf %425, %426 : vector<8x32xf32>
    %428 = math.tanh %427 : vector<8x32xf32>
    %429 = arith.mulf %424, %428 : vector<8x32xf32>
    %430 = vector.extract_strided_slice %396 {offsets = [0, 128], sizes = [8, 128], strides = [1, 1]} : vector<8x256xf32> to vector<8x128xf32>
    %431 = arith.addf %402, %430 : vector<8x128xf32>
    %432 = vector.extract_strided_slice %431 {offsets = [0, 0], sizes = [8, 32], strides = [1, 1]} : vector<8x128xf32> to vector<8x32xf32>
    %433 = arith.negf %432 : vector<8x32xf32>
    %434 = math.exp %433 : vector<8x32xf32>
    %cst_89 = arith.constant 1.000000e+00 : f32
    %435 = vector.broadcast %cst_89 : f32 to vector<8x32xf32>
    %436 = arith.addf %435, %434 : vector<8x32xf32>
    %437 = arith.divf %435, %436 : vector<8x32xf32>
    %438 = vector.extract_strided_slice %431 {offsets = [0, 32], sizes = [8, 32], strides = [1, 1]} : vector<8x128xf32> to vector<8x32xf32>
    %439 = arith.negf %438 : vector<8x32xf32>
    %440 = math.exp %439 : vector<8x32xf32>
    %cst_90 = arith.constant 1.000000e+00 : f32
    %441 = vector.broadcast %cst_90 : f32 to vector<8x32xf32>
    %442 = arith.addf %441, %440 : vector<8x32xf32>
    %443 = arith.divf %441, %442 : vector<8x32xf32>
    %444 = vector.extract_strided_slice %431 {offsets = [0, 64], sizes = [8, 32], strides = [1, 1]} : vector<8x128xf32> to vector<8x32xf32>
    %445 = math.tanh %444 : vector<8x32xf32>
    %446 = vector.extract_strided_slice %431 {offsets = [0, 96], sizes = [8, 32], strides = [1, 1]} : vector<8x128xf32> to vector<8x32xf32>
    %447 = arith.negf %446 : vector<8x32xf32>
    %448 = math.exp %447 : vector<8x32xf32>
    %cst_91 = arith.constant 1.000000e+00 : f32
    %449 = vector.broadcast %cst_91 : f32 to vector<8x32xf32>
    %450 = arith.addf %449, %448 : vector<8x32xf32>
    %451 = arith.divf %449, %450 : vector<8x32xf32>
    %452 = arith.mulf %443, %390 : vector<8x32xf32>
    %453 = arith.mulf %437, %445 : vector<8x32xf32>
    %454 = arith.addf %452, %453 : vector<8x32xf32>
    %455 = math.tanh %454 : vector<8x32xf32>
    %456 = arith.mulf %451, %455 : vector<8x32xf32>
    %457 = tpu.concatenate %429, %456 in 1 : vector<8x32xf32>, vector<8x32xf32> -> vector<8x64xf32>
    %c7_i32_92 = arith.constant 7 : i32
    %c7_i32_93 = arith.constant 7 : i32
    %458 = arith.subi %c7_i32_93, %c7_i32_92 : i32
    %459 = arith.truncf %457 : vector<8x64xf32> to vector<8x64xbf16>
    %cst_94 = arith.constant dense<0.000000e+00> : vector<8x256xf32>
    %460 = tpu.matmul %459, %7, %cst_94 {dimension_numbers = #tpu.dot_dimension_numbers<[1], [0], [0], [1], [0, 0, 1, 1], [], []>} : vector<8x64xbf16>, vector<64x256xbf16>, vector<8x256xf32> -> vector<8x256xf32>
    %c8_i32_95 = arith.constant 8 : i32
    %461 = arith.muli %c7_i32_92, %c8_i32_95 : i32
    %462 = arith.index_cast %461 : i32 to index
    %c0_96 = arith.constant 0 : index
    %463 = vector.load %arg11[%462, %c0_96] : memref<64x256xf32, #tpu.memory_space<vmem>>, vector<8x128xf32>
    %c8_i32_97 = arith.constant 8 : i32
    %464 = arith.muli %458, %c8_i32_97 : i32
    %465 = arith.index_cast %464 : i32 to index
    %c128_98 = arith.constant 128 : index
    %466 = vector.load %arg11[%465, %c128_98] : memref<64x256xf32, #tpu.memory_space<vmem>>, vector<8x128xf32>
    %467 = vector.extract_strided_slice %460 {offsets = [0, 0], sizes = [8, 128], strides = [1, 1]} : vector<8x256xf32> to vector<8x128xf32>
    %468 = arith.addf %463, %467 : vector<8x128xf32>
    %469 = vector.extract_strided_slice %468 {offsets = [0, 0], sizes = [8, 32], strides = [1, 1]} : vector<8x128xf32> to vector<8x32xf32>
    %470 = arith.negf %469 : vector<8x32xf32>
    %471 = math.exp %470 : vector<8x32xf32>
    %cst_99 = arith.constant 1.000000e+00 : f32
    %472 = vector.broadcast %cst_99 : f32 to vector<8x32xf32>
    %473 = arith.addf %472, %471 : vector<8x32xf32>
    %474 = arith.divf %472, %473 : vector<8x32xf32>
    %475 = vector.extract_strided_slice %468 {offsets = [0, 32], sizes = [8, 32], strides = [1, 1]} : vector<8x128xf32> to vector<8x32xf32>
    %476 = arith.negf %475 : vector<8x32xf32>
    %477 = math.exp %476 : vector<8x32xf32>
    %cst_100 = arith.constant 1.000000e+00 : f32
    %478 = vector.broadcast %cst_100 : f32 to vector<8x32xf32>
    %479 = arith.addf %478, %477 : vector<8x32xf32>
    %480 = arith.divf %478, %479 : vector<8x32xf32>
    %481 = vector.extract_strided_slice %468 {offsets = [0, 64], sizes = [8, 32], strides = [1, 1]} : vector<8x128xf32> to vector<8x32xf32>
    %482 = math.tanh %481 : vector<8x32xf32>
    %483 = vector.extract_strided_slice %468 {offsets = [0, 96], sizes = [8, 32], strides = [1, 1]} : vector<8x128xf32> to vector<8x32xf32>
    %484 = arith.negf %483 : vector<8x32xf32>
    %485 = math.exp %484 : vector<8x32xf32>
    %cst_101 = arith.constant 1.000000e+00 : f32
    %486 = vector.broadcast %cst_101 : f32 to vector<8x32xf32>
    %487 = arith.addf %486, %485 : vector<8x32xf32>
    %488 = arith.divf %486, %487 : vector<8x32xf32>
    %489 = arith.mulf %480, %427 : vector<8x32xf32>
    %490 = arith.mulf %474, %482 : vector<8x32xf32>
    %491 = arith.addf %489, %490 : vector<8x32xf32>
    %492 = math.tanh %491 : vector<8x32xf32>
    %493 = arith.mulf %488, %492 : vector<8x32xf32>
    %494 = vector.extract_strided_slice %460 {offsets = [0, 128], sizes = [8, 128], strides = [1, 1]} : vector<8x256xf32> to vector<8x128xf32>
    %495 = arith.addf %466, %494 : vector<8x128xf32>
    %496 = vector.extract_strided_slice %495 {offsets = [0, 0], sizes = [8, 32], strides = [1, 1]} : vector<8x128xf32> to vector<8x32xf32>
    %497 = arith.negf %496 : vector<8x32xf32>
    %498 = math.exp %497 : vector<8x32xf32>
    %cst_102 = arith.constant 1.000000e+00 : f32
    %499 = vector.broadcast %cst_102 : f32 to vector<8x32xf32>
    %500 = arith.addf %499, %498 : vector<8x32xf32>
    %501 = arith.divf %499, %500 : vector<8x32xf32>
    %502 = vector.extract_strided_slice %495 {offsets = [0, 32], sizes = [8, 32], strides = [1, 1]} : vector<8x128xf32> to vector<8x32xf32>
    %503 = arith.negf %502 : vector<8x32xf32>
    %504 = math.exp %503 : vector<8x32xf32>
    %cst_103 = arith.constant 1.000000e+00 : f32
    %505 = vector.broadcast %cst_103 : f32 to vector<8x32xf32>
    %506 = arith.addf %505, %504 : vector<8x32xf32>
    %507 = arith.divf %505, %506 : vector<8x32xf32>
    %508 = vector.extract_strided_slice %495 {offsets = [0, 64], sizes = [8, 32], strides = [1, 1]} : vector<8x128xf32> to vector<8x32xf32>
    %509 = math.tanh %508 : vector<8x32xf32>
    %510 = vector.extract_strided_slice %495 {offsets = [0, 96], sizes = [8, 32], strides = [1, 1]} : vector<8x128xf32> to vector<8x32xf32>
    %511 = arith.negf %510 : vector<8x32xf32>
    %512 = math.exp %511 : vector<8x32xf32>
    %cst_104 = arith.constant 1.000000e+00 : f32
    %513 = vector.broadcast %cst_104 : f32 to vector<8x32xf32>
    %514 = arith.addf %513, %512 : vector<8x32xf32>
    %515 = arith.divf %513, %514 : vector<8x32xf32>
    %516 = arith.mulf %507, %454 : vector<8x32xf32>
    %517 = arith.mulf %501, %509 : vector<8x32xf32>
    %518 = arith.addf %516, %517 : vector<8x32xf32>
    %519 = math.tanh %518 : vector<8x32xf32>
    %520 = arith.mulf %515, %519 : vector<8x32xf32>
    %521 = tpu.concatenate %493, %520 in 1 : vector<8x32xf32>, vector<8x32xf32> -> vector<8x64xf32>
    %c8_i32_105 = arith.constant 8 : i32
    %522 = arith.truncf %521 : vector<8x64xf32> to vector<8x64xbf16>
    %c0_106 = arith.constant 0 : index
    %c0_107 = arith.constant 0 : index
    %523 = vector.load %arg4[%c0_106, %c0_107] : memref<64x21xbf16, #tpu.memory_space<vmem>>, vector<64x21xbf16>
    %cst_108 = arith.constant dense<0.000000e+00> : vector<8x21xf32>
    %524 = tpu.matmul %522, %523, %cst_108 {dimension_numbers = #tpu.dot_dimension_numbers<[1], [0], [0], [1], [0, 0, 1, 1], [], []>} : vector<8x64xbf16>, vector<64x21xbf16>, vector<8x21xf32> -> vector<8x21xf32>
    %c0_109 = arith.constant 0 : index
    %c0_110 = arith.constant 0 : index
    %525 = vector.load %arg5[%c0_109, %c0_110] : memref<1x21xf32, #tpu.memory_space<vmem>>, vector<1x21xf32>
    %526 = vector.broadcast %525 : vector<1x21xf32> to vector<8x21xf32>
    %527 = arith.addf %524, %526 : vector<8x21xf32>
    %c0_111 = arith.constant 0 : index
    %c0_112 = arith.constant 0 : index
    %528 = vector.load %arg6[%c0_111, %c0_112] : memref<1x21xf32, #tpu.memory_space<vmem>>, vector<1x21xf32>
    %c0_113 = arith.constant 0 : index
    %c0_114 = arith.constant 0 : index
    %529 = vector.load %arg7[%c0_113, %c0_114] : memref<1x21xf32, #tpu.memory_space<vmem>>, vector<1x21xf32>
    %cst_115 = arith.constant dense<0.000000e+00> : vector<8xf32>
    %530 = vector.multi_reduction <add>, %527, %cst_115 [1] : vector<8x21xf32> to vector<8xf32>
    %531 = vector.shape_cast %530 : vector<8xf32> to vector<8x1xf32>
    %cst_116 = arith.constant 2.100000e+01 : f32
    %532 = vector.broadcast %cst_116 : f32 to vector<8x1xf32>
    %533 = arith.divf %531, %532 : vector<8x1xf32>
    %534 = vector.broadcast %533 : vector<8x1xf32> to vector<8x21xf32>
    %535 = arith.subf %527, %534 : vector<8x21xf32>
    %536 = arith.mulf %535, %535 : vector<8x21xf32>
    %cst_117 = arith.constant dense<0.000000e+00> : vector<8xf32>
    %537 = vector.multi_reduction <add>, %536, %cst_117 [1] : vector<8x21xf32> to vector<8xf32>
    %538 = vector.shape_cast %537 : vector<8xf32> to vector<8x1xf32>
    %cst_118 = arith.constant 2.100000e+01 : f32
    %539 = vector.broadcast %cst_118 : f32 to vector<8x1xf32>
    %540 = arith.divf %538, %539 : vector<8x1xf32>
    %cst_119 = arith.constant 9.99999974E-6 : f32
    %541 = vector.broadcast %cst_119 : f32 to vector<8x1xf32>
    %542 = arith.addf %540, %541 : vector<8x1xf32>
    %543 = math.rsqrt %542 : vector<8x1xf32>
    %544 = vector.broadcast %543 : vector<8x1xf32> to vector<8x21xf32>
    %545 = arith.mulf %535, %544 : vector<8x21xf32>
    %546 = vector.broadcast %528 : vector<1x21xf32> to vector<8x21xf32>
    %547 = arith.mulf %545, %546 : vector<8x21xf32>
    %548 = vector.broadcast %529 : vector<1x21xf32> to vector<8x21xf32>
    %549 = arith.addf %547, %548 : vector<8x21xf32>
    %cst_120 = arith.constant 0.000000e+00 : f32
    %550 = vector.broadcast %cst_120 : f32 to vector<8x21xf32>
    %551 = arith.cmpf oge, %549, %550 : vector<8x21xf32>
    %cst_121 = arith.constant 0.00999999977 : f32
    %552 = vector.broadcast %cst_121 : f32 to vector<8x21xf32>
    %553 = arith.mulf %552, %549 : vector<8x21xf32>
    %554 = arith.select %551, %549, %553 : vector<8x21xi1>, vector<8x21xf32>
    %c0_122 = arith.constant 0 : index
    %c0_123 = arith.constant 0 : index
    %555 = vector.load %arg8[%c0_122, %c0_123] : memref<21x4xf32, #tpu.memory_space<vmem>>, vector<21x4xf32>
    %cst_124 = arith.constant dense<0.000000e+00> : vector<8x4xf32>
    %556 = tpu.matmul %554, %555, %cst_124 {dimension_numbers = #tpu.dot_dimension_numbers<[1], [0], [0], [1], [0, 0, 1, 1], [], []>} : vector<8x21xf32>, vector<21x4xf32>, vector<8x4xf32> -> vector<8x4xf32>
    %c0_125 = arith.constant 0 : index
    %c0_126 = arith.constant 0 : index
    %557 = vector.load %arg9[%c0_125, %c0_126] : memref<1x4xf32, #tpu.memory_space<vmem>>, vector<1x4xf32>
    %558 = vector.broadcast %557 : vector<1x4xf32> to vector<8x4xf32>
    %559 = arith.addf %556, %558 : vector<8x4xf32>
    %c0_127 = arith.constant 0 : index
    %c0_128 = arith.constant 0 : index
    %560 = vector.load %arg10[%c0_127, %c0_128] : memref<8x4xf32, #tpu.memory_space<vmem>>, vector<8x4xf32>
    tpu.vector_store %arg10[%c0_127, %c0_128], %559 {strides = array<i32>} : memref<8x4xf32, #tpu.memory_space<vmem>>, vector<8x4xf32>,
    return
  }
}

</mosaic_0001>

<bundles_post_ra>
// kernel: birnn_relu_forward.3
= control target key start
LH: loop header
LB: loop body
LE: loop exit
PB: predicated region body
PF: predicated region fallthrough
CT: control target
= control target key end

     0   :  { %v1591_v1 = vmov 0   ;;  %vm124_vm0 = vcmask 523264   ;;  %v54_v21 = vlaneseq  ;;  %vm378_vm1 = vcmask 261120   ;;  %s1973_s1 = inlined_call_operand.vmem [shape: bf16[64,256], index: 1, kind: input, shape index: {}]   ;;  %s1974_s3 = inlined_call_operand.vmem [shape: bf16[64,256], index: 3, kind: input, shape index: {}]   ;;  %s1975_s0 = inlined_call_operand.vmem [shape: bf16[64,64], index: 0, kind: input, shape index: {}]   ;;  %s1976_s2 = inlined_call_operand.vmem [shape: f32[1,256], index: 2, kind: input, shape index: {}]   ;;  %s1977_s4 = inlined_call_operand.vmem [shape: bf16[64,21], index: 4, kind: input, shape index: {}]   ;;  %s1978_s5 = inlined_call_operand.vmem [shape: f32[1,21], index: 5, kind: input, shape index: {}]   ;;  %s1979_s8 = inlined_call_operand.vmem [shape: f32[21,4], index: 8, kind: input, shape index: {}]   ;;  %s1980_s6 = inlined_call_operand.vmem [shape: f32[1,21], index: 6, kind: input, shape index: {}]   ;;  %s1981_s7 = inlined_call_operand.vmem [shape: f32[1,21], index: 7, kind: input, shape index: {}]   ;;  %s1982_s9 = inlined_call_operand.vmem [shape: f32[1,4], index: 9, kind: input, shape index: {}]   ;;  %s1983_s10 = inlined_call_operand.vmem [shape: f32[8,4], index: 10, kind: output, shape index: {}]  }
   0x1   :  { %v1429_v0 = vld [vmem:[%s1973_s1 + $0x4] ss:$8 sps:$4 sm:$0xff]   ;;  %169 = vmatprep.mubr.bf16.mxu0 %v1591_v1  ;;  %309 = vmatprep.mubr.bf16.mxu1 %v1591_v1  ;;  %v1431_v2 = vld [vmem:[%s1973_s1] ss:$8 sps:$4 sm:$0xff]   ;;  %v1435_v5 = vld [vmem:[%s1973_s1 + $0x14] ss:$8 sps:$4 sm:$0xff]  }
   0x2   :  { %137 = vmatprep.subr.bf16.mxu0 %v1429_v0  ;;  %v1663_v3 = vld [vmem:[%s1974_s3 + $0x4] ss:$8 sps:$4 sm:$0xff]   ;;  %v1668_v4 = vld [vmem:[%s1974_s3] ss:$8 sps:$4 sm:$0xff]   ;;  %v1437_v6 = vld [vmem:[%s1973_s1 + $0x10] ss:$8 sps:$4 sm:$0xff]  }
   0x3   :  { %138 = vmatpush1.bf16.msra.mxu0 %v1431_v2  ;;  %277 = vmatprep.subr.bf16.mxu1 %v1663_v3  ;;  %v1680_v7 = vld [vmem:[%s1974_s3 + $0x14] ss:$8 sps:$4 sm:$0xff]   ;;  %v1686_v8 = vld [vmem:[%s1974_s3 + $0x10] ss:$8 sps:$4 sm:$0xff]   ;;  %v1441_v9 = vld [vmem:[%s1973_s1 + $0x24] ss:$8 sps:$4 sm:$0xff]  }
   0x4   :  { %278 = vmatpush1.bf16.msra.mxu1 %v1668_v4  ;;  %139 = vmatprep.subr.bf16.mxu0 %v1435_v5  ;;  %v1443_v10 = vld [vmem:[%s1973_s1 + $0x20] ss:$8 sps:$4 sm:$0xff]   ;;  %v1698_v11 = vld [vmem:[%s1974_s3 + $0x24] ss:$8 sps:$4 sm:$0xff]   ;;  %v1447_v12 = vld [vmem:[%s1973_s1 + $0x34] ss:$8 sps:$4 sm:$0xff]  }
   0x5   :  { %279 = vmatprep.subr.bf16.mxu1 %v1680_v7  ;;  %v1707_v13 = vld [vmem:[%s1974_s3 + $0x20] ss:$8 sps:$4 sm:$0xff]   ;;  %v1713_v14 = vld [vmem:[%s1974_s3 + $0x34] ss:$8 sps:$4 sm:$0xff]   ;;  %v1449_v15 = vld [vmem:[%s1973_s1 + $0x30] ss:$8 sps:$4 sm:$0xff]  }
   0x6   :  { %v1722_v16 = vld [vmem:[%s1974_s3 + $0x30] ss:$8 sps:$4 sm:$0xff]   ;;  %v1453_v17 = vld [vmem:[%s1975_s0] sm:$0xff]   ;;  %v1454_v18 = vld [vmem:[%s1975_s0 + $0x8] sm:$0xff]   ;;  %v55_v22 = vshrl.u32 %v54_v21, 7  ;;  %vm1595_vm2 = vmmov 0  }
   0x7   :  { %140 = vmatpush1.bf16.msra.mxu0 %v1437_v6  ;;  %v1455_v19 = vld [vmem:[%s1975_s0 + $0x10] sm:$0xff]   ;;  %v1456_v20 = vld [vmem:[%s1975_s0 + $0x18] sm:$0xff]   ;;  %v52_v24 = vld [vmem:[%s1976_s2] sm:$0x3]  ;;  %s1592_s0 = smov 64   ;;  %s1593_s2 = smov 32  }
   0x8   :  { %141 = vmatprep.subr.bf16.mxu0 %v1441_v9  ;;  %280 = vmatpush1.bf16.msra.mxu1 %v1686_v8  ;;  %v56_v23 = vsub.s32 0, %v55_v22  ;;  %v60_v25 = vsub.s32 1, %v55_v22  ;;  %vm1207_vm3 = vcmask 171008   ;;  %vm1252_vm4 = vcmask 1044480  }
   0x9   :  { %281 = vmatprep.subr.bf16.mxu1 %v1698_v11  ;;  %vm1326_vm6 = vcmask 31744  }
   0xa   :  { %v57_v26 = vrot.slane %v52_v24, %v56_v23  ;;  %v61_v27 = vrot.slane %v52_v24, %v60_v25 }
   0xb   :  { %142 = vmatpush1.bf16.msra.mxu0 %v1443_v10 }
   0xc   :  { %143 = vmatprep.subr.bf16.mxu0 %v1447_v12  ;;  %282 = vmatpush1.bf16.msra.mxu1 %v1707_v13 }
   0xd   :  { %283 = vmatprep.subr.bf16.mxu1 %v1713_v14 }
   0xf   :  { %144 = vmatpush1.bf16.msra.mxu0 %v1449_v15 }
  0x10   :  { %490 = vmatprep.subr.bf16.mxu0 %v1663_v3  ;;  %284 = vmatpush1.bf16.msra.mxu1 %v1722_v16 }
  0x11   :  { %384 = vmatprep.subr.bf16.mxu1 %v1663_v3 }
  0x12   :  { %1344 = vmatmul.mubr.msk.bf16.vlgmr.msra.gmra.mrb[0].mxu0 %vm124_vm0, %v1453_v17 }
  0x13   :  { %179 = vmatprep.mubr.bf16.mxu0 %v1591_v1  ;;  %491 = vmatpush1.bf16.msra.mxu0 %v1668_v4 }
  0x14   :  { %310 = vmatmul.mubr.bf16.vlgmr.msra.gmra.mrb[0].mxu1 %v1591_v1  ;;  %492 = vmatprep.subr.bf16.mxu0 %v1680_v7 }
  0x15   :  { %385 = vmatpush1.bf16.msra.mxu1 %v1668_v4  ;;  %416 = vmatprep.mubr.bf16.mxu1 %v1591_v1 }
  0x16   :  { %386 = vmatprep.subr.bf16.mxu1 %v1680_v7 }
  0x17   :  { %493 = vmatpush1.bf16.msra.mxu0 %v1686_v8 }
  0x18   :  { %494 = vmatprep.subr.bf16.mxu0 %v1698_v11 }
  0x19   :  { %387 = vmatpush1.bf16.msra.mxu1 %v1686_v8 }
  0x1a   :  { %1345 = vmatmul.mubr.msk.bf16.gmra.mrb[4].mxu0 %vm124_vm0, %v1454_v18  ;;  %388 = vmatprep.subr.bf16.mxu1 %v1698_v11 }
  0x1b   :  { %189 = vmatprep.mubr.bf16.mxu0 %v1591_v1  ;;  %495 = vmatpush1.bf16.msra.mxu0 %v1707_v13 }
  0x1c   :  { %496 = vmatprep.subr.bf16.mxu0 %v1713_v14 }
  0x1d   :  { %389 = vmatpush1.bf16.msra.mxu1 %v1707_v13 }
  0x1e   :  { %390 = vmatprep.subr.bf16.mxu1 %v1713_v14 }
  0x1f   :  { %497 = vmatpush1.bf16.msra.mxu0 %v1722_v16 }
  0x20   :  { %702 = vmatprep.subr.bf16.mxu0 %v1663_v3 }
  0x21   :  { %391 = vmatpush1.bf16.msra.mxu1 %v1722_v16 }
  0x22   :  { %1346 = vmatmul.mubr.msk.bf16.gmra.mrb[8].mxu0 %vm124_vm0, %v1455_v19  ;;  %596 = vmatprep.subr.bf16.mxu1 %v1663_v3 }
  0x23   :  { %199 = vmatprep.mubr.bf16.mxu0 %v1591_v1 }
  0x2a   :  { %1347 = vmatmul.mubr.msk.bf16.gmra.mrb[12].mxu0 %vm124_vm0, %v1456_v20 }
  0x2b   :  { %522 = vmatprep.mubr.bf16.mxu0 %v1591_v1 }
  0xe5   :  { %v171_v28 = vpop.f32.mrb[0].mxu0 }
  0xe6   :  { %v172_v29 = vadd.f32 %v171_v28, %v57_v26  ;;  %v173_v30 = vpop.f32.mrb[1].mxu0 }
  0xe7   :  { %v1769_v31 = vadd.f32 %v173_v30, %v61_v27  ;;  %v175_v32 = vpop.f32.mrb[2].mxu0  ;;  %v311_v33 = vpop.f32.mrb[0].mxu1 }
  0xe8   :  { %v1771_v34 = vadd.f32 %v175_v32, %v57_v26  ;;  %v320_v35 = vadd.f32 %v311_v33, %v172_v29  ;;  %v177_v36 = vpop.f32.mrb[3].mxu0  ;;  %v313_v37 = vpop.f32.mrb[1].mxu1 }
  0xe9   :  { %v1773_v38 = vadd.f32 %v177_v36, %v61_v27  ;;  %v315_v39 = vpop.f32.mrb[2].mxu1 }
  0xea   :  { %1461 = vtanh.f32 %v320_v35  ;;  %v316_v40 = vpop.f32.mrb[3].mxu1  ;;  %v1356_v9 = vmul.f32 -1.442695, %v320_v35 }
  0xed   :  { %v181_v41 = vpop.f32.mrb[4].mxu0 }
  0xee   :  { %v1775_v42 = vadd.f32 %v181_v41, %v57_v26  ;;  %v183_v43 = vpop.f32.mrb[5].mxu0 }
  0xef   :  { %v1777_v44 = vadd.f32 %v183_v43, %v61_v27  ;;  %v185_v45 = vpop.f32.mrb[6].mxu0 }
  0xf0   :  { %v1779_v46 = vadd.f32 %v185_v45, %v57_v26  ;;  %v187_v47 = vpop.f32.mrb[7].mxu0 }
  0xf1   :  { %v1781_v48 = vadd.f32 %v187_v47, %v61_v27 }
  0xf4   :  { %v1462_v49 = vpop.eup %1461 }
  0xf5   :  { %v191_v50 = vpop.f32.mrb[8].mxu0  ;;  %330 = vrot.lane.b32.xlu0 %v1462_v49, %s1592_s0 }
  0xf6   :  { %v1784_v51 = vadd.f32 %v191_v50, %v57_v26  ;;  %v193_v52 = vpop.f32.mrb[9].mxu0 }
  0xf7   :  { %v1786_v53 = vadd.f32 %v193_v52, %v61_v27  ;;  %v195_v54 = vpop.f32.mrb[10].mxu0 }
  0xf8   :  { %v1788_v55 = vadd.f32 %v195_v54, %v57_v26  ;;  %v197_v56 = vpop.f32.mrb[11].mxu0 }
  0xf9   :  { %v1790_v57 = vadd.f32 %v197_v56, %v61_v27 }
  0xfd   :  { %v201_v58 = vpop.f32.mrb[12].mxu0 }
  0xfe   :  { %v1792_v59 = vadd.f32 %v201_v58, %v57_v26  ;;  %v203_v60 = vpop.f32.mrb[13].mxu0 }
  0xff   :  { %v1794_v61 = vadd.f32 %v203_v60, %v61_v27  ;;  %v205_v62 = vpop.f32.mrb[14].mxu0 }
 0x100   :  { %v1796_v63 = vadd.f32 %v205_v62, %v57_v26  ;;  %v207_v0 = vpop.f32.mrb[15].mxu0 }
 0x101   :  { %v208_v2 = vadd.f32 %v207_v0, %v61_v27 }
 0x103   :  { %v345_v5 = vadd.f32 %v313_v37, %v208_v2 }
 0x105   :  { %1463 = vtanh.f32 %v345_v5  ;;  %v1357_v15 = vmul.f32 -1.442695, %v345_v5 }
 0x106   :  { %1465 = vpow2.f32 %v1356_v9 }
 0x10f   :  { %v1464_v6 = vpop.eup %1463 }
 0x110   :  { %355 = vrot.lane.b32.xlu0 %v1464_v6, %s1592_s0  ;;  %v1466_v10 = vpop.eup %1465 }
 0x111   :  { %v324_v12 = vadd.f32 1.0, %v1466_v10 }
 0x113   :  { %1467 = vrcp.f32 %v324_v12 }
 0x114   :  { %1469 = vpow2.f32 %v1357_v15 }
 0x11d   :  { %v1468_v17 = vpop.eup %1467 }
 0x11e   :  { %v1470_v20 = vpop.eup %1469  ;;  %v328_v25 = vmul.f32 0.0, %v1468_v17 }
 0x11f   :  { %v349_v21 = vadd.f32 1.0, %v1470_v20 }
 0x121   :  { %1471 = vrcp.f32 %v349_v21 }
 0x12b   :  { %v1472_v22 = vpop.eup %1471 }
 0x12c   :  { %v353_v29 = vmul.f32 0.0, %v1472_v22 }
 0x167   :  { %v331_v18 = vpop.permute.xlu0 %330 }
 0x168   :  { %v333_v19 = vmul.f32 %v1468_v17, %v331_v18 }
 0x16a   :  { %335 = vrot.lane.b32.xlu1 %v333_v19, %s1593_s2 }
 0x182   :  { %v356_v23 = vpop.permute.xlu0 %355 }
 0x183   :  { %v358_v24 = vmul.f32 %v1472_v22, %v356_v23 }
 0x185   :  { %360 = vrot.lane.b32.xlu1 %v358_v24, %s1593_s2 }
 0x1dc   :  { %v336_v26 = vpop.permute.xlu1 %335 }
 0x1dd   :  { %v338_v27 = vadd.f32 %v336_v26, %v328_v25 }
 0x1df   :  { %1473 = vtanh.f32 %v338_v27 }
 0x1e9   :  { %v1474_v28 = vpop.eup %1473 }
 0x1ea   :  { %341 = vrot.lane.b32.xlu0 %v1474_v28, %s1592_s0 }
 0x1f7   :  { %v361_v30 = vpop.permute.xlu1 %360 }
 0x1f8   :  { %v363_v32 = vadd.f32 %v361_v30, %v353_v29 }
 0x1fa   :  { %1475 = vtanh.f32 %v363_v32 }
 0x204   :  { %v1476_v33 = vpop.eup %1475 }
 0x205   :  { %366 = vrot.lane.b32.xlu1 %v1476_v33, %s1592_s0 }
 0x25c   :  { %v342_v35 = vpop.permute.xlu0 %341 }
 0x25d   :  { %v344_v36 = vmul.f32 %v1468_v17, %v342_v35 }
 0x25f   :  { %371 = vrot.lane.b32.xlu0 %v344_v36, %s1593_s2 }
 0x277   :  { %v367_v37 = vpop.permute.xlu1 %366 }
 0x278   :  { %v369_v39 = vmul.f32 %v1472_v22, %v367_v37 }
 0x27a   :  { %375 = vrot.lane.b32.xlu1 %v369_v39, %s1592_s0 }
 0x2d1   :  { %v372_v40 = vpop.permute.xlu0 %371 }
 0x2ec   :  { %v376_v41 = vpop.permute.xlu1 %375 }
 0x2ed   :  { %v379_v43 = vsel %vm378_vm1, %v372_v40, %v376_v41 }
 0x2ee   :  { %v380_v45 = vpack.c.bf16 %v379_v43, %v379_v43 }
 0x2f0   :  { %1358 = vmatmul.mubr.msk.bf16.vlgmr.msra.gmra.mrb[4].mxu1 %vm124_vm0, %v380_v45 }
 0x2f1   :  { %597 = vmatpush1.bf16.msra.mxu1 %v1668_v4  ;;  %628 = vmatprep.mubr.bf16.mxu1 %v1591_v1 }
 0x2f2   :  { %598 = vmatprep.subr.bf16.mxu1 %v1680_v7 }
 0x2f5   :  { %599 = vmatpush1.bf16.msra.mxu1 %v1686_v8 }
 0x2f6   :  { %600 = vmatprep.subr.bf16.mxu1 %v1698_v11 }
 0x2f9   :  { %601 = vmatpush1.bf16.msra.mxu1 %v1707_v13 }
 0x2fa   :  { %602 = vmatprep.subr.bf16.mxu1 %v1713_v14 }
 0x2fd   :  { %603 = vmatpush1.bf16.msra.mxu1 %v1722_v16 }
 0x2fe   :  { %808 = vmatprep.subr.bf16.mxu1 %v1663_v3 }
 0x3c3   :  { %v418_v47 = vpop.f32.mrb[4].mxu1 }
 0x3c4   :  { %v427_v49 = vadd.f32 %v418_v47, %v1771_v34  ;;  %v420_v50 = vpop.f32.mrb[5].mxu1 }
 0x3c5   :  { %v452_v52 = vadd.f32 %v420_v50, %v1794_v61  ;;  %v422_v54 = vpop.f32.mrb[6].mxu1 }
 0x3c6   :  { %1477 = vtanh.f32 %v427_v49  ;;  %v423_v56 = vpop.f32.mrb[7].mxu1  ;;  %v1359_v62 = vmul.f32 -1.442695, %v427_v49 }
 0x3c7   :  { %1479 = vtanh.f32 %v452_v52  ;;  %v1360_v0 = vmul.f32 -1.442695, %v452_v52 }
 0x3c8   :  { %1481 = vpow2.f32 %v1359_v62 }
 0x3c9   :  { %1483 = vpow2.f32 %v1360_v0 }
 0x3d0   :  { %v1478_v58 = vpop.eup %1477 }
 0x3d1   :  { %v1480_v60 = vpop.eup %1479  ;;  %437 = vrot.lane.b32.xlu0 %v1478_v58, %s1592_s0 }
 0x3d2   :  { %462 = vrot.lane.b32.xlu1 %v1480_v60, %s1592_s0  ;;  %v1482_v2 = vpop.eup %1481 }
 0x3d3   :  { %v1484_v5 = vpop.eup %1483  ;;  %v431_v34 = vadd.f32 1.0, %v1482_v2 }
 0x3d4   :  { %v456_v6 = vadd.f32 1.0, %v1484_v5 }
 0x3d5   :  { %1485 = vrcp.f32 %v431_v34 }
 0x3d6   :  { %1487 = vrcp.f32 %v456_v6 }
 0x3df   :  { %v1486_v61 = vpop.eup %1485 }
 0x3e0   :  { %v1488_v10 = vpop.eup %1487  ;;  %v435_v18 = vmul.f32 %v1486_v61, %v338_v27 }
 0x3e1   :  { %v460_v20 = vmul.f32 %v1488_v10, %v363_v32 }
 0x443   :  { %v438_v9 = vpop.permute.xlu0 %437 }
 0x444   :  { %v440_v12 = vmul.f32 %v1486_v61, %v438_v9  ;;  %v463_v15 = vpop.permute.xlu1 %462 }
 0x445   :  { %v465_v17 = vmul.f32 %v1488_v10, %v463_v15 }
 0x446   :  { %442 = vrot.lane.b32.xlu0 %v440_v12, %s1593_s2 }
 0x447   :  { %467 = vrot.lane.b32.xlu1 %v465_v17, %s1593_s2 }
 0x4b8   :  { %v443_v19 = vpop.permute.xlu0 %442 }
 0x4b9   :  { %v445_v21 = vadd.f32 %v443_v19, %v435_v18  ;;  %v468_v22 = vpop.permute.xlu1 %467 }
 0x4ba   :  { %v470_v23 = vadd.f32 %v468_v22, %v460_v20 }
 0x4bb   :  { %1489 = vtanh.f32 %v445_v21 }
 0x4bc   :  { %1491 = vtanh.f32 %v470_v23 }
 0x4c5   :  { %v1490_v24 = vpop.eup %1489 }
 0x4c6   :  { %v1492_v25 = vpop.eup %1491  ;;  %448 = vrot.lane.b32.xlu0 %v1490_v24, %s1592_s0 }
 0x4c7   :  { %473 = vrot.lane.b32.xlu1 %v1492_v25, %s1592_s0 }
 0x538   :  { %v449_v26 = vpop.permute.xlu0 %448 }
 0x539   :  { %v451_v28 = vmul.f32 %v1486_v61, %v449_v26  ;;  %v474_v29 = vpop.permute.xlu1 %473 }
 0x53a   :  { %v476_v30 = vmul.f32 %v1488_v10, %v474_v29 }
 0x53b   :  { %478 = vrot.lane.b32.xlu0 %v451_v28, %s1593_s2 }
 0x53c   :  { %482 = vrot.lane.b32.xlu1 %v476_v30, %s1592_s0 }
 0x5ad   :  { %v479_v27 = vpop.permute.xlu0 %478 }
 0x5ae   :  { %v483_v32 = vpop.permute.xlu1 %482 }
 0x5af   :  { %v485_v33 = vsel %vm378_vm1, %v479_v27, %v483_v32 }
 0x5b0   :  { %v486_v35 = vpack.c.bf16 %v485_v33, %v485_v33 }
 0x5b2   :  { %1361 = vmatmul.mubr.msk.bf16.vlgmr.msra.gmra.mrb[16].mxu0 %vm124_vm0, %v486_v35 }
 0x5b3   :  { %703 = vmatpush1.bf16.msra.mxu0 %v1668_v4  ;;  %734 = vmatprep.mubr.bf16.mxu0 %v1591_v1 }
 0x5b4   :  { %704 = vmatprep.subr.bf16.mxu0 %v1680_v7 }
 0x5b7   :  { %705 = vmatpush1.bf16.msra.mxu0 %v1686_v8 }
 0x5b8   :  { %706 = vmatprep.subr.bf16.mxu0 %v1698_v11 }
 0x5bb   :  { %707 = vmatpush1.bf16.msra.mxu0 %v1707_v13 }
 0x5bc   :  { %708 = vmatprep.subr.bf16.mxu0 %v1713_v14 }
 0x5bf   :  { %709 = vmatpush1.bf16.msra.mxu0 %v1722_v16 }
 0x5c0   :  { %914 = vmatprep.subr.bf16.mxu0 %v1663_v3 }
 0x685   :  { %v524_v36 = vpop.f32.mrb[16].mxu0 }
 0x686   :  { %v533_v37 = vadd.f32 %v524_v36, %v1775_v42  ;;  %v526_v39 = vpop.f32.mrb[17].mxu0 }
 0x687   :  { %v558_v40 = vadd.f32 %v526_v39, %v1790_v57  ;;  %v528_v41 = vpop.f32.mrb[18].mxu0 }
 0x688   :  { %1493 = vtanh.f32 %v533_v37  ;;  %v529_v43 = vpop.f32.mrb[19].mxu0  ;;  %v1362_v49 = vmul.f32 -1.442695, %v533_v37 }
 0x689   :  { %1495 = vtanh.f32 %v558_v40  ;;  %v1363_v50 = vmul.f32 -1.442695, %v558_v40 }
 0x68a   :  { %1497 = vpow2.f32 %v1362_v49 }
 0x68b   :  { %1499 = vpow2.f32 %v1363_v50 }
 0x692   :  { %v1494_v45 = vpop.eup %1493 }
 0x693   :  { %v1496_v47 = vpop.eup %1495  ;;  %543 = vrot.lane.b32.xlu0 %v1494_v45, %s1592_s0 }
 0x694   :  { %568 = vrot.lane.b32.xlu1 %v1496_v47, %s1592_s0  ;;  %v1498_v52 = vpop.eup %1497 }
 0x695   :  { %v1500_v54 = vpop.eup %1499  ;;  %v537_v42 = vadd.f32 1.0, %v1498_v52 }
 0x696   :  { %v562_v56 = vadd.f32 1.0, %v1500_v54 }
 0x697   :  { %1501 = vrcp.f32 %v537_v42 }
 0x698   :  { %1503 = vrcp.f32 %v562_v56 }
 0x6a1   :  { %v1502_v57 = vpop.eup %1501 }
 0x6a2   :  { %v1504_v60 = vpop.eup %1503  ;;  %v541_v5 = vmul.f32 %v1502_v57, %v445_v21 }
 0x6a3   :  { %v566_v6 = vmul.f32 %v1504_v60, %v470_v23 }
 0x705   :  { %v544_v58 = vpop.permute.xlu0 %543 }
 0x706   :  { %v546_v62 = vmul.f32 %v1502_v57, %v544_v58  ;;  %v569_v0 = vpop.permute.xlu1 %568 }
 0x707   :  { %v571_v2 = vmul.f32 %v1504_v60, %v569_v0 }
 0x708   :  { %548 = vrot.lane.b32.xlu0 %v546_v62, %s1593_s2 }
 0x709   :  { %573 = vrot.lane.b32.xlu1 %v571_v2, %s1593_s2 }
 0x77a   :  { %v549_v34 = vpop.permute.xlu0 %548 }
 0x77b   :  { %v551_v61 = vadd.f32 %v549_v34, %v541_v5  ;;  %v574_v9 = vpop.permute.xlu1 %573 }
 0x77c   :  { %v576_v10 = vadd.f32 %v574_v9, %v566_v6 }
 0x77d   :  { %1505 = vtanh.f32 %v551_v61 }
 0x77e   :  { %1507 = vtanh.f32 %v576_v10 }
 0x787   :  { %v1506_v12 = vpop.eup %1505 }
 0x788   :  { %v1508_v15 = vpop.eup %1507  ;;  %554 = vrot.lane.b32.xlu0 %v1506_v12, %s1592_s0 }
 0x789   :  { %579 = vrot.lane.b32.xlu1 %v1508_v15, %s1592_s0 }
 0x7fa   :  { %v555_v17 = vpop.permute.xlu0 %554 }
 0x7fb   :  { %v557_v18 = vmul.f32 %v1502_v57, %v555_v17  ;;  %v580_v19 = vpop.permute.xlu1 %579 }
 0x7fc   :  { %v582_v20 = vmul.f32 %v1504_v60, %v580_v19 }
 0x7fd   :  { %584 = vrot.lane.b32.xlu0 %v557_v18, %s1593_s2 }
 0x7fe   :  { %588 = vrot.lane.b32.xlu1 %v582_v20, %s1592_s0 }
 0x86f   :  { %v585_v21 = vpop.permute.xlu0 %584 }
 0x870   :  { %v589_v22 = vpop.permute.xlu1 %588 }
 0x871   :  { %v591_v23 = vsel %vm378_vm1, %v585_v21, %v589_v22 }
 0x872   :  { %v592_v24 = vpack.c.bf16 %v591_v23, %v591_v23 }
 0x874   :  { %1364 = vmatmul.mubr.msk.bf16.vlgmr.msra.gmra.mrb[8].mxu1 %vm124_vm0, %v592_v24 }
 0x875   :  { %809 = vmatpush1.bf16.msra.mxu1 %v1668_v4  ;;  %840 = vmatprep.mubr.bf16.mxu1 %v1591_v1 }
 0x876   :  { %810 = vmatprep.subr.bf16.mxu1 %v1680_v7 }
 0x879   :  { %811 = vmatpush1.bf16.msra.mxu1 %v1686_v8 }
 0x87a   :  { %812 = vmatprep.subr.bf16.mxu1 %v1698_v11 }
 0x87d   :  { %813 = vmatpush1.bf16.msra.mxu1 %v1707_v13 }
 0x87e   :  { %814 = vmatprep.subr.bf16.mxu1 %v1713_v14 }
 0x881   :  { %815 = vmatpush1.bf16.msra.mxu1 %v1722_v16 }
 0x882   :  { %1020 = vmatprep.subr.bf16.mxu1 %v1663_v3 }
 0x947   :  { %v630_v25 = vpop.f32.mrb[8].mxu1 }
 0x948   :  { %v639_v26 = vadd.f32 %v630_v25, %v1779_v46  ;;  %v632_v28 = vpop.f32.mrb[9].mxu1 }
 0x949   :  { %v664_v29 = vadd.f32 %v632_v28, %v1786_v53  ;;  %v634_v30 = vpop.f32.mrb[10].mxu1 }
 0x94a   :  { %1509 = vtanh.f32 %v639_v26  ;;  %v635_v27 = vpop.f32.mrb[11].mxu1  ;;  %v1365_v35 = vmul.f32 -1.442695, %v639_v26 }
 0x94b   :  { %1511 = vtanh.f32 %v664_v29  ;;  %v1366_v36 = vmul.f32 -1.442695, %v664_v29 }
 0x94c   :  { %1513 = vpow2.f32 %v1365_v35 }
 0x94d   :  { %1515 = vpow2.f32 %v1366_v36 }
 0x954   :  { %v1510_v32 = vpop.eup %1509 }
 0x955   :  { %v1512_v33 = vpop.eup %1511  ;;  %649 = vrot.lane.b32.xlu0 %v1510_v32, %s1592_s0 }
 0x956   :  { %674 = vrot.lane.b32.xlu1 %v1512_v33, %s1592_s0  ;;  %v1514_v3 = vpop.eup %1513 }
 0x957   :  { %v1516_v37 = vpop.eup %1515  ;;  %v643_v46 = vadd.f32 1.0, %v1514_v3 }
 0x958   :  { %v668_v39 = vadd.f32 1.0, %v1516_v37 }
 0x959   :  { %1517 = vrcp.f32 %v643_v46 }
 0x95a   :  { %1519 = vrcp.f32 %v668_v39 }
 0x963   :  { %v1518_v53 = vpop.eup %1517 }
 0x964   :  { %v1520_v41 = vpop.eup %1519  ;;  %v647_v49 = vmul.f32 %v1518_v53, %v551_v61 }
 0x965   :  { %v672_v52 = vmul.f32 %v1520_v41, %v576_v10 }
 0x9c7   :  { %v650_v40 = vpop.permute.xlu0 %649 }
 0x9c8   :  { %v652_v43 = vmul.f32 %v1518_v53, %v650_v40  ;;  %v675_v45 = vpop.permute.xlu1 %674 }
 0x9c9   :  { %v677_v47 = vmul.f32 %v1520_v41, %v675_v45 }
 0x9ca   :  { %654 = vrot.lane.b32.xlu0 %v652_v43, %s1593_s2 }
 0x9cb   :  { %679 = vrot.lane.b32.xlu1 %v677_v47, %s1593_s2 }
 0xa3c   :  { %v655_v50 = vpop.permute.xlu0 %654 }
 0xa3d   :  { %v657_v54 = vadd.f32 %v655_v50, %v647_v49  ;;  %v680_v42 = vpop.permute.xlu1 %679 }
 0xa3e   :  { %v682_v56 = vadd.f32 %v680_v42, %v672_v52 }
 0xa3f   :  { %1521 = vtanh.f32 %v657_v54 }
 0xa40   :  { %1523 = vtanh.f32 %v682_v56 }
 0xa49   :  { %v1522_v57 = vpop.eup %1521 }
 0xa4a   :  { %v1524_v58 = vpop.eup %1523  ;;  %660 = vrot.lane.b32.xlu0 %v1522_v57, %s1592_s0 }
 0xa4b   :  { %685 = vrot.lane.b32.xlu1 %v1524_v58, %s1592_s0 }
 0xabc   :  { %v661_v60 = vpop.permute.xlu0 %660 }
 0xabd   :  { %v663_v62 = vmul.f32 %v1518_v53, %v661_v60  ;;  %v686_v0 = vpop.permute.xlu1 %685 }
 0xabe   :  { %v688_v2 = vmul.f32 %v1520_v41, %v686_v0 }
 0xabf   :  { %690 = vrot.lane.b32.xlu0 %v663_v62, %s1593_s2 }
 0xac0   :  { %694 = vrot.lane.b32.xlu1 %v688_v2, %s1592_s0 }
 0xb31   :  { %v691_v5 = vpop.permute.xlu0 %690 }
 0xb32   :  { %v695_v34 = vpop.permute.xlu1 %694 }
 0xb33   :  { %v697_v6 = vsel %vm378_vm1, %v691_v5, %v695_v34 }
 0xb34   :  { %v698_v61 = vpack.c.bf16 %v697_v6, %v697_v6 }
 0xb36   :  { %1367 = vmatmul.mubr.msk.bf16.vlgmr.msra.gmra.mrb[20].mxu0 %vm124_vm0, %v698_v61 }
 0xb37   :  { %915 = vmatpush1.bf16.msra.mxu0 %v1668_v4  ;;  %946 = vmatprep.mubr.bf16.mxu0 %v1591_v1 }
 0xb38   :  { %916 = vmatprep.subr.bf16.mxu0 %v1680_v7 }
 0xb3b   :  { %917 = vmatpush1.bf16.msra.mxu0 %v1686_v8 }
 0xb3c   :  { %918 = vmatprep.subr.bf16.mxu0 %v1698_v11 }
 0xb3f   :  { %919 = vmatpush1.bf16.msra.mxu0 %v1707_v13 }
 0xb40   :  { %920 = vmatprep.subr.bf16.mxu0 %v1713_v14 }
 0xb43   :  { %921 = vmatpush1.bf16.msra.mxu0 %v1722_v16 }
 0xc09   :  { %v736_v9 = vpop.f32.mrb[20].mxu0 }
 0xc0a   :  { %v745_v10 = vadd.f32 %v736_v9, %v1784_v51  ;;  %v738_v12 = vpop.f32.mrb[21].mxu0 }
 0xc0b   :  { %v770_v15 = vadd.f32 %v738_v12, %v1781_v48  ;;  %v740_v17 = vpop.f32.mrb[22].mxu0 }
 0xc0c   :  { %1525 = vtanh.f32 %v745_v10  ;;  %v741_v18 = vpop.f32.mrb[23].mxu0  ;;  %v1368_v21 = vmul.f32 -1.442695, %v745_v10 }
 0xc0d   :  { %1527 = vtanh.f32 %v770_v15  ;;  %v1369_v22 = vmul.f32 -1.442695, %v770_v15 }
 0xc0e   :  { %1529 = vpow2.f32 %v1368_v21 }
 0xc0f   :  { %1531 = vpow2.f32 %v1369_v22 }
 0xc16   :  { %v1526_v19 = vpop.eup %1525 }
 0xc17   :  { %v1528_v20 = vpop.eup %1527  ;;  %755 = vrot.lane.b32.xlu0 %v1526_v19, %s1592_s0 }
 0xc18   :  { %780 = vrot.lane.b32.xlu1 %v1528_v20, %s1592_s0  ;;  %v1530_v23 = vpop.eup %1529 }
 0xc19   :  { %v1532_v24 = vpop.eup %1531  ;;  %v749_v51 = vadd.f32 1.0, %v1530_v23 }
 0xc1a   :  { %v774_v25 = vadd.f32 1.0, %v1532_v24 }
 0xc1b   :  { %1533 = vrcp.f32 %v749_v51 }
 0xc1c   :  { %1535 = vrcp.f32 %v774_v25 }
 0xc25   :  { %v1534_v48 = vpop.eup %1533 }
 0xc26   :  { %v1536_v28 = vpop.eup %1535  ;;  %v753_v32 = vmul.f32 %v1534_v48, %v657_v54 }
 0xc27   :  { %v778_v35 = vmul.f32 %v1536_v28, %v682_v56 }
 0xc89   :  { %v756_v26 = vpop.permute.xlu0 %755 }
 0xc8a   :  { %v758_v29 = vmul.f32 %v1534_v48, %v756_v26  ;;  %v781_v30 = vpop.permute.xlu1 %780 }
 0xc8b   :  { %v783_v27 = vmul.f32 %v1536_v28, %v781_v30 }
 0xc8c   :  { %760 = vrot.lane.b32.xlu0 %v758_v29, %s1593_s2 }
 0xc8d   :  { %785 = vrot.lane.b32.xlu1 %v783_v27, %s1593_s2 }
 0xcfe   :  { %v761_v33 = vpop.permute.xlu0 %760 }
 0xcff   :  { %v763_v36 = vadd.f32 %v761_v33, %v753_v32  ;;  %v786_v3 = vpop.permute.xlu1 %785 }
 0xd00   :  { %v788_v37 = vadd.f32 %v786_v3, %v778_v35 }
 0xd01   :  { %1537 = vtanh.f32 %v763_v36 }
 0xd02   :  { %1539 = vtanh.f32 %v788_v37 }
 0xd0b   :  { %v1538_v46 = vpop.eup %1537 }
 0xd0c   :  { %v1540_v39 = vpop.eup %1539  ;;  %766 = vrot.lane.b32.xlu0 %v1538_v46, %s1592_s0 }
 0xd0d   :  { %791 = vrot.lane.b32.xlu1 %v1540_v39, %s1592_s0 }
 0xd7e   :  { %v767_v53 = vpop.permute.xlu0 %766 }
 0xd7f   :  { %v769_v40 = vmul.f32 %v1534_v48, %v767_v53  ;;  %v792_v41 = vpop.permute.xlu1 %791 }
 0xd80   :  { %v794_v43 = vmul.f32 %v1536_v28, %v792_v41 }
 0xd81   :  { %796 = vrot.lane.b32.xlu0 %v769_v40, %s1593_s2 }
 0xd82   :  { %800 = vrot.lane.b32.xlu1 %v794_v43, %s1592_s0 }
 0xdf3   :  { %v797_v45 = vpop.permute.xlu0 %796 }
 0xdf4   :  { %v801_v47 = vpop.permute.xlu1 %800 }
 0xdf5   :  { %v803_v49 = vsel %vm378_vm1, %v797_v45, %v801_v47 }
 0xdf6   :  { %v804_v50 = vpack.c.bf16 %v803_v49, %v803_v49 }
 0xdf8   :  { %1370 = vmatmul.mubr.msk.bf16.vlgmr.msra.gmra.mrb[12].mxu1 %vm124_vm0, %v804_v50 }
 0xdf9   :  { %1021 = vmatpush1.bf16.msra.mxu1 %v1668_v4  ;;  %1052 = vmatprep.mubr.bf16.mxu1 %v1591_v1 }
 0xdfa   :  { %1022 = vmatprep.subr.bf16.mxu1 %v1680_v7 }
 0xdfd   :  { %1023 = vmatpush1.bf16.msra.mxu1 %v1686_v8 }
 0xdfe   :  { %1024 = vmatprep.subr.bf16.mxu1 %v1698_v11 }
 0xe01   :  { %1025 = vmatpush1.bf16.msra.mxu1 %v1707_v13 }
 0xe02   :  { %1026 = vmatprep.subr.bf16.mxu1 %v1713_v14 }
 0xe05   :  { %1027 = vmatpush1.bf16.msra.mxu1 %v1722_v16 }
 0xecb   :  { %v842_v52 = vpop.f32.mrb[12].mxu1 }
 0xecc   :  { %v851_v54 = vadd.f32 %v842_v52, %v1788_v55  ;;  %v844_v42 = vpop.f32.mrb[13].mxu1 }
 0xecd   :  { %v876_v4 = vadd.f32 %v844_v42, %v1777_v44  ;;  %v846_v56 = vpop.f32.mrb[14].mxu1 }
 0xece   :  { %1541 = vtanh.f32 %v851_v54  ;;  %v847_v1 = vpop.f32.mrb[15].mxu1  ;;  %v1371_v11 = vmul.f32 -1.442695, %v851_v54 }
 0xecf   :  { %1543 = vtanh.f32 %v876_v4  ;;  %v1372_v13 = vmul.f32 -1.442695, %v876_v4 }
 0xed0   :  { %1545 = vpow2.f32 %v1371_v11 }
 0xed1   :  { %1547 = vpow2.f32 %v1372_v13 }
 0xed8   :  { %v1542_v7 = vpop.eup %1541 }
 0xed9   :  { %v1544_v8 = vpop.eup %1543  ;;  %861 = vrot.lane.b32.xlu0 %v1542_v7, %s1592_s0 }
 0xeda   :  { %886 = vrot.lane.b32.xlu1 %v1544_v8, %s1592_s0  ;;  %v1546_v14 = vpop.eup %1545 }
 0xedb   :  { %v1548_v16 = vpop.eup %1547  ;;  %v855_v55 = vadd.f32 1.0, %v1546_v14 }
 0xedc   :  { %v880_v57 = vadd.f32 1.0, %v1548_v16 }
 0xedd   :  { %1549 = vrcp.f32 %v855_v55 }
 0xede   :  { %1551 = vrcp.f32 %v880_v57 }
 0xee7   :  { %v1550_v44 = vpop.eup %1549 }
 0xee8   :  { %v1552_v60 = vpop.eup %1551  ;;  %v859_v5 = vmul.f32 %v1550_v44, %v763_v36 }
 0xee9   :  { %v884_v6 = vmul.f32 %v1552_v60, %v788_v37 }
 0xf4b   :  { %v862_v58 = vpop.permute.xlu0 %861 }
 0xf4c   :  { %v864_v62 = vmul.f32 %v1550_v44, %v862_v58  ;;  %v887_v0 = vpop.permute.xlu1 %886 }
 0xf4d   :  { %v889_v2 = vmul.f32 %v1552_v60, %v887_v0 }
 0xf4e   :  { %866 = vrot.lane.b32.xlu0 %v864_v62, %s1593_s2 }
 0xf4f   :  { %891 = vrot.lane.b32.xlu1 %v889_v2, %s1593_s2 }
 0xfc0   :  { %v867_v34 = vpop.permute.xlu0 %866 }
 0xfc1   :  { %v869_v61 = vadd.f32 %v867_v34, %v859_v5  ;;  %v892_v9 = vpop.permute.xlu1 %891 }
 0xfc2   :  { %v894_v10 = vadd.f32 %v892_v9, %v884_v6 }
 0xfc3   :  { %1553 = vtanh.f32 %v869_v61 }
 0xfc4   :  { %1555 = vtanh.f32 %v894_v10 }
 0xfcd   :  { %v1554_v12 = vpop.eup %1553 }
 0xfce   :  { %v1556_v15 = vpop.eup %1555  ;;  %872 = vrot.lane.b32.xlu0 %v1554_v12, %s1592_s0 }
 0xfcf   :  { %897 = vrot.lane.b32.xlu1 %v1556_v15, %s1592_s0 }
0x1040   :  { %v873_v17 = vpop.permute.xlu0 %872 }
0x1041   :  { %v875_v18 = vmul.f32 %v1550_v44, %v873_v17  ;;  %v898_v19 = vpop.permute.xlu1 %897 }
0x1042   :  { %v900_v20 = vmul.f32 %v1552_v60, %v898_v19 }
0x1043   :  { %902 = vrot.lane.b32.xlu0 %v875_v18, %s1593_s2 }
0x1044   :  { %906 = vrot.lane.b32.xlu1 %v900_v20, %s1592_s0 }
0x10b5   :  { %v903_v21 = vpop.permute.xlu0 %902 }
0x10b6   :  { %v907_v22 = vpop.permute.xlu1 %906 }
0x10b7   :  { %v909_v23 = vsel %vm378_vm1, %v903_v21, %v907_v22 }
0x10b8   :  { %v910_v24 = vpack.c.bf16 %v909_v23, %v909_v23  ;;  %v1594_v23 = vmov 0.0  }
0x10b9   :  { %1399 = vmatprep.subr.bf16.mxu0 %v1594_v23 }
0x10ba   :  { %1373 = vmatmul.mubr.msk.bf16.vlgmr.msra.gmra.mrb[24].mxu0 %vm124_vm0, %v910_v24  ;;  %v1457_v24 = vld [vmem:[%s1977_s4] sm:$0xff]  }
0x10bb   :  { %1400 = vmatpush3.bf16.msra.mxu0 %v1457_v24  ;;  %1407 = vmatprep.mubr.msk.bf16.mxu0 %vm1595_vm2, %v1594_v23 }
0x10bc   :  { %1401 = vmatprep.subr.bf16.mxu0 %v1594_v23 }
0x118d   :  { %v948_v51 = vpop.f32.mrb[24].mxu0 }
0x118e   :  { %v957_v25 = vadd.f32 %v948_v51, %v1792_v59  ;;  %v950_v48 = vpop.f32.mrb[25].mxu0  ;;  %v1458_v51 = vld [vmem:[%s1977_s4 + $0x8] sm:$0xff]  }
0x118f   :  { %v982_v26 = vadd.f32 %v950_v48, %v1773_v38  ;;  %v952_v28 = vpop.f32.mrb[26].mxu0  ;;  %1402 = vmatpush3.bf16.msra.mxu0 %v1458_v51 }
0x1190   :  { %1557 = vtanh.f32 %v957_v25  ;;  %v953_v29 = vpop.f32.mrb[27].mxu0  ;;  %v1374_v32 = vmul.f32 -1.442695, %v957_v25  ;;  %v1459_v25 = vld [vmem:[%s1977_s4 + $0x10] sm:$0xff]   ;;  %1403 = vmatprep.subr.bf16.mxu0 %v1594_v23  ;;  %v1460_v28 = vld [vmem:[%s1977_s4 + $0x18] sm:$0xff]  }
0x1191   :  { %1559 = vtanh.f32 %v982_v26  ;;  %v1375_v33 = vmul.f32 -1.442695, %v982_v26 }
0x1192   :  { %1561 = vpow2.f32 %v1374_v32 }
0x1193   :  { %1563 = vpow2.f32 %v1375_v33  ;;  %1404 = vmatpush3.bf16.msra.mxu0 %v1459_v25 }
0x1194   :  { %1405 = vmatprep.subr.bf16.mxu0 %v1594_v23 }
0x1197   :  { %1406 = vmatpush3.bf16.msra.mxu0 %v1460_v28 }
0x119a   :  { %v1558_v30 = vpop.eup %1557 }
0x119b   :  { %v1560_v27 = vpop.eup %1559  ;;  %967 = vrot.lane.b32.xlu0 %v1558_v30, %s1592_s0 }
0x119c   :  { %992 = vrot.lane.b32.xlu1 %v1560_v27, %s1592_s0  ;;  %v1562_v35 = vpop.eup %1561 }
0x119d   :  { %v1564_v36 = vpop.eup %1563  ;;  %v961_v59 = vadd.f32 1.0, %v1562_v35 }
0x119e   :  { %v986_v3 = vadd.f32 1.0, %v1564_v36 }
0x119f   :  { %1565 = vrcp.f32 %v961_v59 }
0x11a0   :  { %1567 = vrcp.f32 %v986_v3  ;;  %v1379_v3 = vld [vmem:[%s1978_s5] ss:$0 sm:$0xff] }
0x11a9   :  { %v1566_v38 = vpop.eup %1565 }
0x11aa   :  { %v1568_v46 = vpop.eup %1567  ;;  %v965_v41 = vmul.f32 %v1566_v38, %v869_v61 }
0x11ab   :  { %v990_v45 = vmul.f32 %v1568_v46, %v894_v10 }
0x120d   :  { %v968_v37 = vpop.permute.xlu0 %967 }
0x120e   :  { %v970_v39 = vmul.f32 %v1566_v38, %v968_v37  ;;  %v993_v53 = vpop.permute.xlu1 %992 }
0x120f   :  { %v995_v40 = vmul.f32 %v1568_v46, %v993_v53 }
0x1210   :  { %972 = vrot.lane.b32.xlu0 %v970_v39, %s1593_s2 }
0x1211   :  { %997 = vrot.lane.b32.xlu1 %v995_v40, %s1593_s2 }
0x1282   :  { %v973_v43 = vpop.permute.xlu0 %972 }
0x1283   :  { %v975_v47 = vadd.f32 %v973_v43, %v965_v41  ;;  %v998_v49 = vpop.permute.xlu1 %997 }
0x1284   :  { %v1000_v50 = vadd.f32 %v998_v49, %v990_v45 }
0x1285   :  { %1569 = vtanh.f32 %v975_v47 }
0x1286   :  { %1571 = vtanh.f32 %v1000_v50 }
0x128f   :  { %v1570_v52 = vpop.eup %1569 }
0x1290   :  { %v1572_v54 = vpop.eup %1571  ;;  %978 = vrot.lane.b32.xlu0 %v1570_v52, %s1592_s0  ;;  %v1239_v52 = vld [vmem:[%s1979_s8] sm:$0xff] }
0x1291   :  { %1003 = vrot.lane.b32.xlu1 %v1572_v54, %s1592_s0  ;;  %v1240_v54 = vld [vmem:[%s1979_s8 + $0x8] sm:$0xff] }
0x1302   :  { %v979_v42 = vpop.permute.xlu0 %978 }
0x1303   :  { %v981_v4 = vmul.f32 %v1566_v38, %v979_v42  ;;  %v1004_v56 = vpop.permute.xlu1 %1003  ;;  %v1421_v42 = vpack.c.bf16 %v1240_v54, %v1239_v52 }
0x1304   :  { %v1006_v1 = vmul.f32 %v1568_v46, %v1004_v56 }
0x1305   :  { %1008 = vrot.lane.b32.xlu0 %v981_v4, %s1593_s2  ;;  %v1241_v4 = vld [vmem:[%s1979_s8 + $0x10] sm:$0x1f] }
0x1306   :  { %1012 = vrot.lane.b32.xlu1 %v1006_v1, %s1592_s0 }
0x1377   :  { %v1009_v7 = vpop.permute.xlu0 %1008 }
0x1378   :  { %v1013_v8 = vpop.permute.xlu1 %1012 }
0x1379   :  { %v1015_v11 = vsel %vm378_vm1, %v1009_v7, %v1013_v8 }
0x137a   :  { %v1016_v13 = vpack.c.bf16 %v1015_v11, %v1015_v11  ;;  %v1385_v11 = vld [vmem:[%s1980_s6] ss:$0 sm:$0xff] }
0x137c   :  { %1376 = vmatmul.mubr.msk.bf16.vlgmr.msra.gmra.mrb[16].mxu1 %vm124_vm0, %v1016_v13 }
0x137d   :  { %1417 = vmatprep.mubr.msk.f32.mxu1 %vm1595_vm2, %v1594_v23 }
0x144f   :  { %v1054_v14 = vpop.f32.mrb[16].mxu1 }
0x1450   :  { %v1063_v16 = vadd.f32 %v1054_v14, %v1796_v63  ;;  %v1056_v55 = vpop.f32.mrb[17].mxu1  ;;  %v1386_v14 = vld [vmem:[%s1981_s7] ss:$0 sm:$0xff] }
0x1451   :  { %v1088_v57 = vadd.f32 %v1056_v55, %v1769_v31  ;;  %v1058_v44 = vpop.f32.mrb[18].mxu1 }
0x1452   :  { %1573 = vtanh.f32 %v1063_v16  ;;  %v1059_v58 = vpop.f32.mrb[19].mxu1  ;;  %v1377_v0 = vmul.f32 -1.442695, %v1063_v16 }
0x1453   :  { %1575 = vtanh.f32 %v1088_v57  ;;  %v1378_v2 = vmul.f32 -1.442695, %v1088_v57  ;;  %v1387_v58 = vld [vmem:[%s1982_s9] ss:$0 sm:$0xff] }
0x1454   :  { %1577 = vpow2.f32 %v1377_v0 }
0x1455   :  { %1579 = vpow2.f32 %v1378_v2 }
0x145c   :  { %v1574_v60 = vpop.eup %1573 }
0x145d   :  { %v1576_v62 = vpop.eup %1575  ;;  %1073 = vrot.lane.b32.xlu0 %v1574_v60, %s1592_s0 }
0x145e   :  { %1098 = vrot.lane.b32.xlu1 %v1576_v62, %s1592_s0  ;;  %v1578_v5 = vpop.eup %1577 }
0x145f   :  { %v1580_v34 = vpop.eup %1579  ;;  %v1067_v63 = vadd.f32 1.0, %v1578_v5 }
0x1460   :  { %v1092_v6 = vadd.f32 1.0, %v1580_v34 }
0x1461   :  { %1581 = vrcp.f32 %v1067_v63 }
0x1462   :  { %1583 = vrcp.f32 %v1092_v6 }
0x146b   :  { %v1582_v31 = vpop.eup %1581 }
0x146c   :  { %v1584_v9 = vpop.eup %1583  ;;  %v1071_v17 = vmul.f32 %v1582_v31, %v975_v47 }
0x146d   :  { %v1096_v19 = vmul.f32 %v1584_v9, %v1000_v50  ;;  %v1596_v50 = vmov 0.0|0.0  }
0x146e   :  { %1420 = vmatprep.subr.bf16.mxu1 %v1596_v50 }
0x146f   :  { %1422 = vmatpush3.bf16.msra.mxu1 %v1421_v42 }
0x1470   :  { %1415 = vmatprep.subr.mxu1 %v1594_v23 }
0x1473   :  { %1416 = vmatpush3.msk.msra.mxu1 %vm1252_vm4, %v1241_v4 }
0x14cf   :  { %v1074_v61 = vpop.permute.xlu0 %1073 }
0x14d0   :  { %v1076_v10 = vmul.f32 %v1582_v31, %v1074_v61  ;;  %v1099_v12 = vpop.permute.xlu1 %1098 }
0x14d1   :  { %v1101_v15 = vmul.f32 %v1584_v9, %v1099_v12 }
0x14d2   :  { %1078 = vrot.lane.b32.xlu0 %v1076_v10, %s1593_s2 }
0x14d3   :  { %1103 = vrot.lane.b32.xlu1 %v1101_v15, %s1593_s2 }
0x1544   :  { %v1079_v18 = vpop.permute.xlu0 %1078 }
0x1545   :  { %v1081_v20 = vadd.f32 %v1079_v18, %v1071_v17  ;;  %v1104_v21 = vpop.permute.xlu1 %1103 }
0x1546   :  { %v1106_v22 = vadd.f32 %v1104_v21, %v1096_v19 }
0x1547   :  { %1585 = vtanh.f32 %v1081_v20 }
0x1548   :  { %1587 = vtanh.f32 %v1106_v22 }
0x1551   :  { %v1586_v48 = vpop.eup %1585 }
0x1552   :  { %v1588_v26 = vpop.eup %1587  ;;  %1084 = vrot.lane.b32.xlu0 %v1586_v48, %s1592_s0 }
0x1553   :  { %1109 = vrot.lane.b32.xlu1 %v1588_v26, %s1592_s0 }
0x15c4   :  { %v1085_v29 = vpop.permute.xlu0 %1084 }
0x15c5   :  { %v1087_v30 = vmul.f32 %v1582_v31, %v1085_v29  ;;  %v1110_v27 = vpop.permute.xlu1 %1109 }
0x15c6   :  { %v1112_v32 = vmul.f32 %v1584_v9, %v1110_v27 }
0x15c7   :  { %1114 = vrot.lane.b32.xlu0 %v1087_v30, %s1593_s2 }
0x15c8   :  { %1118 = vrot.lane.b32.xlu1 %v1112_v32, %s1592_s0 }
0x1639   :  { %v1115_v33 = vpop.permute.xlu0 %1114 }
0x163a   :  { %v1119_v35 = vpop.permute.xlu1 %1118 }
0x163b   :  { %v1121_v36 = vsel %vm378_vm1, %v1115_v33, %v1119_v35 }
0x163c   :  { %v1122_v59 = vpack.c.bf16 %v1121_v36, %v1121_v36 }
0x163e   :  { %1408 = vmatmul.mubr.msk.bf16.vlgmr.msra.gmra.mrb[28].mxu0 %vm124_vm0, %v1122_v59 }
0x1711   :  { %v1199_v38 = vpop.f32.mrb[28].mxu0 }
0x1712   :  { %v1200_v37 = vadd.f32 %v1379_v3, %v1199_v38  ;;  %v1409_v46 = vpop.f32.mrb[29].mxu0 }
0x1713   :  { %v1202_v39 = vpop.f32.mrb[30].mxu0 }
0x1714   :  { %v1410_v53 = vpop.f32.mrb[31].mxu0  ;;  %v1208_v40 = vsel %vm1207_vm3, %v1200_v37, 0.0 }
0x1715   :  { %1209 = vadd.xlane.f32.xlu0 %v1208_v40 }
0x17a2   :  { %v1210_v41 = vpop.xlane.xlu0 %1209 }
0x17a3   :  { %v1212_v43 = vmul.f32 0.04761905, %v1210_v41 }
0x17a5   :  { %v1213_v45 = vsub.f32 %v1200_v37, %v1212_v43 }
0x17a7   :  { %v1214_v47 = vmul.f32 %v1213_v45, %v1213_v45 }
0x17a9   :  { %v1215_v49 = vsel %vm1207_vm3, %v1214_v47, 0.0 }
0x17aa   :  { %1216 = vadd.xlane.f32.xlu1 %v1215_v49 }
0x1837   :  { %v1217_v56 = vpop.xlane.xlu1 %1216 }
0x1838   :  { %v1218_v1 = vmul.f32 0.04761905, %v1217_v56 }
0x183a   :  { %v1219_v7 = vadd.f32 1e-05, %v1218_v1 }
0x183c   :  { %1589 = vrsqrt.f32 %v1219_v7 }
0x1846   :  { %v1590_v8 = vpop.eup %1589 }
0x1847   :  { %v1221_v13 = vmul.f32 %v1590_v8, %v1213_v45 }
0x1849   :  { %v1228_v16 = vmul.f32 %v1385_v11, %v1221_v13 }
0x184b   :  { %v1235_v55 = vadd.f32 %v1386_v14, %v1228_v16 }
0x184d   :  { %vm1236_vm5 = vcmp.ge.f32.partialorder %v1235_v55, 0.0  ;;  %v1237_v57 = vmul.f32 0.01, %v1235_v55 }
0x184f   :  { %v1238_v44 = vsel %vm1236_vm5, %v1235_v55, %v1237_v57 }
0x1850   :  { %1418 = vmatmul.mubr.msk.f32.vlgmr.msra.gmra.mrb[20].mxu1 %vm1207_vm3, %v1238_v44 }
0x1923   :  { %v1322_v60 = vpop.f32.mrb[20].mxu1 }
0x1924   :  { %v1323_v62 = vadd.f32 %v1387_v58, %v1322_v60  ;;  %v1419_v0 = vpop.f32.mrb[21].mxu1 }
0x1926   :  { %1327 = vst.msk [vmem:[%s1983_s10] sm:$0xff] %vm1326_vm6, %v1323_v62 }

// kernel: birnn_relu_forward.2
= control target key start
LH: loop header
LB: loop body
LE: loop exit
PB: predicated region body
PF: predicated region fallthrough
CT: control target
= control target key end

     0   :  { %vm34_vm0 = vcmask 261120   ;;  %s1591_s13 = smov 32   ;;  %vm357_vm1 = vcmask 523264   ;;  %vm461_vm2 = vcmask 257024   ;;  %vm471_vm3 = vcmask 519424   ;;  %s2117_s0 = inlined_call_operand.vmem [shape: f32[64,32], index: 0, kind: input, shape index: {}]   ;;  %s2118_s5 = inlined_call_operand.vmem [shape: bf16[64,256], index: 5, kind: input, shape index: {}]   ;;  %s2119_s3 = inlined_call_operand.vmem [shape: bf16[32,256], index: 3, kind: input, shape index: {}]   ;;  %s2120_s1 = inlined_call_operand.vmem [shape: f32[1,32], index: 1, kind: input, shape index: {}]   ;;  %s2121_s2 = inlined_call_operand.vmem [shape: f32[1,32], index: 2, kind: input, shape index: {}]   ;;  %s2122_s4 = inlined_call_operand.vmem [shape: f32[1,256], index: 4, kind: input, shape index: {}]   ;;  %s2123_s6 = inlined_call_operand.vmem [shape: bf16[8,8,64], index: 6, kind: output, shape index: {}]  }
   0x1   :  { %v24_v0 = vld [vmem:[%s2117_s0] sm:$0xff]  ;;  %v26_v1 = vld [vmem:[%s2117_s0 + $0x10] sm:$0xff]  ;;  %v25_v2 = vld [vmem:[%s2117_s0 + $0x8] sm:$0xff] }
   0x2   :  { %v35_v3 = vsel %vm34_vm0, %v24_v0, 0.0  ;;  %v41_v4 = vsel %vm34_vm0, %v26_v1, 0.0  ;;  %v27_v5 = vld [vmem:[%s2117_s0 + $0x18] sm:$0xff]  ;;  %v38_v6 = vsel %vm34_vm0, %v25_v2, 0.0  ;;  %v28_v8 = vld [vmem:[%s2117_s0 + $0x20] sm:$0xff]  ;;  %v29_v9 = vld [vmem:[%s2117_s0 + $0x28] sm:$0xff] }
   0x3   :  { %36 = vadd.xlane.f32.xlu0 %v35_v3  ;;  %42 = vadd.xlane.f32.xlu1 %v41_v4  ;;  %v44_v7 = vsel %vm34_vm0, %v27_v5, 0.0  ;;  %v47_v10 = vsel %vm34_vm0, %v28_v8, 0.0  ;;  %v50_v11 = vsel %vm34_vm0, %v29_v9, 0.0  ;;  %v30_v12 = vld [vmem:[%s2117_s0 + $0x30] sm:$0xff]  ;;  %v31_v13 = vld [vmem:[%s2117_s0 + $0x38] sm:$0xff]  ;;  %v1589_v4 = vmov 0  }
   0x4   :  { %v53_v14 = vsel %vm34_vm0, %v30_v12, 0.0  ;;  %v56_v15 = vsel %vm34_vm0, %v31_v13, 0.0  ;;  %v1702_v56 = vld [vmem:[%s2118_s5 + $0x4] ss:$8 sps:$4 sm:$0xff]   ;;  %v1707_v57 = vld [vmem:[%s2118_s5] ss:$8 sps:$4 sm:$0xff]   ;;  %252 = vmatprep.mubr.bf16.mxu0 %v1589_v4  ;;  %393 = vmatprep.mubr.bf16.mxu1 %v1589_v4 }
   0x5   :  { %361 = vmatprep.subr.bf16.mxu1 %v1702_v56  ;;  %v1714_v58 = vld [vmem:[%s2118_s5 + $0x14] ss:$8 sps:$4 sm:$0xff]   ;;  %v1719_v59 = vld [vmem:[%s2118_s5 + $0x10] ss:$8 sps:$4 sm:$0xff]   ;;  %v1433_v60 = vld [vmem:[%s2119_s3 + $0x4] ss:$8 sps:$4 sm:$0xff]  }
   0x6   :  { %362 = vmatpush1.bf16.msra.mxu1 %v1707_v57  ;;  %v1435_v61 = vld [vmem:[%s2119_s3] ss:$8 sps:$4 sm:$0xff]   ;;  %220 = vmatprep.subr.bf16.mxu0 %v1433_v60  ;;  %v1732_v62 = vld [vmem:[%s2118_s5 + $0x24] ss:$8 sps:$4 sm:$0xff]   ;;  %v1755_v3 = vld [vmem:[%s2118_s5 + $0x30] ss:$8 sps:$4 sm:$0xff]  }
   0x7   :  { %39 = vadd.xlane.f32.xlu0 %v38_v6  ;;  %45 = vadd.xlane.f32.xlu1 %v44_v7  ;;  %v1737_v63 = vld [vmem:[%s2118_s5 + $0x20] ss:$8 sps:$4 sm:$0xff]  }
   0x8   :  { %363 = vmatprep.subr.bf16.mxu1 %v1714_v58  ;;  %221 = vmatpush1.bf16.msra.mxu0 %v1435_v61 }
   0xa   :  { %364 = vmatpush1.bf16.msra.mxu1 %v1719_v59 }
   0xb   :  { %48 = vadd.xlane.f32.xlu0 %v47_v10  ;;  %51 = vadd.xlane.f32.xlu1 %v50_v11 }
   0xc   :  { %365 = vmatprep.subr.bf16.mxu1 %v1732_v62 }
   0xe   :  { %366 = vmatpush1.bf16.msra.mxu1 %v1737_v63 }
   0xf   :  { %54 = vadd.xlane.f32.xlu0 %v53_v14  ;;  %57 = vadd.xlane.f32.xlu1 %v56_v15 }
  0x90   :  { %v37_v16 = vpop.xlane.xlu0 %36  ;;  %v43_v17 = vpop.xlane.xlu1 %42 }
  0x91   :  { %v60_v18 = vmul.f32 0.03125, %v37_v16  ;;  %v62_v19 = vmul.f32 0.03125, %v43_v17 }
  0x93   :  { %v1659_v20 = vsub.f32 %v24_v0, %v60_v18  ;;  %v1661_v21 = vsub.f32 %v26_v1, %v62_v19  ;;  %v1439_v0 = vld [vmem:[%s2119_s3 + $0x14] ss:$8 sps:$4 sm:$0xff]   ;;  %v1441_v1 = vld [vmem:[%s2119_s3 + $0x10] ss:$8 sps:$4 sm:$0xff]  }
  0x94   :  { %v40_v22 = vpop.xlane.xlu0 %39  ;;  %v46_v23 = vpop.xlane.xlu1 %45  ;;  %222 = vmatprep.subr.bf16.mxu0 %v1439_v0 }
  0x95   :  { %v61_v24 = vmul.f32 0.03125, %v40_v22  ;;  %v63_v25 = vmul.f32 0.03125, %v46_v23  ;;  %v76_v26 = vmul.f32 %v1659_v20, %v1659_v20  ;;  %v78_v27 = vmul.f32 %v1661_v21, %v1661_v21  ;;  %223 = vmatpush1.bf16.msra.mxu0 %v1441_v1 }
  0x96   :  { %610 = vmatprep.subr.bf16.mxu0 %v1702_v56 }
  0x97   :  { %v1667_v28 = vsub.f32 %v25_v2, %v61_v24  ;;  %v1669_v29 = vsub.f32 %v27_v5, %v63_v25  ;;  %v84_v30 = vsel %vm34_vm0, %v76_v26, 0.0  ;;  %v90_v33 = vsel %vm34_vm0, %v78_v27, 0.0  ;;  %v1750_v2 = vld [vmem:[%s2118_s5 + $0x34] ss:$8 sps:$4 sm:$0xff]  }
  0x98   :  { %85 = vadd.xlane.f32.xlu0 %v84_v30  ;;  %v49_v31 = vpop.xlane.xlu0 %48  ;;  %v52_v32 = vpop.xlane.xlu1 %51  ;;  %367 = vmatprep.subr.bf16.mxu1 %v1750_v2 }
  0x99   :  { %v64_v34 = vmul.f32 0.03125, %v49_v31  ;;  %v65_v35 = vmul.f32 0.03125, %v52_v32  ;;  %v77_v36 = vmul.f32 %v1667_v28, %v1667_v28  ;;  %v79_v37 = vmul.f32 %v1669_v29, %v1669_v29  ;;  %368 = vmatpush1.bf16.msra.mxu1 %v1755_v3  ;;  %v1337_v32 = vld [vmem:[%s2120_s1] ss:$0 sm:$0xff] }
  0x9a   :  { %486 = vmatprep.subr.bf16.mxu1 %v1702_v56 }
  0x9b   :  { %v1677_v38 = vsub.f32 %v28_v8, %v64_v34  ;;  %v1679_v39 = vsub.f32 %v29_v9, %v65_v35  ;;  %v87_v40 = vsel %vm34_vm0, %v77_v36, 0.0  ;;  %v93_v43 = vsel %vm34_vm0, %v79_v37, 0.0 }
  0x9c   :  { %91 = vadd.xlane.f32.xlu0 %v90_v33  ;;  %88 = vadd.xlane.f32.xlu1 %v87_v40  ;;  %v55_v41 = vpop.xlane.xlu0 %54  ;;  %v58_v42 = vpop.xlane.xlu1 %57 }
  0x9d   :  { %v66_v44 = vmul.f32 0.03125, %v55_v41  ;;  %v67_v45 = vmul.f32 0.03125, %v58_v42  ;;  %v80_v46 = vmul.f32 %v1677_v38, %v1677_v38  ;;  %v81_v47 = vmul.f32 %v1679_v39, %v1679_v39  ;;  %394 = vmatmul.mubr.bf16.vlgmr.msra.gmra.mrb[0].mxu1 %v1589_v4 }
  0x9e   :  { %487 = vmatpush1.bf16.msra.mxu1 %v1707_v57  ;;  %518 = vmatprep.mubr.bf16.mxu1 %v1589_v4 }
  0x9f   :  { %v1687_v48 = vsub.f32 %v30_v12, %v66_v44  ;;  %v1689_v49 = vsub.f32 %v31_v13, %v67_v45  ;;  %v96_v50 = vsel %vm34_vm0, %v80_v46, 0.0  ;;  %v99_v51 = vsel %vm34_vm0, %v81_v47, 0.0  ;;  %488 = vmatprep.subr.bf16.mxu1 %v1714_v58 }
  0xa0   :  { %94 = vadd.xlane.f32.xlu1 %v93_v43  ;;  %97 = vadd.xlane.f32.xlu0 %v96_v50 }
  0xa1   :  { %v82_v52 = vmul.f32 %v1687_v48, %v1687_v48  ;;  %v83_v53 = vmul.f32 %v1689_v49, %v1689_v49 }
  0xa2   :  { %489 = vmatpush1.bf16.msra.mxu1 %v1719_v59 }
  0xa3   :  { %v102_v54 = vsel %vm34_vm0, %v82_v52, 0.0  ;;  %v105_v55 = vsel %vm34_vm0, %v83_v53, 0.0  ;;  %490 = vmatprep.subr.bf16.mxu1 %v1732_v62 }
  0xa4   :  { %100 = vadd.xlane.f32.xlu1 %v99_v51  ;;  %103 = vadd.xlane.f32.xlu0 %v102_v54 }
  0xa6   :  { %491 = vmatpush1.bf16.msra.mxu1 %v1737_v63 }
  0xa7   :  { %492 = vmatprep.subr.bf16.mxu1 %v1750_v2 }
  0xa8   :  { %106 = vadd.xlane.f32.xlu1 %v105_v55 }
  0xaa   :  { %493 = vmatpush1.bf16.msra.mxu1 %v1755_v3 }
  0xab   :  { %734 = vmatprep.subr.bf16.mxu1 %v1702_v56 }
 0x125   :  { %v86_v5 = vpop.xlane.xlu0 %85 }
 0x126   :  { %v108_v6 = vmul.f32 0.03125, %v86_v5 }
 0x128   :  { %v116_v7 = vadd.f32 1e-05, %v108_v6 }
 0x129   :  { %v89_v8 = vpop.xlane.xlu1 %88  ;;  %v92_v9 = vpop.xlane.xlu0 %91 }
 0x12a   :  { %1445 = vrsqrt.f32 %v116_v7  ;;  %v109_v10 = vmul.f32 0.03125, %v89_v8  ;;  %v110_v11 = vmul.f32 0.03125, %v92_v9 }
 0x12c   :  { %v117_v12 = vadd.f32 1e-05, %v109_v10  ;;  %v118_v13 = vadd.f32 1e-05, %v110_v11 }
 0x12d   :  { %v95_v14 = vpop.xlane.xlu1 %94  ;;  %v98_v15 = vpop.xlane.xlu0 %97 }
 0x12e   :  { %1447 = vrsqrt.f32 %v117_v12  ;;  %v111_v16 = vmul.f32 0.03125, %v95_v14  ;;  %v112_v18 = vmul.f32 0.03125, %v98_v15 }
 0x12f   :  { %1449 = vrsqrt.f32 %v118_v13 }
 0x130   :  { %v119_v17 = vadd.f32 1e-05, %v111_v16  ;;  %v120_v24 = vadd.f32 1e-05, %v112_v18  ;;  %v178_v16 = vlaneseq }
 0x131   :  { %v101_v19 = vpop.xlane.xlu1 %100  ;;  %v104_v27 = vpop.xlane.xlu0 %103 }
 0x132   :  { %1451 = vrsqrt.f32 %v119_v17  ;;  %v113_v22 = vmul.f32 0.03125, %v101_v19  ;;  %v114_v34 = vmul.f32 0.03125, %v104_v27  ;;  %v179_v17 = vshrl.u32 %v178_v16, 7  ;;  %v176_v19 = vld [vmem:[%s2122_s4] sm:$0x3]  ;;  %s1590_s4 = smov 64  }
 0x134   :  { %v1446_v23 = vpop.eup %1445  ;;  %v121_v25 = vadd.f32 1e-05, %v113_v22  ;;  %v122_v43 = vadd.f32 1e-05, %v114_v34  ;;  %v180_v18 = vsub.s32 0, %v179_v17  ;;  %v184_v22 = vsub.s32 1, %v179_v17 }
 0x135   :  { %v132_v26 = vmul.f32 %v1446_v23, %v1659_v20  ;;  %v107_v30 = vpop.xlane.xlu1 %106  ;;  %v1338_v20 = vld [vmem:[%s2121_s2] ss:$0 sm:$0xff] }
 0x136   :  { %1453 = vrsqrt.f32 %v121_v25  ;;  %v115_v31 = vmul.f32 0.03125, %v107_v30  ;;  %v181_v23 = vrot.slane %v176_v19, %v180_v18 }
 0x137   :  { %1455 = vrsqrt.f32 %v120_v24  ;;  %v146_v36 = vmul.f32 %v1337_v32, %v132_v26  ;;  %v185_v24 = vrot.slane %v176_v19, %v184_v22 }
 0x138   :  { %v1448_v33 = vpop.eup %1447  ;;  %v123_v40 = vadd.f32 1e-05, %v115_v31 }
 0x139   :  { %v133_v35 = vmul.f32 %v1448_v33, %v1667_v28  ;;  %v1450_v37 = vpop.eup %1449  ;;  %v160_v46 = vadd.f32 %v1338_v20, %v146_v36 }
 0x13a   :  { %v134_v44 = vmul.f32 %v1450_v37, %v1661_v21  ;;  %1457 = vrsqrt.f32 %v123_v40 }
 0x13b   :  { %v147_v41 = vmul.f32 %v1337_v32, %v133_v35  ;;  %1459 = vrsqrt.f32 %v122_v43 }
 0x13c   :  { %v1452_v42 = vpop.eup %1451  ;;  %v148_v52 = vmul.f32 %v1337_v32, %v134_v44 }
 0x13d   :  { %v135_v45 = vmul.f32 %v1452_v42, %v1669_v29  ;;  %v161_v47 = vadd.f32 %v1338_v20, %v147_v41 }
 0x13e   :  { %v162_v55 = vadd.f32 %v1338_v20, %v148_v52 }
 0x13f   :  { %v168_v50 = vpack.c.bf16 %v161_v47, %v160_v46  ;;  %v149_v51 = vmul.f32 %v1337_v32, %v135_v45 }
 0x140   :  { %v1454_v28 = vpop.eup %1453 }
 0x141   :  { %1343 = vmatmul.mubr.msk.bf16.vlgmr.msra.gmra.mrb[0].mxu0 %vm34_vm0, %v168_v50  ;;  %v1456_v53 = vpop.eup %1455  ;;  %v137_v54 = vmul.f32 %v1454_v28, %v1679_v39  ;;  %v163_v21 = vadd.f32 %v1338_v20, %v149_v51 }
 0x142   :  { %262 = vmatprep.mubr.bf16.mxu0 %v1589_v4  ;;  %611 = vmatpush1.bf16.msra.mxu0 %v1707_v57  ;;  %v136_v29 = vmul.f32 %v1456_v53, %v1677_v38 }
 0x143   :  { %612 = vmatprep.subr.bf16.mxu0 %v1714_v58  ;;  %v169_v60 = vpack.c.bf16 %v163_v21, %v162_v55  ;;  %v151_v61 = vmul.f32 %v1337_v32, %v137_v54 }
 0x144   :  { %v1458_v0 = vpop.eup %1457  ;;  %v150_v1 = vmul.f32 %v1337_v32, %v136_v29 }
 0x145   :  { %v1460_v5 = vpop.eup %1459  ;;  %v139_v39 = vmul.f32 %v1458_v0, %v1689_v49  ;;  %v165_v6 = vadd.f32 %v1338_v20, %v151_v61 }
 0x146   :  { %613 = vmatpush1.bf16.msra.mxu0 %v1719_v59  ;;  %v138_v38 = vmul.f32 %v1460_v5, %v1687_v48  ;;  %v164_v7 = vadd.f32 %v1338_v20, %v150_v1 }
 0x147   :  { %614 = vmatprep.subr.bf16.mxu0 %v1732_v62  ;;  %v153_v9 = vmul.f32 %v1337_v32, %v139_v39 }
 0x148   :  { %v170_v8 = vpack.c.bf16 %v165_v6, %v164_v7  ;;  %v152_v10 = vmul.f32 %v1337_v32, %v138_v38 }
 0x149   :  { %1344 = vmatmul.mubr.msk.bf16.gmra.mrb[4].mxu0 %vm34_vm0, %v169_v60  ;;  %v167_v11 = vadd.f32 %v1338_v20, %v153_v9 }
 0x14a   :  { %272 = vmatprep.mubr.bf16.mxu0 %v1589_v4  ;;  %615 = vmatpush1.bf16.msra.mxu0 %v1737_v63  ;;  %v166_v12 = vadd.f32 %v1338_v20, %v152_v10 }
 0x14b   :  { %616 = vmatprep.subr.bf16.mxu0 %v1750_v2 }
 0x14c   :  { %v171_v49 = vpack.c.bf16 %v167_v11, %v166_v12 }
 0x14e   :  { %617 = vmatpush1.bf16.msra.mxu0 %v1755_v3 }
 0x14f   :  { %858 = vmatprep.subr.bf16.mxu0 %v1702_v56 }
 0x151   :  { %1345 = vmatmul.mubr.msk.bf16.gmra.mrb[8].mxu0 %vm34_vm0, %v170_v8 }
 0x152   :  { %282 = vmatprep.mubr.bf16.mxu0 %v1589_v4 }
 0x159   :  { %1346 = vmatmul.mubr.msk.bf16.gmra.mrb[12].mxu0 %vm34_vm0, %v171_v49 }
 0x15a   :  { %642 = vmatprep.mubr.bf16.mxu0 %v1589_v4 }
 0x170   :  { %v395_v48 = vpop.f32.mrb[0].mxu1 }
 0x171   :  { %v397_v13 = vpop.f32.mrb[1].mxu1 }
 0x172   :  { %v399_v14 = vpop.f32.mrb[2].mxu1 }
 0x173   :  { %v400_v15 = vpop.f32.mrb[3].mxu1 }
 0x214   :  { %v254_v25 = vpop.f32.mrb[0].mxu0 }
 0x215   :  { %v255_v26 = vadd.f32 %v254_v25, %v181_v23  ;;  %v256_v27 = vpop.f32.mrb[1].mxu0 }
 0x216   :  { %v1806_v30 = vadd.f32 %v256_v27, %v185_v24  ;;  %v258_v31 = vpop.f32.mrb[2].mxu0 }
 0x217   :  { %v1808_v32 = vadd.f32 %v258_v31, %v181_v23  ;;  %v404_v33 = vadd.f32 %v395_v48, %v255_v26  ;;  %v260_v34 = vpop.f32.mrb[3].mxu0 }
 0x218   :  { %v1810_v35 = vadd.f32 %v260_v34, %v185_v24 }
 0x219   :  { %1461 = vtanh.f32 %v404_v33  ;;  %v1355_v38 = vmul.f32 -1.442695, %v404_v33 }
 0x21c   :  { %v264_v36 = vpop.f32.mrb[4].mxu0 }
 0x21d   :  { %v1812_v37 = vadd.f32 %v264_v36, %v181_v23  ;;  %v266_v40 = vpop.f32.mrb[5].mxu0 }
 0x21e   :  { %v1814_v20 = vadd.f32 %v266_v40, %v185_v24  ;;  %v268_v41 = vpop.f32.mrb[6].mxu0 }
 0x21f   :  { %v1816_v42 = vadd.f32 %v268_v41, %v181_v23  ;;  %v270_v43 = vpop.f32.mrb[7].mxu0 }
 0x220   :  { %v1818_v44 = vadd.f32 %v270_v43, %v185_v24 }
 0x223   :  { %v1462_v45 = vpop.eup %1461 }
 0x224   :  { %414 = vrot.lane.b32.xlu0 %v1462_v45, %s1590_s4  ;;  %v274_v46 = vpop.f32.mrb[8].mxu0 }
 0x225   :  { %v1821_v47 = vadd.f32 %v274_v46, %v181_v23  ;;  %v276_v50 = vpop.f32.mrb[9].mxu0 }
 0x226   :  { %v1823_v51 = vadd.f32 %v276_v50, %v185_v24  ;;  %v278_v28 = vpop.f32.mrb[10].mxu0 }
 0x227   :  { %v1825_v52 = vadd.f32 %v278_v28, %v181_v23  ;;  %v280_v53 = vpop.f32.mrb[11].mxu0 }
 0x228   :  { %v1827_v54 = vadd.f32 %v280_v53, %v185_v24 }
 0x22c   :  { %v284_v21 = vpop.f32.mrb[12].mxu0 }
 0x22d   :  { %v1829_v29 = vadd.f32 %v284_v21, %v181_v23  ;;  %v286_v55 = vpop.f32.mrb[13].mxu0 }
 0x22e   :  { %v1831_v60 = vadd.f32 %v286_v55, %v185_v24  ;;  %v288_v61 = vpop.f32.mrb[14].mxu0 }
 0x22f   :  { %v1833_v0 = vadd.f32 %v288_v61, %v181_v23  ;;  %v290_v1 = vpop.f32.mrb[15].mxu0 }
 0x230   :  { %v291_v5 = vadd.f32 %v290_v1, %v185_v24 }
 0x232   :  { %v429_v39 = vadd.f32 %v397_v13, %v291_v5 }
 0x234   :  { %1463 = vtanh.f32 %v429_v39  ;;  %v1356_v9 = vmul.f32 -1.442695, %v429_v39 }
 0x235   :  { %1465 = vpow2.f32 %v1355_v38 }
 0x23e   :  { %v1464_v6 = vpop.eup %1463 }
 0x23f   :  { %439 = vrot.lane.b32.xlu1 %v1464_v6, %s1590_s4  ;;  %v1466_v7 = vpop.eup %1465 }
 0x240   :  { %v408_v8 = vadd.f32 1.0, %v1466_v7 }
 0x242   :  { %1467 = vrcp.f32 %v408_v8 }
 0x243   :  { %1469 = vpow2.f32 %v1356_v9 }
 0x24c   :  { %v1468_v10 = vpop.eup %1467 }
 0x24d   :  { %v1470_v49 = vpop.eup %1469  ;;  %v412_v16 = vmul.f32 0.0, %v1468_v10 }
 0x24e   :  { %v433_v48 = vadd.f32 1.0, %v1470_v49 }
 0x250   :  { %1471 = vrcp.f32 %v433_v48 }
 0x25a   :  { %v1472_v13 = vpop.eup %1471 }
 0x25b   :  { %v437_v22 = vmul.f32 0.0, %v1472_v13 }
 0x296   :  { %v415_v11 = vpop.permute.xlu0 %414 }
 0x297   :  { %v417_v12 = vmul.f32 %v1468_v10, %v415_v11 }
 0x299   :  { %419 = vrot.lane.b32.xlu1 %v417_v12, %s1591_s13 }
 0x2b1   :  { %v440_v14 = vpop.permute.xlu1 %439 }
 0x2b2   :  { %v442_v15 = vmul.f32 %v1472_v13, %v440_v14 }
 0x2b4   :  { %444 = vrot.lane.b32.xlu1 %v442_v15, %s1591_s13 }
 0x30b   :  { %v420_v17 = vpop.permute.xlu1 %419 }
 0x30c   :  { %v422_v18 = vadd.f32 %v420_v17, %v412_v16 }
 0x30e   :  { %1473 = vtanh.f32 %v422_v18 }
 0x318   :  { %v1474_v19 = vpop.eup %1473 }
 0x319   :  { %425 = vrot.lane.b32.xlu0 %v1474_v19, %s1590_s4 }
 0x326   :  { %v445_v23 = vpop.permute.xlu1 %444 }
 0x327   :  { %v447_v24 = vadd.f32 %v445_v23, %v437_v22 }
 0x329   :  { %1475 = vtanh.f32 %v447_v24 }
 0x333   :  { %v1476_v25 = vpop.eup %1475 }
 0x334   :  { %450 = vrot.lane.b32.xlu1 %v1476_v25, %s1590_s4 }
 0x38b   :  { %v426_v26 = vpop.permute.xlu0 %425 }
 0x38c   :  { %v1840_v27 = vmul.f32 %v1468_v10, %v426_v26 }
 0x38e   :  { %474 = vrot.lane.b32.xlu0 %v1840_v27, %s1591_s13 }
 0x3a6   :  { %v451_v31 = vpop.permute.xlu1 %450 }
 0x3a7   :  { %v1844_v33 = vmul.f32 %v1472_v13, %v451_v31 }
 0x3a9   :  { %478 = vrot.lane.b32.xlu1 %v1844_v33, %s1590_s4 }
 0x400   :  { %v475_v34 = vpop.permute.xlu0 %474 }
 0x41b   :  { %v479_v36 = vpop.permute.xlu1 %478 }
 0x41c   :  { %v481_v40 = vsel %vm34_vm0, %v475_v34, %v479_v36 }
 0x41d   :  { %v482_v41 = vpack.c.bf16 %v481_v40, %v481_v40 }
 0x41f   :  { %1360 = vmatmul.mubr.msk.bf16.vlgmr.msra.gmra.mrb[4].mxu1 %vm357_vm1, %v482_v41 }
 0x420   :  { %735 = vmatpush1.bf16.msra.mxu1 %v1707_v57  ;;  %766 = vmatprep.mubr.bf16.mxu1 %v1589_v4 }
 0x421   :  { %736 = vmatprep.subr.bf16.mxu1 %v1714_v58 }
 0x424   :  { %737 = vmatpush1.bf16.msra.mxu1 %v1719_v59 }
 0x425   :  { %738 = vmatprep.subr.bf16.mxu1 %v1732_v62 }
 0x428   :  { %739 = vmatpush1.bf16.msra.mxu1 %v1737_v63 }
 0x429   :  { %740 = vmatprep.subr.bf16.mxu1 %v1750_v2 }
 0x42c   :  { %741 = vmatpush1.bf16.msra.mxu1 %v1755_v3 }
 0x42d   :  { %980 = vmatprep.subr.bf16.mxu1 %v1702_v56 }
 0x4f2   :  { %v520_v43 = vpop.f32.mrb[4].mxu1 }
 0x4f3   :  { %v529_v45 = vadd.f32 %v520_v43, %v1808_v32  ;;  %v522_v46 = vpop.f32.mrb[5].mxu1 }
 0x4f4   :  { %v554_v50 = vadd.f32 %v522_v46, %v1831_v60  ;;  %v524_v28 = vpop.f32.mrb[6].mxu1 }
 0x4f5   :  { %1477 = vtanh.f32 %v529_v45  ;;  %v525_v53 = vpop.f32.mrb[7].mxu1  ;;  %v1361_v61 = vmul.f32 -1.442695, %v529_v45 }
 0x4f6   :  { %1479 = vtanh.f32 %v554_v50  ;;  %v1362_v1 = vmul.f32 -1.442695, %v554_v50 }
 0x4f7   :  { %1481 = vpow2.f32 %v1361_v61 }
 0x4f8   :  { %1483 = vpow2.f32 %v1362_v1 }
 0x4ff   :  { %v1478_v21 = vpop.eup %1477 }
 0x500   :  { %v1480_v55 = vpop.eup %1479  ;;  %539 = vrot.lane.b32.xlu0 %v1478_v21, %s1590_s4 }
 0x501   :  { %564 = vrot.lane.b32.xlu1 %v1480_v55, %s1590_s4  ;;  %v1482_v5 = vpop.eup %1481 }
 0x502   :  { %v1484_v39 = vpop.eup %1483  ;;  %v533_v32 = vadd.f32 1.0, %v1482_v5 }
 0x503   :  { %v558_v6 = vadd.f32 1.0, %v1484_v39 }
 0x504   :  { %1485 = vrcp.f32 %v533_v32 }
 0x505   :  { %1487 = vrcp.f32 %v558_v6 }
 0x50e   :  { %v1486_v60 = vpop.eup %1485 }
 0x50f   :  { %v1488_v7 = vpop.eup %1487  ;;  %v537_v11 = vmul.f32 %v1486_v60, %v422_v18 }
 0x510   :  { %v562_v49 = vmul.f32 %v1488_v7, %v447_v24 }
 0x572   :  { %v540_v38 = vpop.permute.xlu0 %539 }
 0x573   :  { %v542_v8 = vmul.f32 %v1486_v60, %v540_v38  ;;  %v565_v9 = vpop.permute.xlu1 %564 }
 0x574   :  { %v567_v10 = vmul.f32 %v1488_v7, %v565_v9 }
 0x575   :  { %544 = vrot.lane.b32.xlu0 %v542_v8, %s1591_s13 }
 0x576   :  { %569 = vrot.lane.b32.xlu1 %v567_v10, %s1591_s13 }
 0x5e7   :  { %v545_v12 = vpop.permute.xlu0 %544 }
 0x5e8   :  { %v547_v48 = vadd.f32 %v545_v12, %v537_v11  ;;  %v570_v13 = vpop.permute.xlu1 %569 }
 0x5e9   :  { %v572_v14 = vadd.f32 %v570_v13, %v562_v49 }
 0x5ea   :  { %1489 = vtanh.f32 %v547_v48 }
 0x5eb   :  { %1491 = vtanh.f32 %v572_v14 }
 0x5f4   :  { %v1490_v15 = vpop.eup %1489 }
 0x5f5   :  { %v1492_v16 = vpop.eup %1491  ;;  %550 = vrot.lane.b32.xlu0 %v1490_v15, %s1590_s4 }
 0x5f6   :  { %575 = vrot.lane.b32.xlu1 %v1492_v16, %s1590_s4 }
 0x667   :  { %v551_v17 = vpop.permute.xlu0 %550 }
 0x668   :  { %v1867_v19 = vmul.f32 %v1486_v60, %v551_v17  ;;  %v576_v22 = vpop.permute.xlu1 %575 }
 0x669   :  { %v1869_v23 = vmul.f32 %v1488_v7, %v576_v22 }
 0x66a   :  { %598 = vrot.lane.b32.xlu0 %v1867_v19, %s1591_s13 }
 0x66b   :  { %602 = vrot.lane.b32.xlu1 %v1869_v23, %s1590_s4 }
 0x6dc   :  { %v599_v18 = vpop.permute.xlu0 %598 }
 0x6dd   :  { %v603_v24 = vpop.permute.xlu1 %602 }
 0x6de   :  { %v605_v25 = vsel %vm34_vm0, %v599_v18, %v603_v24 }
 0x6df   :  { %v606_v26 = vpack.c.bf16 %v605_v25, %v605_v25 }
 0x6e1   :  { %1367 = vmatmul.mubr.msk.bf16.vlgmr.msra.gmra.mrb[16].mxu0 %vm357_vm1, %v606_v26 }
 0x6e2   :  { %859 = vmatpush1.bf16.msra.mxu0 %v1707_v57  ;;  %890 = vmatprep.mubr.bf16.mxu0 %v1589_v4 }
 0x6e3   :  { %860 = vmatprep.subr.bf16.mxu0 %v1714_v58 }
 0x6e6   :  { %861 = vmatpush1.bf16.msra.mxu0 %v1719_v59 }
 0x6e7   :  { %862 = vmatprep.subr.bf16.mxu0 %v1732_v62 }
 0x6ea   :  { %863 = vmatpush1.bf16.msra.mxu0 %v1737_v63 }
 0x6eb   :  { %864 = vmatprep.subr.bf16.mxu0 %v1750_v2 }
 0x6ee   :  { %865 = vmatpush1.bf16.msra.mxu0 %v1755_v3 }
 0x6ef   :  { %1102 = vmatprep.subr.bf16.mxu0 %v1702_v56 }
 0x7b4   :  { %v644_v31 = vpop.f32.mrb[16].mxu0 }
 0x7b5   :  { %v653_v34 = vadd.f32 %v644_v31, %v1812_v37  ;;  %v646_v36 = vpop.f32.mrb[17].mxu0 }
 0x7b6   :  { %v678_v40 = vadd.f32 %v646_v36, %v1827_v54  ;;  %v648_v41 = vpop.f32.mrb[18].mxu0 }
 0x7b7   :  { %1493 = vtanh.f32 %v653_v34  ;;  %v649_v43 = vpop.f32.mrb[19].mxu0  ;;  %v1368_v50 = vmul.f32 -1.442695, %v653_v34 }
 0x7b8   :  { %1495 = vtanh.f32 %v678_v40  ;;  %v1369_v28 = vmul.f32 -1.442695, %v678_v40 }
 0x7b9   :  { %1497 = vpow2.f32 %v1368_v50 }
 0x7ba   :  { %1499 = vpow2.f32 %v1369_v28 }
 0x7c1   :  { %v1494_v45 = vpop.eup %1493 }
 0x7c2   :  { %v1496_v46 = vpop.eup %1495  ;;  %663 = vrot.lane.b32.xlu0 %v1494_v45, %s1590_s4 }
 0x7c3   :  { %688 = vrot.lane.b32.xlu1 %v1496_v46, %s1590_s4  ;;  %v1498_v53 = vpop.eup %1497 }
 0x7c4   :  { %v1500_v21 = vpop.eup %1499  ;;  %v657_v37 = vadd.f32 1.0, %v1498_v53 }
 0x7c5   :  { %v682_v55 = vadd.f32 1.0, %v1500_v21 }
 0x7c6   :  { %1501 = vrcp.f32 %v657_v37 }
 0x7c7   :  { %1503 = vrcp.f32 %v682_v55 }
 0x7d0   :  { %v1502_v54 = vpop.eup %1501 }
 0x7d1   :  { %v1504_v1 = vpop.eup %1503  ;;  %v661_v6 = vmul.f32 %v1502_v54, %v547_v48 }
 0x7d2   :  { %v686_v38 = vmul.f32 %v1504_v1, %v572_v14 }
 0x834   :  { %v664_v61 = vpop.permute.xlu0 %663 }
 0x835   :  { %v666_v5 = vmul.f32 %v1502_v54, %v664_v61  ;;  %v689_v39 = vpop.permute.xlu1 %688 }
 0x836   :  { %v691_v32 = vmul.f32 %v1504_v1, %v689_v39 }
 0x837   :  { %668 = vrot.lane.b32.xlu0 %v666_v5, %s1591_s13 }
 0x838   :  { %693 = vrot.lane.b32.xlu1 %v691_v32, %s1591_s13 }
 0x8a9   :  { %v669_v60 = vpop.permute.xlu0 %668 }
 0x8aa   :  { %v671_v7 = vadd.f32 %v669_v60, %v661_v6  ;;  %v694_v8 = vpop.permute.xlu1 %693 }
 0x8ab   :  { %v696_v9 = vadd.f32 %v694_v8, %v686_v38 }
 0x8ac   :  { %1505 = vtanh.f32 %v671_v7 }
 0x8ad   :  { %1507 = vtanh.f32 %v696_v9 }
 0x8b6   :  { %v1506_v10 = vpop.eup %1505 }
 0x8b7   :  { %v1508_v11 = vpop.eup %1507  ;;  %674 = vrot.lane.b32.xlu0 %v1506_v10, %s1590_s4 }
 0x8b8   :  { %699 = vrot.lane.b32.xlu1 %v1508_v11, %s1590_s4 }
 0x929   :  { %v675_v12 = vpop.permute.xlu0 %674 }
 0x92a   :  { %v1894_v49 = vmul.f32 %v1502_v54, %v675_v12  ;;  %v700_v13 = vpop.permute.xlu1 %699 }
 0x92b   :  { %v1896_v15 = vmul.f32 %v1504_v1, %v700_v13 }
 0x92c   :  { %722 = vrot.lane.b32.xlu0 %v1894_v49, %s1591_s13 }
 0x92d   :  { %726 = vrot.lane.b32.xlu1 %v1896_v15, %s1590_s4 }
 0x99e   :  { %v723_v48 = vpop.permute.xlu0 %722 }
 0x99f   :  { %v727_v14 = vpop.permute.xlu1 %726 }
 0x9a0   :  { %v729_v16 = vsel %vm34_vm0, %v723_v48, %v727_v14 }
 0x9a1   :  { %v730_v17 = vpack.c.bf16 %v729_v16, %v729_v16 }
 0x9a3   :  { %1374 = vmatmul.mubr.msk.bf16.vlgmr.msra.gmra.mrb[8].mxu1 %vm357_vm1, %v730_v17 }
 0x9a4   :  { %981 = vmatpush1.bf16.msra.mxu1 %v1707_v57  ;;  %1012 = vmatprep.mubr.bf16.mxu1 %v1589_v4 }
 0x9a5   :  { %982 = vmatprep.subr.bf16.mxu1 %v1714_v58 }
 0x9a8   :  { %983 = vmatpush1.bf16.msra.mxu1 %v1719_v59 }
 0x9a9   :  { %984 = vmatprep.subr.bf16.mxu1 %v1732_v62 }
 0x9ac   :  { %985 = vmatpush1.bf16.msra.mxu1 %v1737_v63 }
 0x9ad   :  { %986 = vmatprep.subr.bf16.mxu1 %v1750_v2 }
 0x9b0   :  { %987 = vmatpush1.bf16.msra.mxu1 %v1755_v3 }
 0x9b1   :  { %1224 = vmatprep.subr.bf16.mxu1 %v1702_v56 }
 0xa76   :  { %v768_v22 = vpop.f32.mrb[8].mxu1 }
 0xa77   :  { %v777_v18 = vadd.f32 %v768_v22, %v1816_v42  ;;  %v770_v24 = vpop.f32.mrb[9].mxu1 }
 0xa78   :  { %v802_v25 = vadd.f32 %v770_v24, %v1823_v51  ;;  %v772_v26 = vpop.f32.mrb[10].mxu1 }
 0xa79   :  { %1509 = vtanh.f32 %v777_v18  ;;  %v773_v31 = vpop.f32.mrb[11].mxu1  ;;  %v1375_v40 = vmul.f32 -1.442695, %v777_v18 }
 0xa7a   :  { %1511 = vtanh.f32 %v802_v25  ;;  %v1376_v41 = vmul.f32 -1.442695, %v802_v25 }
 0xa7b   :  { %1513 = vpow2.f32 %v1375_v40 }
 0xa7c   :  { %1515 = vpow2.f32 %v1376_v41 }
 0xa83   :  { %v1510_v34 = vpop.eup %1509 }
 0xa84   :  { %v1512_v36 = vpop.eup %1511  ;;  %787 = vrot.lane.b32.xlu0 %v1510_v34, %s1590_s4 }
 0xa85   :  { %812 = vrot.lane.b32.xlu1 %v1512_v36, %s1590_s4  ;;  %v1514_v56 = vpop.eup %1513 }
 0xa86   :  { %v1516_v43 = vpop.eup %1515  ;;  %v781_v42 = vadd.f32 1.0, %v1514_v56 }
 0xa87   :  { %v806_v45 = vadd.f32 1.0, %v1516_v43 }
 0xa88   :  { %1517 = vrcp.f32 %v781_v42 }
 0xa89   :  { %1519 = vrcp.f32 %v806_v45 }
 0xa92   :  { %v1518_v51 = vpop.eup %1517 }
 0xa93   :  { %v1520_v50 = vpop.eup %1519  ;;  %v785_v37 = vmul.f32 %v1518_v51, %v671_v7 }
 0xa94   :  { %v810_v54 = vmul.f32 %v1520_v50, %v696_v9 }
 0xaf6   :  { %v788_v46 = vpop.permute.xlu0 %787 }
 0xaf7   :  { %v790_v28 = vmul.f32 %v1518_v51, %v788_v46  ;;  %v813_v53 = vpop.permute.xlu1 %812 }
 0xaf8   :  { %v815_v21 = vmul.f32 %v1520_v50, %v813_v53 }
 0xaf9   :  { %792 = vrot.lane.b32.xlu0 %v790_v28, %s1591_s13 }
 0xafa   :  { %817 = vrot.lane.b32.xlu1 %v815_v21, %s1591_s13 }
 0xb6b   :  { %v793_v55 = vpop.permute.xlu0 %792 }
 0xb6c   :  { %v795_v61 = vadd.f32 %v793_v55, %v785_v37  ;;  %v818_v1 = vpop.permute.xlu1 %817 }
 0xb6d   :  { %v820_v5 = vadd.f32 %v818_v1, %v810_v54 }
 0xb6e   :  { %1521 = vtanh.f32 %v795_v61 }
 0xb6f   :  { %1523 = vtanh.f32 %v820_v5 }
 0xb78   :  { %v1522_v39 = vpop.eup %1521 }
 0xb79   :  { %v1524_v32 = vpop.eup %1523  ;;  %798 = vrot.lane.b32.xlu0 %v1522_v39, %s1590_s4 }
 0xb7a   :  { %823 = vrot.lane.b32.xlu1 %v1524_v32, %s1590_s4 }
 0xbeb   :  { %v799_v6 = vpop.permute.xlu0 %798 }
 0xbec   :  { %v1921_v60 = vmul.f32 %v1518_v51, %v799_v6  ;;  %v824_v38 = vpop.permute.xlu1 %823 }
 0xbed   :  { %v1923_v8 = vmul.f32 %v1520_v50, %v824_v38 }
 0xbee   :  { %846 = vrot.lane.b32.xlu0 %v1921_v60, %s1591_s13 }
 0xbef   :  { %850 = vrot.lane.b32.xlu1 %v1923_v8, %s1590_s4 }
 0xc60   :  { %v847_v7 = vpop.permute.xlu0 %846 }
 0xc61   :  { %v851_v9 = vpop.permute.xlu1 %850 }
 0xc62   :  { %v853_v10 = vsel %vm34_vm0, %v847_v7, %v851_v9 }
 0xc63   :  { %v854_v11 = vpack.c.bf16 %v853_v10, %v853_v10 }
 0xc65   :  { %1381 = vmatmul.mubr.msk.bf16.vlgmr.msra.gmra.mrb[20].mxu0 %vm357_vm1, %v854_v11 }
 0xc66   :  { %1103 = vmatpush1.bf16.msra.mxu0 %v1707_v57  ;;  %1134 = vmatprep.mubr.bf16.mxu0 %v1589_v4 }
 0xc67   :  { %1104 = vmatprep.subr.bf16.mxu0 %v1714_v58 }
 0xc6a   :  { %1105 = vmatpush1.bf16.msra.mxu0 %v1719_v59 }
 0xc6b   :  { %1106 = vmatprep.subr.bf16.mxu0 %v1732_v62 }
 0xc6e   :  { %1107 = vmatpush1.bf16.msra.mxu0 %v1737_v63 }
 0xc6f   :  { %1108 = vmatprep.subr.bf16.mxu0 %v1750_v2 }
 0xc72   :  { %1109 = vmatpush1.bf16.msra.mxu0 %v1755_v3 }
 0xd38   :  { %v892_v12 = vpop.f32.mrb[20].mxu0 }
 0xd39   :  { %v901_v13 = vadd.f32 %v892_v12, %v1821_v47  ;;  %v894_v48 = vpop.f32.mrb[21].mxu0 }
 0xd3a   :  { %v926_v14 = vadd.f32 %v894_v48, %v1818_v44  ;;  %v896_v16 = vpop.f32.mrb[22].mxu0 }
 0xd3b   :  { %1525 = vtanh.f32 %v901_v13  ;;  %v897_v17 = vpop.f32.mrb[23].mxu0  ;;  %v1382_v24 = vmul.f32 -1.442695, %v901_v13 }
 0xd3c   :  { %1527 = vtanh.f32 %v926_v14  ;;  %v1383_v25 = vmul.f32 -1.442695, %v926_v14 }
 0xd3d   :  { %1529 = vpow2.f32 %v1382_v24 }
 0xd3e   :  { %1531 = vpow2.f32 %v1383_v25 }
 0xd45   :  { %v1526_v22 = vpop.eup %1525 }
 0xd46   :  { %v1528_v18 = vpop.eup %1527  ;;  %911 = vrot.lane.b32.xlu0 %v1526_v22, %s1590_s4 }
 0xd47   :  { %936 = vrot.lane.b32.xlu1 %v1528_v18, %s1590_s4  ;;  %v1530_v26 = vpop.eup %1529 }
 0xd48   :  { %v1532_v31 = vpop.eup %1531  ;;  %v905_v47 = vadd.f32 1.0, %v1530_v26 }
 0xd49   :  { %v930_v34 = vadd.f32 1.0, %v1532_v31 }
 0xd4a   :  { %1533 = vrcp.f32 %v905_v47 }
 0xd4b   :  { %1535 = vrcp.f32 %v930_v34 }
 0xd54   :  { %v1534_v44 = vpop.eup %1533 }
 0xd55   :  { %v1536_v40 = vpop.eup %1535  ;;  %v909_v42 = vmul.f32 %v1534_v44, %v795_v61 }
 0xd56   :  { %v934_v51 = vmul.f32 %v1536_v40, %v820_v5 }
 0xdb8   :  { %v912_v36 = vpop.permute.xlu0 %911 }
 0xdb9   :  { %v914_v41 = vmul.f32 %v1534_v44, %v912_v36  ;;  %v937_v56 = vpop.permute.xlu1 %936 }
 0xdba   :  { %v939_v43 = vmul.f32 %v1536_v40, %v937_v56 }
 0xdbb   :  { %916 = vrot.lane.b32.xlu0 %v914_v41, %s1591_s13 }
 0xdbc   :  { %941 = vrot.lane.b32.xlu1 %v939_v43, %s1591_s13 }
 0xe2d   :  { %v917_v45 = vpop.permute.xlu0 %916 }
 0xe2e   :  { %v919_v46 = vadd.f32 %v917_v45, %v909_v42  ;;  %v942_v50 = vpop.permute.xlu1 %941 }
 0xe2f   :  { %v944_v28 = vadd.f32 %v942_v50, %v934_v51 }
 0xe30   :  { %1537 = vtanh.f32 %v919_v46 }
 0xe31   :  { %1539 = vtanh.f32 %v944_v28 }
 0xe3a   :  { %v1538_v53 = vpop.eup %1537 }
 0xe3b   :  { %v1540_v21 = vpop.eup %1539  ;;  %922 = vrot.lane.b32.xlu0 %v1538_v53, %s1590_s4 }
 0xe3c   :  { %947 = vrot.lane.b32.xlu1 %v1540_v21, %s1590_s4 }
 0xead   :  { %v923_v37 = vpop.permute.xlu0 %922 }
 0xeae   :  { %v1947_v55 = vmul.f32 %v1534_v44, %v923_v37  ;;  %v948_v54 = vpop.permute.xlu1 %947 }
 0xeaf   :  { %v1949_v1 = vmul.f32 %v1536_v40, %v948_v54 }
 0xeb0   :  { %968 = vrot.lane.b32.xlu0 %v1947_v55, %s1591_s13 }
 0xeb1   :  { %972 = vrot.lane.b32.xlu1 %v1949_v1, %s1590_s4 }
 0xf22   :  { %v969_v61 = vpop.permute.xlu0 %968 }
 0xf23   :  { %v973_v5 = vpop.permute.xlu1 %972 }
 0xf24   :  { %v975_v39 = vsel %vm34_vm0, %v969_v61, %v973_v5 }
 0xf25   :  { %v976_v32 = vpack.c.bf16 %v975_v39, %v975_v39 }
 0xf27   :  { %1388 = vmatmul.mubr.msk.bf16.vlgmr.msra.gmra.mrb[12].mxu1 %vm357_vm1, %v976_v32 }
 0xf28   :  { %1225 = vmatpush1.bf16.msra.mxu1 %v1707_v57  ;;  %1256 = vmatprep.mubr.bf16.mxu1 %v1589_v4 }
 0xf29   :  { %1226 = vmatprep.subr.bf16.mxu1 %v1714_v58 }
 0xf2c   :  { %1227 = vmatpush1.bf16.msra.mxu1 %v1719_v59 }
 0xf2d   :  { %1228 = vmatprep.subr.bf16.mxu1 %v1732_v62 }
 0xf30   :  { %1229 = vmatpush1.bf16.msra.mxu1 %v1737_v63 }
 0xf31   :  { %1230 = vmatprep.subr.bf16.mxu1 %v1750_v2 }
 0xf34   :  { %1231 = vmatpush1.bf16.msra.mxu1 %v1755_v3 }
 0xffa   :  { %v1014_v6 = vpop.f32.mrb[12].mxu1 }
 0xffb   :  { %v1023_v38 = vadd.f32 %v1014_v6, %v1825_v52  ;;  %v1016_v7 = vpop.f32.mrb[13].mxu1 }
 0xffc   :  { %v1048_v57 = vadd.f32 %v1016_v7, %v1814_v20  ;;  %v1018_v9 = vpop.f32.mrb[14].mxu1 }
 0xffd   :  { %1541 = vtanh.f32 %v1023_v38  ;;  %v1019_v4 = vpop.f32.mrb[15].mxu1  ;;  %v1389_v62 = vmul.f32 -1.442695, %v1023_v38 }
 0xffe   :  { %1543 = vtanh.f32 %v1048_v57  ;;  %v1390_v63 = vmul.f32 -1.442695, %v1048_v57 }
 0xfff   :  { %1545 = vpow2.f32 %v1389_v62 }
0x1000   :  { %1547 = vpow2.f32 %v1390_v63 }
0x1007   :  { %v1542_v58 = vpop.eup %1541 }
0x1008   :  { %v1544_v59 = vpop.eup %1543  ;;  %1033 = vrot.lane.b32.xlu0 %v1542_v58, %s1590_s4 }
0x1009   :  { %1058 = vrot.lane.b32.xlu1 %v1544_v59, %s1590_s4  ;;  %v1546_v2 = vpop.eup %1545 }
0x100a   :  { %v1548_v3 = vpop.eup %1547  ;;  %v1027_v52 = vadd.f32 1.0, %v1546_v2 }
0x100b   :  { %v1052_v10 = vadd.f32 1.0, %v1548_v3 }
0x100c   :  { %1549 = vrcp.f32 %v1027_v52 }
0x100d   :  { %1551 = vrcp.f32 %v1052_v10 }
0x1016   :  { %v1550_v20 = vpop.eup %1549 }
0x1017   :  { %v1552_v12 = vpop.eup %1551  ;;  %v1031_v16 = vmul.f32 %v1550_v20, %v919_v46 }
0x1018   :  { %v1056_v22 = vmul.f32 %v1552_v12, %v944_v28 }
0x107a   :  { %v1034_v11 = vpop.permute.xlu0 %1033 }
0x107b   :  { %v1036_v13 = vmul.f32 %v1550_v20, %v1034_v11  ;;  %v1059_v48 = vpop.permute.xlu1 %1058 }
0x107c   :  { %v1061_v14 = vmul.f32 %v1552_v12, %v1059_v48 }
0x107d   :  { %1038 = vrot.lane.b32.xlu0 %v1036_v13, %s1591_s13 }
0x107e   :  { %1063 = vrot.lane.b32.xlu1 %v1061_v14, %s1591_s13 }
0x10ef   :  { %v1039_v17 = vpop.permute.xlu0 %1038 }
0x10f0   :  { %v1041_v18 = vadd.f32 %v1039_v17, %v1031_v16  ;;  %v1064_v24 = vpop.permute.xlu1 %1063 }
0x10f1   :  { %v1066_v25 = vadd.f32 %v1064_v24, %v1056_v22 }
0x10f2   :  { %1553 = vtanh.f32 %v1041_v18 }
0x10f3   :  { %1555 = vtanh.f32 %v1066_v25 }
0x10fc   :  { %v1554_v26 = vpop.eup %1553 }
0x10fd   :  { %v1556_v31 = vpop.eup %1555  ;;  %1044 = vrot.lane.b32.xlu0 %v1554_v26, %s1590_s4 }
0x10fe   :  { %1069 = vrot.lane.b32.xlu1 %v1556_v31, %s1590_s4 }
0x116f   :  { %v1045_v47 = vpop.permute.xlu0 %1044 }
0x1170   :  { %v1973_v34 = vmul.f32 %v1550_v20, %v1045_v47  ;;  %v1070_v44 = vpop.permute.xlu1 %1069 }
0x1171   :  { %v1975_v36 = vmul.f32 %v1552_v12, %v1070_v44 }
0x1172   :  { %1090 = vrot.lane.b32.xlu0 %v1973_v34, %s1591_s13 }
0x1173   :  { %1094 = vrot.lane.b32.xlu1 %v1975_v36, %s1590_s4 }
0x11e4   :  { %v1091_v40 = vpop.permute.xlu0 %1090 }
0x11e5   :  { %v1095_v41 = vpop.permute.xlu1 %1094 }
0x11e6   :  { %v1097_v56 = vsel %vm34_vm0, %v1091_v40, %v1095_v41 }
0x11e7   :  { %v1098_v43 = vpack.c.bf16 %v1097_v56, %v1097_v56 }
0x11e9   :  { %1395 = vmatmul.mubr.msk.bf16.vlgmr.msra.gmra.mrb[24].mxu0 %vm357_vm1, %v1098_v43 }
0x12bc   :  { %v1136_v42 = vpop.f32.mrb[24].mxu0 }
0x12bd   :  { %v1145_v45 = vadd.f32 %v1136_v42, %v1829_v29  ;;  %v1138_v51 = vpop.f32.mrb[25].mxu0 }
0x12be   :  { %v1170_v46 = vadd.f32 %v1138_v51, %v1810_v35  ;;  %v1140_v50 = vpop.f32.mrb[26].mxu0 }
0x12bf   :  { %1557 = vtanh.f32 %v1145_v45  ;;  %v1141_v28 = vpop.f32.mrb[27].mxu0  ;;  %v1396_v37 = vmul.f32 -1.442695, %v1145_v45 }
0x12c0   :  { %1559 = vtanh.f32 %v1170_v46  ;;  %v1397_v54 = vmul.f32 -1.442695, %v1170_v46 }
0x12c1   :  { %1561 = vpow2.f32 %v1396_v37 }
0x12c2   :  { %1563 = vpow2.f32 %v1397_v54 }
0x12c9   :  { %v1558_v53 = vpop.eup %1557 }
0x12ca   :  { %v1560_v21 = vpop.eup %1559  ;;  %1155 = vrot.lane.b32.xlu0 %v1558_v53, %s1590_s4 }
0x12cb   :  { %1180 = vrot.lane.b32.xlu1 %v1560_v21, %s1590_s4  ;;  %v1562_v61 = vpop.eup %1561 }
0x12cc   :  { %v1564_v5 = vpop.eup %1563  ;;  %v1149_v29 = vadd.f32 1.0, %v1562_v61 }
0x12cd   :  { %v1174_v39 = vadd.f32 1.0, %v1564_v5 }
0x12ce   :  { %1565 = vrcp.f32 %v1149_v29  ;;  %v1408_v29 = vpack.c.bf16 %v1840_v27, %v1840_v27  ;;  %v1412_v27 = vpack.c.bf16 %v1894_v49, %v1894_v49  ;;  %v1416_v49 = vpack.c.bf16 %v1947_v55, %v1947_v55 }
0x12cf   :  { %1567 = vrcp.f32 %v1174_v39  ;;  %v1409_v39 = vpack.c.bf16 %v1844_v33, %v1844_v33  ;;  %v1413_v33 = vpack.c.bf16 %v1896_v15, %v1896_v15  ;;  %v1417_v15 = vpack.c.bf16 %v1949_v1, %v1949_v1 }
0x12d8   :  { %v1566_v35 = vpop.eup %1565 }
0x12d9   :  { %v1568_v6 = vpop.eup %1567  ;;  %v1153_v9 = vmul.f32 %v1566_v35, %v1041_v18 }
0x12da   :  { %v1178_v58 = vmul.f32 %v1568_v6, %v1066_v25 }
0x133c   :  { %v1156_v32 = vpop.permute.xlu0 %1155 }
0x133d   :  { %v1158_v38 = vmul.f32 %v1566_v35, %v1156_v32  ;;  %v1181_v7 = vpop.permute.xlu1 %1180  ;;  %v1411_v32 = vpack.c.bf16 %v1869_v23, %v1869_v23  ;;  %v1415_v23 = vpack.c.bf16 %v1923_v8, %v1923_v8  ;;  %v1419_v8 = vpack.c.bf16 %v1975_v36, %v1975_v36 }
0x133e   :  { %v1183_v57 = vmul.f32 %v1568_v6, %v1181_v7 }
0x133f   :  { %1160 = vrot.lane.b32.xlu0 %v1158_v38, %s1591_s13 }
0x1340   :  { %1185 = vrot.lane.b32.xlu1 %v1183_v57, %s1591_s13 }
0x13b1   :  { %v1161_v4 = vpop.permute.xlu0 %1160 }
0x13b2   :  { %v1163_v59 = vadd.f32 %v1161_v4, %v1153_v9  ;;  %v1186_v62 = vpop.permute.xlu1 %1185 }
0x13b3   :  { %v1188_v63 = vadd.f32 %v1186_v62, %v1178_v58 }
0x13b4   :  { %1569 = vtanh.f32 %v1163_v59 }
0x13b5   :  { %1571 = vtanh.f32 %v1188_v63 }
0x13be   :  { %v1570_v2 = vpop.eup %1569 }
0x13bf   :  { %v1572_v3 = vpop.eup %1571  ;;  %1166 = vrot.lane.b32.xlu0 %v1570_v2, %s1590_s4 }
0x13c0   :  { %1191 = vrot.lane.b32.xlu1 %v1572_v3, %s1590_s4 }
0x1431   :  { %v1167_v52 = vpop.permute.xlu0 %1166 }
0x1432   :  { %v1991_v10 = vmul.f32 %v1566_v35, %v1167_v52  ;;  %v1192_v20 = vpop.permute.xlu1 %1191  ;;  %v1410_v35 = vpack.c.bf16 %v1867_v19, %v1867_v19  ;;  %v1414_v19 = vpack.c.bf16 %v1921_v60, %v1921_v60  ;;  %v1418_v60 = vpack.c.bf16 %v1973_v34, %v1973_v34 }
0x1433   :  { %v1993_v11 = vmul.f32 %v1568_v6, %v1192_v20 }
0x1434   :  { %1212 = vrot.lane.b32.xlu0 %v1991_v10, %s1591_s13  ;;  %v1420_v55 = vpack.c.bf16 %v1991_v10, %v1991_v10 }
0x1435   :  { %1216 = vrot.lane.b32.xlu1 %v1993_v11, %s1590_s4  ;;  %v1421_v1 = vpack.c.bf16 %v1993_v11, %v1993_v11 }
0x14a6   :  { %v1213_v12 = vpop.permute.xlu0 %1212 }
0x14a7   :  { %v1217_v13 = vpop.permute.xlu1 %1216 }
0x14a8   :  { %v1219_v48 = vsel %vm34_vm0, %v1213_v12, %v1217_v13 }
0x14a9   :  { %v1220_v14 = vpack.c.bf16 %v1219_v48, %v1219_v48 }
0x14ab   :  { %1402 = vmatmul.mubr.msk.bf16.vlgmr.msra.gmra.mrb[16].mxu1 %vm357_vm1, %v1220_v14 }
0x157e   :  { %v1258_v16 = vpop.f32.mrb[16].mxu1 }
0x157f   :  { %v1267_v17 = vadd.f32 %v1258_v16, %v1833_v0  ;;  %v1260_v22 = vpop.f32.mrb[17].mxu1 }
0x1580   :  { %v1292_v18 = vadd.f32 %v1260_v22, %v1806_v30  ;;  %v1262_v24 = vpop.f32.mrb[18].mxu1 }
0x1581   :  { %1573 = vtanh.f32 %v1267_v17  ;;  %v1263_v25 = vpop.f32.mrb[19].mxu1  ;;  %v1403_v47 = vmul.f32 -1.442695, %v1267_v17 }
0x1582   :  { %1575 = vtanh.f32 %v1292_v18  ;;  %v1404_v44 = vmul.f32 -1.442695, %v1292_v18 }
0x1583   :  { %1577 = vpow2.f32 %v1403_v47 }
0x1584   :  { %1579 = vpow2.f32 %v1404_v44 }
0x158b   :  { %v1574_v26 = vpop.eup %1573 }
0x158c   :  { %v1576_v31 = vpop.eup %1575  ;;  %1277 = vrot.lane.b32.xlu0 %v1574_v26, %s1590_s4 }
0x158d   :  { %1302 = vrot.lane.b32.xlu1 %v1576_v31, %s1590_s4  ;;  %v1578_v40 = vpop.eup %1577 }
0x158e   :  { %v1580_v41 = vpop.eup %1579  ;;  %v1271_v0 = vadd.f32 1.0, %v1578_v40 }
0x158f   :  { %v1296_v56 = vadd.f32 1.0, %v1580_v41 }
0x1590   :  { %1581 = vrcp.f32 %v1271_v0 }
0x1591   :  { %1583 = vrcp.f32 %v1296_v56 }
0x159a   :  { %v1582_v30 = vpop.eup %1581 }
0x159b   :  { %v1584_v42 = vpop.eup %1583  ;;  %v1275_v50 = vmul.f32 %v1582_v30, %v1163_v59 }
0x159c   :  { %v1300_v53 = vmul.f32 %v1584_v42, %v1188_v63 }
0x15fe   :  { %v1278_v43 = vpop.permute.xlu0 %1277 }
0x15ff   :  { %v1280_v45 = vmul.f32 %v1582_v30, %v1278_v43  ;;  %v1303_v51 = vpop.permute.xlu1 %1302 }
0x1600   :  { %v1305_v46 = vmul.f32 %v1584_v42, %v1303_v51 }
0x1601   :  { %1282 = vrot.lane.b32.xlu0 %v1280_v45, %s1591_s13 }
0x1602   :  { %1307 = vrot.lane.b32.xlu1 %v1305_v46, %s1591_s13 }
0x1673   :  { %v1283_v28 = vpop.permute.xlu0 %1282 }
0x1674   :  { %v1285_v21 = vadd.f32 %v1283_v28, %v1275_v50  ;;  %v1308_v37 = vpop.permute.xlu1 %1307 }
0x1675   :  { %v1310_v54 = vadd.f32 %v1308_v37, %v1300_v53 }
0x1676   :  { %1585 = vtanh.f32 %v1285_v21 }
0x1677   :  { %1587 = vtanh.f32 %v1310_v54 }
0x1680   :  { %v1586_v61 = vpop.eup %1585 }
0x1681   :  { %v1588_v5 = vpop.eup %1587  ;;  %1288 = vrot.lane.b32.xlu0 %v1586_v61, %s1590_s4 }
0x1682   :  { %1313 = vrot.lane.b32.xlu1 %v1588_v5, %s1590_s4 }
0x1685   :  { %458 = vrot.lane.b32.xlu0 %v1408_v29, %s1591_s13 }
0x1686   :  { %467 = vrot.lane.b32.xlu1 %v1409_v39, %s1590_s4 }
0x1689   :  { %583 = vrot.lane.b32.xlu0 %v1410_v35, %s1591_s13 }
0x168a   :  { %592 = vrot.lane.b32.xlu1 %v1411_v32, %s1590_s4 }
0x168d   :  { %707 = vrot.lane.b32.xlu0 %v1412_v27, %s1591_s13 }
0x168e   :  { %716 = vrot.lane.b32.xlu1 %v1413_v33, %s1590_s4 }
0x1691   :  { %831 = vrot.lane.b32.xlu0 %v1414_v19, %s1591_s13 }
0x1692   :  { %840 = vrot.lane.b32.xlu1 %v1415_v23, %s1590_s4 }
0x1695   :  { %955 = vrot.lane.b32.xlu0 %v1416_v49, %s1591_s13 }
0x1696   :  { %963 = vrot.lane.b32.xlu1 %v1417_v15, %s1590_s4 }
0x1699   :  { %1077 = vrot.lane.b32.xlu0 %v1418_v60, %s1591_s13 }
0x169a   :  { %1085 = vrot.lane.b32.xlu1 %v1419_v8, %s1590_s4 }
0x169d   :  { %1199 = vrot.lane.b32.xlu0 %v1420_v55, %s1591_s13 }
0x169e   :  { %1207 = vrot.lane.b32.xlu1 %v1421_v1, %s1590_s4 }
0x16f3   :  { %v1289_v6 = vpop.permute.xlu0 %1288 }
0x16f4   :  { %v1291_v38 = vmul.f32 %v1582_v30, %v1289_v6  ;;  %v1314_v34 = vpop.permute.xlu1 %1313 }
0x16f5   :  { %v1316_v7 = vmul.f32 %v1584_v42, %v1314_v34 }
0x16f6   :  { %v1422_v36 = vpack.c.bf16 %v1291_v38, %v1291_v38 }
0x16f7   :  { %v1423_v57 = vpack.c.bf16 %v1316_v7, %v1316_v7  ;;  %v459_v9 = vpop.permute.xlu0 %458 }
0x16f8   :  { %462 = vst.msk [vmem:[%s2123_s6] sm:$0xf] %vm461_vm2, %v459_v9  ;;  %1321 = vrot.lane.b32.xlu0 %v1422_v36, %s1591_s13  ;;  %v468_v4 = vpop.permute.xlu1 %467 }
0x16f9   :  { %1359 = vst.msk [vmem:[%s2123_s6 + $0x1c] sm:$0xf] %vm471_vm3, %v468_v4  ;;  %1329 = vrot.lane.b32.xlu1 %v1423_v57, %s1590_s4 }
0x16fb   :  { %v584_v58 = vpop.permute.xlu0 %583 }
0x16fc   :  { %1364 = vst.msk [vmem:[%s2123_s6 + $0x4] sm:$0xf] %vm461_vm2, %v584_v58  ;;  %v593_v59 = vpop.permute.xlu1 %592 }
0x16fd   :  { %1366 = vst.msk [vmem:[%s2123_s6 + $0x18] sm:$0xf] %vm471_vm3, %v593_v59 }
0x16ff   :  { %v708_v62 = vpop.permute.xlu0 %707 }
0x1700   :  { %1371 = vst.msk [vmem:[%s2123_s6 + $0x8] sm:$0xf] %vm461_vm2, %v708_v62  ;;  %v717_v63 = vpop.permute.xlu1 %716 }
0x1701   :  { %1373 = vst.msk [vmem:[%s2123_s6 + $0x14] sm:$0xf] %vm471_vm3, %v717_v63 }
0x1703   :  { %v832_v2 = vpop.permute.xlu0 %831 }
0x1704   :  { %1378 = vst.msk [vmem:[%s2123_s6 + $0xc] sm:$0xf] %vm461_vm2, %v832_v2  ;;  %v841_v3 = vpop.permute.xlu1 %840 }
0x1705   :  { %1380 = vst.msk [vmem:[%s2123_s6 + $0x10] sm:$0xf] %vm471_vm3, %v841_v3 }
0x1707   :  { %v956_v52 = vpop.permute.xlu0 %955 }
0x1708   :  { %1385 = vst.msk [vmem:[%s2123_s6 + $0x10] sm:$0xf] %vm461_vm2, %v956_v52  ;;  %v964_v10 = vpop.permute.xlu1 %963 }
0x1709   :  { %1387 = vst.msk [vmem:[%s2123_s6 + $0xc] sm:$0xf] %vm471_vm3, %v964_v10 }
0x170b   :  { %v1078_v20 = vpop.permute.xlu0 %1077 }
0x170c   :  { %1392 = vst.msk [vmem:[%s2123_s6 + $0x14] sm:$0xf] %vm461_vm2, %v1078_v20  ;;  %v1086_v11 = vpop.permute.xlu1 %1085 }
0x170d   :  { %1394 = vst.msk [vmem:[%s2123_s6 + $0x8] sm:$0xf] %vm471_vm3, %v1086_v11 }
0x170f   :  { %v1200_v12 = vpop.permute.xlu0 %1199 }
0x1710   :  { %1399 = vst.msk [vmem:[%s2123_s6 + $0x18] sm:$0xf] %vm461_vm2, %v1200_v12  ;;  %v1208_v13 = vpop.permute.xlu1 %1207 }
0x1711   :  { %1401 = vst.msk [vmem:[%s2123_s6 + $0x4] sm:$0xf] %vm471_vm3, %v1208_v13 }
0x176a   :  { %v1322_v48 = vpop.permute.xlu0 %1321 }
0x176b   :  { %1406 = vst.msk [vmem:[%s2123_s6 + $0x1c] sm:$0xf] %vm461_vm2, %v1322_v48  ;;  %v1330_v14 = vpop.permute.xlu1 %1329 }
0x176c   :  { %1332 = vst.msk [vmem:[%s2123_s6] sm:$0xf] %vm471_vm3, %v1330_v14 }

</bundles_post_ra>
